<compile_context>
chip_gen: v7x
topology: tpu7x:2x2x1
jax: 0.10.0
libtpu: 0.0.40
codegen_flags: <defaults>
</compile_context>

<pallas_src>
import functools

import jax
import jax.numpy as jnp
from jax.experimental import pallas as pl
from jax.experimental.pallas import tpu as pltpu

EPS = 1e-5
LANE = 128
_TILE_BUDGET_BYTES = 16 * 1024 * 1024   # M-tiled buffers incl. double-buffering
_VMEM_LIMIT_BYTES = 48 * 1024 * 1024    # < v7x's 64 MiB physical VMEM per TC


# --------------------------------------------------------------------------
# Pallas kernels
# --------------------------------------------------------------------------
def _matmul_bias_kernel(x_ref, w_ref, b_ref, o_ref, *, relu):
    """(tm, K)@(K, C) in bf16 -> f32 acc -> +bias (BN scale folded in w) -> ReLU."""
    acc = jnp.dot(x_ref[...], w_ref[...], preferred_element_type=jnp.float32)
    y = acc + b_ref[...]
    if relu:
        y = jnp.maximum(y, 0.0)
    o_ref[...] = y.astype(o_ref.dtype)


def _matmul_bias_add_relu_kernel(x_ref, w_ref, b_ref, r_ref, o_ref):
    """conv3: matmul -> +bias -> +residual (f32) -> ReLU."""
    acc = jnp.dot(x_ref[...], w_ref[...], preferred_element_type=jnp.float32)
    y = acc + b_ref[...] + r_ref[...].astype(jnp.float32)
    o_ref[...] = jnp.maximum(y, 0.0).astype(o_ref.dtype)


def _conv1_shortcut_kernel(x_ref, w1_ref, b1_ref, wsc_ref, bsc_ref,
                           o1_ref, osc_ref):
    """Fused conv1(1x1)+BN+ReLU and projection-shortcut(1x1)+BN sharing one x tile."""
    x = x_ref[...]
    h = jnp.dot(x, w1_ref[...], preferred_element_type=jnp.float32) + b1_ref[...]
    o1_ref[...] = jnp.maximum(h, 0.0).astype(o1_ref.dtype)
    s = jnp.dot(x, wsc_ref[...], preferred_element_type=jnp.float32) + bsc_ref[...]
    osc_ref[...] = s.astype(osc_ref.dtype)


def _conv3x3_bias_relu_kernel(xp_ref, w_ref, b_ref, o_ref, *, h_out, w_out):
    """3x3 conv (stride=1, pad already applied) as 9 in-VMEM shifted-window taps
    accumulated in f32 -> +bias -> ReLU.  No HBM im2col tensor."""
    c = w_ref.shape[-1]
    acc = jnp.zeros((h_out * w_out, c), jnp.float32)
    for kh in range(3):
        for kw in range(3):
            win = xp_ref[0, kh:kh + h_out, kw:kw + w_out, :]
            acc = acc + jnp.dot(win.reshape(h_out * w_out, c),
                                w_ref[kh * 3 + kw],
                                preferred_element_type=jnp.float32)
    y = jnp.maximum(acc + b_ref[...], 0.0)
    o_ref[...] = y.reshape(1, h_out, w_out, c).astype(o_ref.dtype)


# --------------------------------------------------------------------------
# Wrappers
# --------------------------------------------------------------------------
def _pick_tm(m, row_bytes, budget=_TILE_BUDGET_BYTES):
    """Largest row tile whose double-buffered M-tiled buffers fit the VMEM
    budget; prefer grid >= 4 so v7x's two TensorCores both get pipelined work."""
    candidates = [tm for tm in (512, 256, 128, 64, 32, 16, 8) if m % tm == 0]
    if not candidates:
        return m
    for min_grid in (4, 2, 1):
        for tm in candidates:
            if 2 * tm * row_bytes <= budget and m // tm >= min_grid:
                return tm
    return candidates[-1]


def _compiler_params():
    return pltpu.CompilerParams(dimension_semantics=("parallel",),
                                vmem_limit_bytes=_VMEM_LIMIT_BYTES)


def _nbytes(a):
    return a.size * a.dtype.itemsize


def matmul_bias(x, w, b, *, relu, residual=None, out_dtype=jnp.bfloat16):
    """x: (M, K) bf16, w: (K, C) bf16 (BN scale pre-folded), b: (1, C) f32."""
    m, k = x.shape
    c = w.shape[1]
    out_bytes = jnp.dtype(out_dtype).itemsize
    row_bytes = (k * x.dtype.itemsize + c * out_bytes
                 + (c * residual.dtype.itemsize if residual is not None else 0))
    tm = _pick_tm(m, row_bytes)

    in_specs = [
        pl.BlockSpec((tm, k), lambda i: (i, 0)),
        pl.BlockSpec((k, c), lambda i: (0, 0)),
        pl.BlockSpec((1, c), lambda i: (0, 0)),
    ]
    args = [x, w, b]
    bytes_accessed = _nbytes(x) + _nbytes(w) + _nbytes(b) + m * c * out_bytes
    if residual is None:
        kernel = functools.partial(_matmul_bias_kernel, relu=relu)
    else:
        kernel = _matmul_bias_add_relu_kernel
        in_specs.append(pl.BlockSpec((tm, c), lambda i: (i, 0)))
        args.append(residual)
        bytes_accessed += _nbytes(residual)

    return pl.pallas_call(
        kernel,
        out_shape=jax.ShapeDtypeStruct((m, c), out_dtype),
        grid=(m // tm,),
        in_specs=in_specs,
        out_specs=pl.BlockSpec((tm, c), lambda i: (i, 0)),
        compiler_params=_compiler_params(),
        cost_estimate=pl.CostEstimate(flops=2 * m * k * c, transcendentals=0,
                                      bytes_accessed=bytes_accessed),
    )(*args)


def conv1_shortcut(x, w1, b1, wsc, bsc):
    """Fused conv1 + projection shortcut (stride=1): two outputs sharing the x tile."""
    m, k = x.shape
    c1 = w1.shape[1]
    csc = wsc.shape[1]
    row_bytes = k * x.dtype.itemsize + 2 * (c1 + csc)
    tm = _pick_tm(m, row_bytes)
    bytes_accessed = (_nbytes(x) + _nbytes(w1) + _nbytes(wsc) + _nbytes(b1)
                      + _nbytes(bsc) + m * (c1 + csc) * 2)
    return pl.pallas_call(
        _conv1_shortcut_kernel,
        out_shape=(jax.ShapeDtypeStruct((m, c1), jnp.bfloat16),
                   jax.ShapeDtypeStruct((m, csc), jnp.bfloat16)),
        grid=(m // tm,),
        in_specs=[
            pl.BlockSpec((tm, k), lambda i: (i, 0)),
            pl.BlockSpec((k, c1), lambda i: (0, 0)),
            pl.BlockSpec((1, c1), lambda i: (0, 0)),
            pl.BlockSpec((k, csc), lambda i: (0, 0)),
            pl.BlockSpec((1, csc), lambda i: (0, 0)),
        ],
        out_specs=(pl.BlockSpec((tm, c1), lambda i: (i, 0)),
                   pl.BlockSpec((tm, csc), lambda i: (i, 0))),
        compiler_params=_compiler_params(),
        cost_estimate=pl.CostEstimate(flops=2 * m * k * (c1 + csc),
                                      transcendentals=0,
                                      bytes_accessed=bytes_accessed),
    )(x, w1, b1, wsc, bsc)


def conv3x3_bias_relu(xp, w_taps, b):
    """xp: (N, H+2, W+2, C) bf16 padded plane; w_taps: (9, C, C) bf16; b: (1, C) f32."""
    n, hp, wp, c = xp.shape
    h_out, w_out = hp - 2, wp - 2
    bytes_accessed = (_nbytes(xp) + _nbytes(w_taps) + _nbytes(b)
                      + n * h_out * w_out * c * 2)
    return pl.pallas_call(
        functools.partial(_conv3x3_bias_relu_kernel, h_out=h_out, w_out=w_out),
        out_shape=jax.ShapeDtypeStruct((n, h_out, w_out, c), jnp.bfloat16),
        grid=(n,),
        in_specs=[
            pl.BlockSpec((1, hp, wp, c), lambda i: (i, 0, 0, 0)),
            pl.BlockSpec((9, c, c), lambda i: (0, 0, 0)),
            pl.BlockSpec((1, c), lambda i: (0, 0)),
        ],
        out_specs=pl.BlockSpec((1, h_out, w_out, c), lambda i: (i, 0, 0, 0)),
        compiler_params=_compiler_params(),
        cost_estimate=pl.CostEstimate(flops=2 * n * h_out * w_out * 9 * c * c,
                                      transcendentals=0,
                                      bytes_accessed=bytes_accessed),
    )(xp, w_taps, b)


# --------------------------------------------------------------------------
# Parameter construction (deterministic, synthetic) and folding helpers
# --------------------------------------------------------------------------
def init_params(key, in_ch, mid_ch, out_ch):
    def bn_params(k, c):
        k1, k2, k3, k4 = jax.random.split(k, 4)
        gamma = jax.random.uniform(k1, (c,), jnp.float32, 0.5, 1.5)
        beta = 0.1 * jax.random.normal(k2, (c,), jnp.float32)
        mean = 0.1 * jax.random.normal(k3, (c,), jnp.float32)
        var = jax.random.uniform(k4, (c,), jnp.float32, 0.5, 1.5)
        return dict(gamma=gamma, beta=beta, mean=mean, var=var)

    keys = jax.random.split(key, 8)
    p = {
        # PyTorch OIHW conv weights
        "w1": 0.1 * jax.random.normal(keys[0], (mid_ch, in_ch, 1, 1), jnp.float32),
        "w2": 0.1 * jax.random.normal(keys[1], (mid_ch, mid_ch, 3, 3), jnp.float32),
        "w3": 0.1 * jax.random.normal(keys[2], (out_ch, mid_ch, 1, 1), jnp.float32),
        "bn1": bn_params(keys[3], mid_ch),
        "bn2": bn_params(keys[4], mid_ch),
        "bn3": bn_params(keys[5], out_ch),
    }
    if in_ch != out_ch:
        p["wsc"] = 0.1 * jax.random.normal(keys[6], (out_ch, in_ch, 1, 1), jnp.float32)
        p["bnsc"] = bn_params(keys[7], out_ch)
    return p


def _fold_bn(bn):
    s = bn["gamma"] / jnp.sqrt(bn["var"] + EPS)
    b = bn["beta"] - bn["mean"] * s
    return s, b


def _round_up(x, m):
    return ((x + m - 1) // m) * m


def _prep_1x1(w_oihw, bn, cin_p, cout_p):
    """1x1 OIHW conv weight + BN -> scale-folded, channel-padded bf16 (cin_p, cout_p)
    weight and f32 (1, cout_p) bias."""
    cout, cin = w_oihw.shape[:2]
    s, b = _fold_bn(bn)
    w = w_oihw.reshape(cout, cin).T * s[None, :]
    w = jnp.pad(w, ((0, cin_p - cin), (0, cout_p - cout)))
    b = jnp.pad(b, (0, cout_p - cout)).reshape(1, cout_p)
    return w.astype(jnp.bfloat16), b.astype(jnp.float32)


def _prep_3x3(w_oihw, bn, c_p):
    """3x3 OIHW conv weight + BN -> (9, c_p, c_p) bf16 taps (kh*3+kw) and (1, c_p) bias."""
    cout, cin = w_oihw.shape[:2]
    s, b = _fold_bn(bn)
    w = jnp.transpose(w_oihw, (2, 3, 1, 0)) * s[None, None, None, :]  # (3,3,cin,cout)
    w = jnp.pad(w, ((0, 0), (0, 0), (0, c_p - cin), (0, c_p - cout)))
    w = w.reshape(9, c_p, c_p)
    b = jnp.pad(b, (0, c_p - cout)).reshape(1, c_p)
    return w.astype(jnp.bfloat16), b.astype(jnp.float32)


# --------------------------------------------------------------------------
# Bottleneck forward (Pallas path)
# --------------------------------------------------------------------------
def bottleneck_forward(x_nchw, params, *, stride=1):
    n, cin, h, w = x_nchw.shape
    cmid = params["w1"].shape[0]
    cout = params["w3"].shape[0]
    has_proj = "wsc" in params
    if stride != 1 and not has_proj:
        # PyTorch's identity shortcut would shape-mismatch at the add too.
        raise ValueError("identity shortcut requires stride == 1")

    cin_p = _round_up(cin, LANE)
    cmid_p = _round_up(cmid, LANE)
    cout_p = _round_up(cout, LANE)

    h_out = (h + 2 - 3) // stride + 1
    w_out = (w + 2 - 3) // stride + 1

    # NCHW -> NHWC, lane-dense channel padding, bf16
    x = jnp.transpose(x_nchw, (0, 2, 3, 1))
    x = jnp.pad(x, ((0, 0), (0, 0), (0, 0), (0, cin_p - cin))).astype(jnp.bfloat16)
    x_flat = x.reshape(n * h * w, cin_p)

    w1, b1 = _prep_1x1(params["w1"], params["bn1"], cin_p, cmid_p)
    w2, b2 = _prep_3x3(params["w2"], params["bn2"], cmid_p)
    w3, b3 = _prep_1x1(params["w3"], params["bn3"], cmid_p, cout_p)

    # ---- conv1 (1x1 s=1) + BN + ReLU, fused with projection shortcut -----
    if has_proj:
        wsc, bsc = _prep_1x1(params["wsc"], params["bnsc"], cin_p, cout_p)
        if stride == 1:
            h1_flat, residual = conv1_shortcut(x_flat, w1, b1, wsc, bsc)
        else:
            h1_flat = matmul_bias(x_flat, w1, b1, relu=True)
            # TODO(synk): fold the shortcut stride into the kernel's DMA
            # (strided window) instead of a strided XLA slice copy.
            x_s = x[:, ::stride, ::stride, :].reshape(n * h_out * w_out, cin_p)
            residual = matmul_bias(x_s, wsc, bsc, relu=False)
    else:
        h1_flat = matmul_bias(x_flat, w1, b1, relu=True)
        residual = x_flat  # identity shortcut (stride == 1 enforced above)

    # ---- conv2 (3x3, stride, pad=1) + BN + ReLU ---------------------------
    h1 = h1_flat.reshape(n, h, w, cmid_p)
    xp = jnp.pad(h1, ((0, 0), (1, 1), (1, 1), (0, 0)))
    if stride == 1:
        # In-kernel im2col: 9 shifted-window taps accumulated in VMEM (f32).
        h2 = conv3x3_bias_relu(xp, w2, b2).reshape(n * h_out * w_out, cmid_p)
    else:
        # TODO(synk): stride>1 falls back to XLA-glue im2col; fold strided
        # window reads into the kernel DMA to remove this HBM round trip.
        cols = []
        for kh in range(3):
            for kw in range(3):
                cols.append(xp[:, kh:kh + (h_out - 1) * stride + 1:stride,
                                  kw:kw + (w_out - 1) * stride + 1:stride, :])
        patches = jnp.concatenate(cols, axis=-1).reshape(
            n * h_out * w_out, 9 * cmid_p)
        h2 = matmul_bias(patches, w2.reshape(9 * cmid_p, cmid_p), b2, relu=True)

    # ---- conv3 (1x1 s=1) + BN + residual add + ReLU (fused) ---------------
    y = matmul_bias(h2, w3, b3, relu=True, residual=residual,
                    out_dtype=jnp.float32)
    y = y.reshape(n, h_out, w_out, cout_p)[..., :cout]
    return jnp.transpose(y, (0, 3, 1, 2))  # back to NCHW


# --------------------------------------------------------------------------
# Pure-JAX f32 reference (mimics the PyTorch module) for verification
# --------------------------------------------------------------------------
def reference_forward(x, params, *, stride=1):
    def conv(x, w, s, pad):
        return jax.lax.conv_general_dilated(
            x, w, (s, s), pad, dimension_numbers=("NCHW", "OIHW", "NCHW"))

    def bn(x, p):
        sc = (p["gamma"] / jnp.sqrt(p["var"] + EPS))[None, :, None, None]
        return (x - p["mean"][None, :, None, None]) * sc + p["beta"][None, :, None, None]

    if "wsc" in params:
        residual = bn(conv(x, params["wsc"], stride, [(0, 0), (0, 0)]), params["bnsc"])
    else:
        residual = x
    h1 = jax.nn.relu(bn(conv(x, params["w1"], 1, [(0, 0), (0, 0)]), params["bn1"]))
    h2 = jax.nn.relu(bn(conv(h1, params["w2"], stride, [(1, 1), (1, 1)]), params["bn2"]))
    h3 = bn(conv(h2, params["w3"], 1, [(0, 0), (0, 0)]), params["bn3"])
    return jax.nn.relu(h3 + residual)


# --------------------------------------------------------------------------
if __name__ == "__main__":
    key = jax.random.PRNGKey(0)

    cases = [
        # (N, Cin, Cmid, Cout, H, W, stride)
        (2, 32, 16, 64, 16, 16, 1),  # projection shortcut, fused conv1+shortcut
        (2, 64, 16, 64, 8, 8, 1),    # identity shortcut
        (2, 32, 16, 64, 16, 16, 2),  # strided downsample block (glue im2col path)
    ]
    for idx, (n, cin, cmid, cout, hh, ww, stride) in enumerate(cases):
        k_x, k_p = jax.random.split(jax.random.fold_in(key, idx))
        x = jax.random.normal(k_x, (n, cin, hh, ww), jnp.float32)
        params = init_params(k_p, cin, cmid, cout)

        fwd = jax.jit(functools.partial(bottleneck_forward, stride=stride))
        out = jax.block_until_ready(fwd(x, params))
        ref = reference_forward(x, params, stride=stride)

        assert out.shape == ref.shape, (idx, out.shape, ref.shape)
        max_err = float(jnp.max(jnp.abs(out - ref)))
        # bf16 MXU inputs (f32 accumulation) -> loosened tolerance vs f32 reference.
        assert jnp.allclose(out, ref, rtol=5e-2, atol=5e-2), (idx, max_err)

    print("KERNEL_OK")
</pallas_src>

<mosaic_0001>
module attributes {stable_mosaic.version = 11 : i64} {
  func.func @_conv1_shortcut_kernel(%arg0: i32, %arg1: memref<128x128xbf16, #tpu.memory_space<vmem>>, %arg2: memref<128x128xbf16, #tpu.memory_space<vmem>>, %arg3: memref<1x128xf32, #tpu.memory_space<vmem>>, %arg4: memref<128x128xbf16, #tpu.memory_space<vmem>>, %arg5: memref<1x128xf32, #tpu.memory_space<vmem>>, %arg6: memref<128x128xbf16, #tpu.memory_space<vmem>>, %arg7: memref<128x128xbf16, #tpu.memory_space<vmem>>) attributes {dimension_semantics = [#tpu.dimension_semantics<parallel>], iteration_bounds = array<i64: 4>, scalar_prefetch = 0 : i64, scratch_operands = 0 : i64, tpu.core_type = #tpu.core_type<tc>, window_params = [{transform_indices = @transform_0, window_bounds = array<i64: 128, 128>}, {pipeline_mode = #tpu.pipeline_mode<synchronous>, transform_indices = @transform_1, window_bounds = array<i64: 128, 128>}, {pipeline_mode = #tpu.pipeline_mode<synchronous>, transform_indices = @transform_2, window_bounds = array<i64: 1, 128>}, {pipeline_mode = #tpu.pipeline_mode<synchronous>, transform_indices = @transform_3, window_bounds = array<i64: 128, 128>}, {pipeline_mode = #tpu.pipeline_mode<synchronous>, transform_indices = @transform_4, window_bounds = array<i64: 1, 128>}, {transform_indices = @transform_5, window_bounds = array<i64: 128, 128>}, {transform_indices = @transform_6, window_bounds = array<i64: 128, 128>}]} {
    %c0 = arith.constant 0 : index
    %c0_0 = arith.constant 0 : index
    %0 = vector.load %arg1[%c0, %c0_0] : memref<128x128xbf16, #tpu.memory_space<vmem>>, vector<128x128xbf16>
    %c0_1 = arith.constant 0 : index
    %c0_2 = arith.constant 0 : index
    %1 = vector.load %arg2[%c0_1, %c0_2] : memref<128x128xbf16, #tpu.memory_space<vmem>>, vector<128x128xbf16>
    %cst = arith.constant dense<0.000000e+00> : vector<128x128xf32>
    %2 = tpu.matmul %0, %1, %cst {dimension_numbers = #tpu.dot_dimension_numbers<[1], [0], [0], [1], [0, 0, 1, 1], [], []>} : vector<128x128xbf16>, vector<128x128xbf16>, vector<128x128xf32> -> vector<128x128xf32>
    %c0_3 = arith.constant 0 : index
    %c0_4 = arith.constant 0 : index
    %3 = vector.load %arg3[%c0_3, %c0_4] : memref<1x128xf32, #tpu.memory_space<vmem>>, vector<1x128xf32>
    %4 = vector.broadcast %3 : vector<1x128xf32> to vector<128x128xf32>
    %5 = arith.addf %2, %4 : vector<128x128xf32>
    %cst_5 = arith.constant 0.000000e+00 : f32
    %6 = vector.broadcast %cst_5 : f32 to vector<128x128xf32>
    %7 = arith.maximumf %5, %6 : vector<128x128xf32>
    %8 = arith.truncf %7 : vector<128x128xf32> to vector<128x128xbf16>
    %c0_6 = arith.constant 0 : index
    %c0_7 = arith.constant 0 : index
    %9 = vector.load %arg6[%c0_6, %c0_7] : memref<128x128xbf16, #tpu.memory_space<vmem>>, vector<128x128xbf16>
    tpu.vector_store %arg6[%c0_6, %c0_7], %8 {strides = array<i32>} : memref<128x128xbf16, #tpu.memory_space<vmem>>, vector<128x128xbf16>,
    %c0_8 = arith.constant 0 : index
    %c0_9 = arith.constant 0 : index
    %10 = vector.load %arg4[%c0_8, %c0_9] : memref<128x128xbf16, #tpu.memory_space<vmem>>, vector<128x128xbf16>
    %cst_10 = arith.constant dense<0.000000e+00> : vector<128x128xf32>
    %11 = tpu.matmul %0, %10, %cst_10 {dimension_numbers = #tpu.dot_dimension_numbers<[1], [0], [0], [1], [0, 0, 1, 1], [], []>} : vector<128x128xbf16>, vector<128x128xbf16>, vector<128x128xf32> -> vector<128x128xf32>
    %c0_11 = arith.constant 0 : index
    %c0_12 = arith.constant 0 : index
    %12 = vector.load %arg5[%c0_11, %c0_12] : memref<1x128xf32, #tpu.memory_space<vmem>>, vector<1x128xf32>
    %13 = vector.broadcast %12 : vector<1x128xf32> to vector<128x128xf32>
    %14 = arith.addf %11, %13 : vector<128x128xf32>
    %15 = arith.truncf %14 : vector<128x128xf32> to vector<128x128xbf16>
    %c0_13 = arith.constant 0 : index
    %c0_14 = arith.constant 0 : index
    %16 = vector.load %arg7[%c0_13, %c0_14] : memref<128x128xbf16, #tpu.memory_space<vmem>>, vector<128x128xbf16>
    tpu.vector_store %arg7[%c0_13, %c0_14], %15 {strides = array<i32>} : memref<128x128xbf16, #tpu.memory_space<vmem>>, vector<128x128xbf16>,
    return
  }
  func.func @transform_0(%arg0: i32) -> (i32, i32) {
    %c0_i32 = arith.constant 0 : i32
    %c0_i32_0 = arith.constant 0 : i32
    return %arg0, %c0_i32 : i32, i32
  }
  func.func @transform_1(%arg0: i32) -> (i32, i32) {
    %c0_i32 = arith.constant 0 : i32
    %c0_i32_0 = arith.constant 0 : i32
    %c0_i32_1 = arith.constant 0 : i32
    return %c0_i32, %c0_i32_0 : i32, i32
  }
  func.func @transform_2(%arg0: i32) -> (i32, i32) {
    %c0_i32 = arith.constant 0 : i32
    %c0_i32_0 = arith.constant 0 : i32
    %c0_i32_1 = arith.constant 0 : i32
    return %c0_i32, %c0_i32_0 : i32, i32
  }
  func.func @transform_3(%arg0: i32) -> (i32, i32) {
    %c0_i32 = arith.constant 0 : i32
    %c0_i32_0 = arith.constant 0 : i32
    %c0_i32_1 = arith.constant 0 : i32
    return %c0_i32, %c0_i32_0 : i32, i32
  }
  func.func @transform_4(%arg0: i32) -> (i32, i32) {
    %c0_i32 = arith.constant 0 : i32
    %c0_i32_0 = arith.constant 0 : i32
    %c0_i32_1 = arith.constant 0 : i32
    return %c0_i32, %c0_i32_0 : i32, i32
  }
  func.func @transform_5(%arg0: i32) -> (i32, i32) {
    %c0_i32 = arith.constant 0 : i32
    %c0_i32_0 = arith.constant 0 : i32
    return %arg0, %c0_i32 : i32, i32
  }
  func.func @transform_6(%arg0: i32) -> (i32, i32) {
    %c0_i32 = arith.constant 0 : i32
    %c0_i32_0 = arith.constant 0 : i32
    return %arg0, %c0_i32 : i32, i32
  }
}

module attributes {stable_mosaic.version = 11 : i64} {
  func.func @_conv3x3_bias_relu_kernel(%arg0: i32, %arg1: memref<1x18x18x128xbf16, #tpu.memory_space<vmem>>, %arg2: memref<9x128x128xbf16, #tpu.memory_space<vmem>>, %arg3: memref<1x128xf32, #tpu.memory_space<vmem>>, %arg4: memref<1x16x16x128xbf16, #tpu.memory_space<vmem>>) attributes {dimension_semantics = [#tpu.dimension_semantics<parallel>], iteration_bounds = array<i64: 2>, scalar_prefetch = 0 : i64, scratch_operands = 0 : i64, tpu.core_type = #tpu.core_type<tc>, window_params = [{transform_indices = @transform_0, window_bounds = array<i64: 1, 18, 18, 128>}, {pipeline_mode = #tpu.pipeline_mode<synchronous>, transform_indices = @transform_1, window_bounds = array<i64: 9, 128, 128>}, {pipeline_mode = #tpu.pipeline_mode<synchronous>, transform_indices = @transform_2, window_bounds = array<i64: 1, 128>}, {transform_indices = @transform_3, window_bounds = array<i64: 1, 16, 16, 128>}]} {
    %cst = arith.constant 0.000000e+00 : f32
    %0 = vector.broadcast %cst : f32 to vector<256x128xf32>
    %c0 = arith.constant 0 : index
    %c0_0 = arith.constant 0 : index
    %c0_1 = arith.constant 0 : index
    %c0_2 = arith.constant 0 : index
    %1 = vector.load %arg1[%c0, %c0_0, %c0_1, %c0_2] : memref<1x18x18x128xbf16, #tpu.memory_space<vmem>>, vector<1x16x16x128xbf16>
    %2 = vector.shape_cast %1 : vector<1x16x16x128xbf16> to vector<16x16x128xbf16>
    %3 = vector.shape_cast %2 : vector<16x16x128xbf16> to vector<256x128xbf16>
    %c0_3 = arith.constant 0 : index
    %c0_4 = arith.constant 0 : index
    %c0_5 = arith.constant 0 : index
    %4 = vector.load %arg2[%c0_3, %c0_4, %c0_5] : memref<9x128x128xbf16, #tpu.memory_space<vmem>>, vector<1x128x128xbf16>
    %5 = vector.shape_cast %4 : vector<1x128x128xbf16> to vector<128x128xbf16>
    %cst_6 = arith.constant dense<0.000000e+00> : vector<256x128xf32>
    %6 = tpu.matmul %3, %5, %cst_6 {dimension_numbers = #tpu.dot_dimension_numbers<[1], [0], [0], [1], [0, 0, 1, 1], [], []>} : vector<256x128xbf16>, vector<128x128xbf16>, vector<256x128xf32> -> vector<256x128xf32>
    %7 = arith.addf %0, %6 : vector<256x128xf32>
    %c0_7 = arith.constant 0 : index
    %c0_8 = arith.constant 0 : index
    %c1 = arith.constant 1 : index
    %c0_9 = arith.constant 0 : index
    %8 = vector.load %arg1[%c0_7, %c0_8, %c1, %c0_9] : memref<1x18x18x128xbf16, #tpu.memory_space<vmem>>, vector<1x16x16x128xbf16>
    %9 = vector.shape_cast %8 : vector<1x16x16x128xbf16> to vector<16x16x128xbf16>
    %10 = vector.shape_cast %9 : vector<16x16x128xbf16> to vector<256x128xbf16>
    %c1_10 = arith.constant 1 : index
    %c0_11 = arith.constant 0 : index
    %c0_12 = arith.constant 0 : index
    %11 = vector.load %arg2[%c1_10, %c0_11, %c0_12] : memref<9x128x128xbf16, #tpu.memory_space<vmem>>, vector<1x128x128xbf16>
    %12 = vector.shape_cast %11 : vector<1x128x128xbf16> to vector<128x128xbf16>
    %cst_13 = arith.constant dense<0.000000e+00> : vector<256x128xf32>
    %13 = tpu.matmul %10, %12, %cst_13 {dimension_numbers = #tpu.dot_dimension_numbers<[1], [0], [0], [1], [0, 0, 1, 1], [], []>} : vector<256x128xbf16>, vector<128x128xbf16>, vector<256x128xf32> -> vector<256x128xf32>
    %14 = arith.addf %7, %13 : vector<256x128xf32>
    %c0_14 = arith.constant 0 : index
    %c0_15 = arith.constant 0 : index
    %c2 = arith.constant 2 : index
    %c0_16 = arith.constant 0 : index
    %15 = vector.load %arg1[%c0_14, %c0_15, %c2, %c0_16] : memref<1x18x18x128xbf16, #tpu.memory_space<vmem>>, vector<1x16x16x128xbf16>
    %16 = vector.shape_cast %15 : vector<1x16x16x128xbf16> to vector<16x16x128xbf16>
    %17 = vector.shape_cast %16 : vector<16x16x128xbf16> to vector<256x128xbf16>
    %c2_17 = arith.constant 2 : index
    %c0_18 = arith.constant 0 : index
    %c0_19 = arith.constant 0 : index
    %18 = vector.load %arg2[%c2_17, %c0_18, %c0_19] : memref<9x128x128xbf16, #tpu.memory_space<vmem>>, vector<1x128x128xbf16>
    %19 = vector.shape_cast %18 : vector<1x128x128xbf16> to vector<128x128xbf16>
    %cst_20 = arith.constant dense<0.000000e+00> : vector<256x128xf32>
    %20 = tpu.matmul %17, %19, %cst_20 {dimension_numbers = #tpu.dot_dimension_numbers<[1], [0], [0], [1], [0, 0, 1, 1], [], []>} : vector<256x128xbf16>, vector<128x128xbf16>, vector<256x128xf32> -> vector<256x128xf32>
    %21 = arith.addf %14, %20 : vector<256x128xf32>
    %c0_21 = arith.constant 0 : index
    %c1_22 = arith.constant 1 : index
    %c0_23 = arith.constant 0 : index
    %c0_24 = arith.constant 0 : index
    %22 = vector.load %arg1[%c0_21, %c1_22, %c0_23, %c0_24] : memref<1x18x18x128xbf16, #tpu.memory_space<vmem>>, vector<1x16x16x128xbf16>
    %23 = vector.shape_cast %22 : vector<1x16x16x128xbf16> to vector<16x16x128xbf16>
    %24 = vector.shape_cast %23 : vector<16x16x128xbf16> to vector<256x128xbf16>
    %c3 = arith.constant 3 : index
    %c0_25 = arith.constant 0 : index
    %c0_26 = arith.constant 0 : index
    %25 = vector.load %arg2[%c3, %c0_25, %c0_26] : memref<9x128x128xbf16, #tpu.memory_space<vmem>>, vector<1x128x128xbf16>
    %26 = vector.shape_cast %25 : vector<1x128x128xbf16> to vector<128x128xbf16>
    %cst_27 = arith.constant dense<0.000000e+00> : vector<256x128xf32>
    %27 = tpu.matmul %24, %26, %cst_27 {dimension_numbers = #tpu.dot_dimension_numbers<[1], [0], [0], [1], [0, 0, 1, 1], [], []>} : vector<256x128xbf16>, vector<128x128xbf16>, vector<256x128xf32> -> vector<256x128xf32>
    %28 = arith.addf %21, %27 : vector<256x128xf32>
    %c0_28 = arith.constant 0 : index
    %c1_29 = arith.constant 1 : index
    %c1_30 = arith.constant 1 : index
    %c0_31 = arith.constant 0 : index
    %29 = vector.load %arg1[%c0_28, %c1_29, %c1_30, %c0_31] : memref<1x18x18x128xbf16, #tpu.memory_space<vmem>>, vector<1x16x16x128xbf16>
    %30 = vector.shape_cast %29 : vector<1x16x16x128xbf16> to vector<16x16x128xbf16>
    %31 = vector.shape_cast %30 : vector<16x16x128xbf16> to vector<256x128xbf16>
    %c4 = arith.constant 4 : index
    %c0_32 = arith.constant 0 : index
    %c0_33 = arith.constant 0 : index
    %32 = vector.load %arg2[%c4, %c0_32, %c0_33] : memref<9x128x128xbf16, #tpu.memory_space<vmem>>, vector<1x128x128xbf16>
    %33 = vector.shape_cast %32 : vector<1x128x128xbf16> to vector<128x128xbf16>
    %cst_34 = arith.constant dense<0.000000e+00> : vector<256x128xf32>
    %34 = tpu.matmul %31, %33, %cst_34 {dimension_numbers = #tpu.dot_dimension_numbers<[1], [0], [0], [1], [0, 0, 1, 1], [], []>} : vector<256x128xbf16>, vector<128x128xbf16>, vector<256x128xf32> -> vector<256x128xf32>
    %35 = arith.addf %28, %34 : vector<256x128xf32>
    %c0_35 = arith.constant 0 : index
    %c1_36 = arith.constant 1 : index
    %c2_37 = arith.constant 2 : index
    %c0_38 = arith.constant 0 : index
    %36 = vector.load %arg1[%c0_35, %c1_36, %c2_37, %c0_38] : memref<1x18x18x128xbf16, #tpu.memory_space<vmem>>, vector<1x16x16x128xbf16>
    %37 = vector.shape_cast %36 : vector<1x16x16x128xbf16> to vector<16x16x128xbf16>
    %38 = vector.shape_cast %37 : vector<16x16x128xbf16> to vector<256x128xbf16>
    %c5 = arith.constant 5 : index
    %c0_39 = arith.constant 0 : index
    %c0_40 = arith.constant 0 : index
    %39 = vector.load %arg2[%c5, %c0_39, %c0_40] : memref<9x128x128xbf16, #tpu.memory_space<vmem>>, vector<1x128x128xbf16>
    %40 = vector.shape_cast %39 : vector<1x128x128xbf16> to vector<128x128xbf16>
    %cst_41 = arith.constant dense<0.000000e+00> : vector<256x128xf32>
    %41 = tpu.matmul %38, %40, %cst_41 {dimension_numbers = #tpu.dot_dimension_numbers<[1], [0], [0], [1], [0, 0, 1, 1], [], []>} : vector<256x128xbf16>, vector<128x128xbf16>, vector<256x128xf32> -> vector<256x128xf32>
    %42 = arith.addf %35, %41 : vector<256x128xf32>
    %c0_42 = arith.constant 0 : index
    %c2_43 = arith.constant 2 : index
    %c0_44 = arith.constant 0 : index
    %c0_45 = arith.constant 0 : index
    %43 = vector.load %arg1[%c0_42, %c2_43, %c0_44, %c0_45] : memref<1x18x18x128xbf16, #tpu.memory_space<vmem>>, vector<1x16x16x128xbf16>
    %44 = vector.shape_cast %43 : vector<1x16x16x128xbf16> to vector<16x16x128xbf16>
    %45 = vector.shape_cast %44 : vector<16x16x128xbf16> to vector<256x128xbf16>
    %c6 = arith.constant 6 : index
    %c0_46 = arith.constant 0 : index
    %c0_47 = arith.constant 0 : index
    %46 = vector.load %arg2[%c6, %c0_46, %c0_47] : memref<9x128x128xbf16, #tpu.memory_space<vmem>>, vector<1x128x128xbf16>
    %47 = vector.shape_cast %46 : vector<1x128x128xbf16> to vector<128x128xbf16>
    %cst_48 = arith.constant dense<0.000000e+00> : vector<256x128xf32>
    %48 = tpu.matmul %45, %47, %cst_48 {dimension_numbers = #tpu.dot_dimension_numbers<[1], [0], [0], [1], [0, 0, 1, 1], [], []>} : vector<256x128xbf16>, vector<128x128xbf16>, vector<256x128xf32> -> vector<256x128xf32>
    %49 = arith.addf %42, %48 : vector<256x128xf32>
    %c0_49 = arith.constant 0 : index
    %c2_50 = arith.constant 2 : index
    %c1_51 = arith.constant 1 : index
    %c0_52 = arith.constant 0 : index
    %50 = vector.load %arg1[%c0_49, %c2_50, %c1_51, %c0_52] : memref<1x18x18x128xbf16, #tpu.memory_space<vmem>>, vector<1x16x16x128xbf16>
    %51 = vector.shape_cast %50 : vector<1x16x16x128xbf16> to vector<16x16x128xbf16>
    %52 = vector.shape_cast %51 : vector<16x16x128xbf16> to vector<256x128xbf16>
    %c7 = arith.constant 7 : index
    %c0_53 = arith.constant 0 : index
    %c0_54 = arith.constant 0 : index
    %53 = vector.load %arg2[%c7, %c0_53, %c0_54] : memref<9x128x128xbf16, #tpu.memory_space<vmem>>, vector<1x128x128xbf16>
    %54 = vector.shape_cast %53 : vector<1x128x128xbf16> to vector<128x128xbf16>
    %cst_55 = arith.constant dense<0.000000e+00> : vector<256x128xf32>
    %55 = tpu.matmul %52, %54, %cst_55 {dimension_numbers = #tpu.dot_dimension_numbers<[1], [0], [0], [1], [0, 0, 1, 1], [], []>} : vector<256x128xbf16>, vector<128x128xbf16>, vector<256x128xf32> -> vector<256x128xf32>
    %56 = arith.addf %49, %55 : vector<256x128xf32>
    %c0_56 = arith.constant 0 : index
    %c2_57 = arith.constant 2 : index
    %c2_58 = arith.constant 2 : index
    %c0_59 = arith.constant 0 : index
    %57 = vector.load %arg1[%c0_56, %c2_57, %c2_58, %c0_59] : memref<1x18x18x128xbf16, #tpu.memory_space<vmem>>, vector<1x16x16x128xbf16>
    %58 = vector.shape_cast %57 : vector<1x16x16x128xbf16> to vector<16x16x128xbf16>
    %59 = vector.shape_cast %58 : vector<16x16x128xbf16> to vector<256x128xbf16>
    %c8 = arith.constant 8 : index
    %c0_60 = arith.constant 0 : index
    %c0_61 = arith.constant 0 : index
    %60 = vector.load %arg2[%c8, %c0_60, %c0_61] : memref<9x128x128xbf16, #tpu.memory_space<vmem>>, vector<1x128x128xbf16>
    %61 = vector.shape_cast %60 : vector<1x128x128xbf16> to vector<128x128xbf16>
    %cst_62 = arith.constant dense<0.000000e+00> : vector<256x128xf32>
    %62 = tpu.matmul %59, %61, %cst_62 {dimension_numbers = #tpu.dot_dimension_numbers<[1], [0], [0], [1], [0, 0, 1, 1], [], []>} : vector<256x128xbf16>, vector<128x128xbf16>, vector<256x128xf32> -> vector<256x128xf32>
    %63 = arith.addf %56, %62 : vector<256x128xf32>
    %c0_63 = arith.constant 0 : index
    %c0_64 = arith.constant 0 : index
    %64 = vector.load %arg3[%c0_63, %c0_64] : memref<1x128xf32, #tpu.memory_space<vmem>>, vector<1x128xf32>
    %65 = vector.broadcast %64 : vector<1x128xf32> to vector<256x128xf32>
    %66 = arith.addf %63, %65 : vector<256x128xf32>
    %cst_65 = arith.constant 0.000000e+00 : f32
    %67 = vector.broadcast %cst_65 : f32 to vector<256x128xf32>
    %68 = arith.maximumf %66, %67 : vector<256x128xf32>
    %69 = vector.shape_cast %68 : vector<256x128xf32> to vector<1x16x16x128xf32>
    %70 = arith.truncf %69 : vector<1x16x16x128xf32> to vector<1x16x16x128xbf16>
    %c0_66 = arith.constant 0 : index
    %c0_67 = arith.constant 0 : index
    %c0_68 = arith.constant 0 : index
    %c0_69 = arith.constant 0 : index
    %71 = vector.load %arg4[%c0_66, %c0_67, %c0_68, %c0_69] : memref<1x16x16x128xbf16, #tpu.memory_space<vmem>>, vector<1x16x16x128xbf16>
    tpu.vector_store %arg4[%c0_66, %c0_67, %c0_68, %c0_69], %70 {strides = array<i32>} : memref<1x16x16x128xbf16, #tpu.memory_space<vmem>>, vector<1x16x16x128xbf16>,
    return
  }
  func.func @transform_0(%arg0: i32) -> (i32, i32, i32, i32) {
    %c0_i32 = arith.constant 0 : i32
    %c0_i32_0 = arith.constant 0 : i32
    %c0_i32_1 = arith.constant 0 : i32
    %c0_i32_2 = arith.constant 0 : i32
    return %arg0, %c0_i32, %c0_i32_0, %c0_i32_1 : i32, i32, i32, i32
  }
  func.func @transform_1(%arg0: i32) -> (i32, i32, i32) {
    %c0_i32 = arith.constant 0 : i32
    %c0_i32_0 = arith.constant 0 : i32
    %c0_i32_1 = arith.constant 0 : i32
    %c0_i32_2 = arith.constant 0 : i32
    return %c0_i32, %c0_i32_0, %c0_i32_1 : i32, i32, i32
  }
  func.func @transform_2(%arg0: i32) -> (i32, i32) {
    %c0_i32 = arith.constant 0 : i32
    %c0_i32_0 = arith.constant 0 : i32
    %c0_i32_1 = arith.constant 0 : i32
    return %c0_i32, %c0_i32_0 : i32, i32
  }
  func.func @transform_3(%arg0: i32) -> (i32, i32, i32, i32) {
    %c0_i32 = arith.constant 0 : i32
    %c0_i32_0 = arith.constant 0 : i32
    %c0_i32_1 = arith.constant 0 : i32
    %c0_i32_2 = arith.constant 0 : i32
    return %arg0, %c0_i32, %c0_i32_0, %c0_i32_1 : i32, i32, i32, i32
  }
}

module attributes {stable_mosaic.version = 11 : i64} {
  func.func @_matmul_bias_add_relu_kernel(%arg0: i32, %arg1: memref<128x128xbf16, #tpu.memory_space<vmem>>, %arg2: memref<128x128xbf16, #tpu.memory_space<vmem>>, %arg3: memref<1x128xf32, #tpu.memory_space<vmem>>, %arg4: memref<128x128xbf16, #tpu.memory_space<vmem>>, %arg5: memref<128x128xf32, #tpu.memory_space<vmem>>) attributes {dimension_semantics = [#tpu.dimension_semantics<parallel>], iteration_bounds = array<i64: 4>, scalar_prefetch = 0 : i64, scratch_operands = 0 : i64, tpu.core_type = #tpu.core_type<tc>, window_params = [{transform_indices = @transform_0, window_bounds = array<i64: 128, 128>}, {pipeline_mode = #tpu.pipeline_mode<synchronous>, transform_indices = @transform_1, window_bounds = array<i64: 128, 128>}, {pipeline_mode = #tpu.pipeline_mode<synchronous>, transform_indices = @transform_2, window_bounds = array<i64: 1, 128>}, {transform_indices = @transform_3, window_bounds = array<i64: 128, 128>}, {transform_indices = @transform_4, window_bounds = array<i64: 128, 128>}]} {
    %c0 = arith.constant 0 : index
    %c0_0 = arith.constant 0 : index
    %0 = vector.load %arg1[%c0, %c0_0] : memref<128x128xbf16, #tpu.memory_space<vmem>>, vector<128x128xbf16>
    %c0_1 = arith.constant 0 : index
    %c0_2 = arith.constant 0 : index
    %1 = vector.load %arg2[%c0_1, %c0_2] : memref<128x128xbf16, #tpu.memory_space<vmem>>, vector<128x128xbf16>
    %cst = arith.constant dense<0.000000e+00> : vector<128x128xf32>
    %2 = tpu.matmul %0, %1, %cst {dimension_numbers = #tpu.dot_dimension_numbers<[1], [0], [0], [1], [0, 0, 1, 1], [], []>} : vector<128x128xbf16>, vector<128x128xbf16>, vector<128x128xf32> -> vector<128x128xf32>
    %c0_3 = arith.constant 0 : index
    %c0_4 = arith.constant 0 : index
    %3 = vector.load %arg3[%c0_3, %c0_4] : memref<1x128xf32, #tpu.memory_space<vmem>>, vector<1x128xf32>
    %4 = vector.broadcast %3 : vector<1x128xf32> to vector<128x128xf32>
    %5 = arith.addf %2, %4 : vector<128x128xf32>
    %c0_5 = arith.constant 0 : index
    %c0_6 = arith.constant 0 : index
    %6 = vector.load %arg4[%c0_5, %c0_6] : memref<128x128xbf16, #tpu.memory_space<vmem>>, vector<128x128xbf16>
    %7 = arith.extf %6 : vector<128x128xbf16> to vector<128x128xf32>
    %8 = arith.addf %5, %7 : vector<128x128xf32>
    %cst_7 = arith.constant 0.000000e+00 : f32
    %9 = vector.broadcast %cst_7 : f32 to vector<128x128xf32>
    %10 = arith.maximumf %8, %9 : vector<128x128xf32>
    %c0_8 = arith.constant 0 : index
    %c0_9 = arith.constant 0 : index
    %11 = vector.load %arg5[%c0_8, %c0_9] : memref<128x128xf32, #tpu.memory_space<vmem>>, vector<128x128xf32>
    tpu.vector_store %arg5[%c0_8, %c0_9], %10 {strides = array<i32>} : memref<128x128xf32, #tpu.memory_space<vmem>>, vector<128x128xf32>,
    return
  }
  func.func @transform_0(%arg0: i32) -> (i32, i32) {
    %c0_i32 = arith.constant 0 : i32
    %c0_i32_0 = arith.constant 0 : i32
    return %arg0, %c0_i32 : i32, i32
  }
  func.func @transform_1(%arg0: i32) -> (i32, i32) {
    %c0_i32 = arith.constant 0 : i32
    %c0_i32_0 = arith.constant 0 : i32
    %c0_i32_1 = arith.constant 0 : i32
    return %c0_i32, %c0_i32_0 : i32, i32
  }
  func.func @transform_2(%arg0: i32) -> (i32, i32) {
    %c0_i32 = arith.constant 0 : i32
    %c0_i32_0 = arith.constant 0 : i32
    %c0_i32_1 = arith.constant 0 : i32
    return %c0_i32, %c0_i32_0 : i32, i32
  }
  func.func @transform_3(%arg0: i32) -> (i32, i32) {
    %c0_i32 = arith.constant 0 : i32
    %c0_i32_0 = arith.constant 0 : i32
    return %arg0, %c0_i32 : i32, i32
  }
  func.func @transform_4(%arg0: i32) -> (i32, i32) {
    %c0_i32 = arith.constant 0 : i32
    %c0_i32_0 = arith.constant 0 : i32
    return %arg0, %c0_i32 : i32, i32
  }
}

</mosaic_0001>

<bundles_post_ra>
// kernel: bottleneck_forward.5
= control target key start
LH: loop header
LB: loop body
LE: loop exit
PB: predicated region body
PF: predicated region fallthrough
CT: control target
= control target key end

     0   :  { %s794_s15 = smov 0   ;;  %s905_s0 = inlined_call_operand.vmem [shape: bf16[512,128], index: 0, kind: input, shape index: {}]   ;;  %s906_s1 = inlined_call_operand.vmem [shape: bf16[128,128], index: 1, kind: input, shape index: {}]   ;;  %s907_s2 = inlined_call_operand.vmem [shape: f32[1,128], index: 2, kind: input, shape index: {}]   ;;  %s908_s3 = inlined_call_operand.vmem [shape: bf16[512,128], index: 3, kind: input, shape index: {}]   ;;  %s909_s4 = inlined_call_operand.vmem [shape: f32[512,128], index: 4, kind: output, shape index: {}]  }
   0x1 LB: > { %s604_s16 = sadd.s32 4294967295, %s767_s15   ;;  %p608_p0 = scmp.ge.s32.totalorder %s767_s15, 1  ;;  %s767_s15 = sphi %s794_s15, %s14_s15  }
   0x2   : > { %p174_p1 = scmp.lt.s32.totalorder %s767_s15, 5 }
   0x4   : > { %p175_p2 = pnand %p608_p0, %p174_p1 }
   0x5   : > { %v745_v0 = vld [vmem:[%s906_s1] sm:$0xff] (!%p175_p2)   ;;  %s609_s19 = sshll.u32 (!%p175_p2), %s604_s16, 4  ;;  %v746_v1 = vld [vmem:[%s906_s1 + $0x8] sm:$0xff] (!%p175_p2)   ;;  %v747_v2 = vld [vmem:[%s906_s1 + $0x10] sm:$0xff] (!%p175_p2)  }
   0x6   : > { %178 = sbr.rel (%p175_p2) target bundleno = 268 (0x10c), region = 36  ;;  %p206_p3 = scmp.lt.s32.totalorder (!%p175_p2), %s609_s19, 63  ;;  %689 = vmatprep.subr.bf16.mxu0 (!%p175_p2), %v745_v0  ;;  %721 = vmatprep.subr.bf16.mxu1 (!%p175_p2), %v745_v0  ;;  %v748_v3 = vld [vmem:[%s906_s1 + $0x18] sm:$0xff] (!%p175_p2)   ;;  %v749_v6 = vld [vmem:[%s906_s1 + $0x20] sm:$0xff] (!%p175_p2)   ;;  %v750_v7 = vld [vmem:[%s906_s1 + $0x28] sm:$0xff] (!%p175_p2)  }
   0x7   : > { %690 = vmatpush3.bf16.msra.mxu0 (!%p175_p2), %v745_v0  ;;  %729 = vmatpush3.bf16.msra.mxu1 (!%p175_p2), %v745_v0  ;;  %v751_v8 = vld [vmem:[%s906_s1 + $0x30] sm:$0xff] (!%p175_p2)   ;;  %v752_v9 = vld [vmem:[%s906_s1 + $0x38] sm:$0xff] (!%p175_p2)   ;;  %v858_v20 = vld [vmem:[%s907_s2] ss:$0 sm:$0xff] (!%p175_p2) }
   0x8   : > { %691 = vmatprep.subr.bf16.mxu0 (!%p175_p2), %v746_v1  ;;  %722 = vmatprep.subr.bf16.mxu1 (!%p175_p2), %v746_v1 }
   0xb   : > { %692 = vmatpush3.bf16.msra.mxu0 (!%p175_p2), %v746_v1  ;;  %730 = vmatpush3.bf16.msra.mxu1 (!%p175_p2), %v746_v1 }
   0xc   : > { %693 = vmatprep.subr.bf16.mxu0 (!%p175_p2), %v747_v2  ;;  %723 = vmatprep.subr.bf16.mxu1 (!%p175_p2), %v747_v2 }
   0xd   : > { %s911_s19 = smov (!%p206_p3, %s609_s19), 63 }
   0xe   : > { %s610_s24 = sshll.u32 %s911_s19, 2  ;;  %s614_s18 = sshll.u32 %s911_s19, 3 }
   0xf   : > { %s819_s27 = scalar_lea.vmem %s905_s0, %s610_s24  ;;  %694 = vmatpush3.bf16.msra.mxu0 %v747_v2  ;;  %731 = vmatpush3.bf16.msra.mxu1 %v747_v2  ;;  %s849_s14 = scalar_lea.vmem %s908_s3, %s610_s24 }
  0x10   : > { %v753_v4 = vld [vmem:[%s819_s27] sm:$0xff]   ;;  %695 = vmatprep.subr.bf16.mxu0 %v748_v3  ;;  %724 = vmatprep.subr.bf16.mxu1 %v748_v3  ;;  %v755_v10 = vld [vmem:[%s819_s27 + $0x8] sm:$0xff]   ;;  %v757_v12 = vld [vmem:[%s819_s27 + $0x10] sm:$0xff]   ;;  %s870_s21 = scalar_lea.vmem %s909_s4, %s614_s18 }
  0x11   : > { %v754_v5 = vld [vmem:[%s819_s27 + $0x20] sm:$0xff]   ;;  %705 = vmatprep.mubr.bf16.mxu0 %v753_v4  ;;  %v756_v11 = vld [vmem:[%s819_s27 + $0x28] sm:$0xff]   ;;  %v758_v13 = vld [vmem:[%s819_s27 + $0x30] sm:$0xff]  }
  0x12   : > { %713 = vmatprep.mubr.bf16.mxu1 %v754_v5  ;;  %v759_v14 = vld [vmem:[%s819_s27 + $0x18] sm:$0xff]   ;;  %v666_v16 = vld [vmem:[%s849_s14 + $0x8] sm:$0xff]   ;;  %v635_v18 = vld [vmem:[%s849_s14] sm:$0xff]  }
  0x13   : > { %696 = vmatpush3.bf16.msra.mxu0 %v748_v3  ;;  %732 = vmatpush3.bf16.msra.mxu1 %v748_v3  ;;  %v760_v15 = vld [vmem:[%s819_s27 + $0x38] sm:$0xff]   ;;  %v670_v17 = vld [vmem:[%s849_s14 + $0x28] sm:$0xff]   ;;  %v669_v19 = vld [vmem:[%s849_s14 + $0x20] sm:$0xff]   ;;  %v640_v21 = vunpack.c.l.bf16 %v666_v16  ;;  %v636_v25 = vunpack.c.l.bf16 %v635_v18  ;;  %v641_v31 = vunpack.c.h.bf16 %v666_v16  ;;  %v637_v37 = vunpack.c.h.bf16 %v635_v18 }
  0x14   : > { %697 = vmatprep.subr.bf16.mxu0 %v749_v6  ;;  %725 = vmatprep.subr.bf16.mxu1 %v749_v6  ;;  %v656_v22 = vunpack.c.l.bf16 %v670_v17  ;;  %v652_v26 = vunpack.c.l.bf16 %v669_v19  ;;  %v657_v32 = vunpack.c.h.bf16 %v670_v17  ;;  %v653_v38 = vunpack.c.h.bf16 %v669_v19  ;;  %v668_v49 = vld [vmem:[%s849_s14 + $0x18] sm:$0xff]   ;;  %v667_v55 = vld [vmem:[%s849_s14 + $0x10] sm:$0xff]  }
  0x15   : > { %v672_v50 = vld [vmem:[%s849_s14 + $0x38] sm:$0xff]   ;;  %v671_v56 = vld [vmem:[%s849_s14 + $0x30] sm:$0xff]   ;;  %v648_v63 = vunpack.c.l.bf16 %v668_v49  ;;  %v644_v5 = vunpack.c.l.bf16 %v667_v55  ;;  %v645_v17 = vunpack.c.h.bf16 %v667_v55 }
  0x16   : > { %v664_v0 = vunpack.c.l.bf16 %v672_v50  ;;  %v661_v18 = vunpack.c.h.bf16 %v671_v56 }
  0x17   : > { %698 = vmatpush3.bf16.msra.mxu0 %v749_v6  ;;  %733 = vmatpush3.bf16.msra.mxu1 %v749_v6  ;;  %v660_v6 = vunpack.c.l.bf16 %v671_v56 }
  0x18   : > { %699 = vmatprep.subr.bf16.mxu0 %v750_v7  ;;  %726 = vmatprep.subr.bf16.mxu1 %v750_v7 }
  0x1b   : > { %700 = vmatpush3.bf16.msra.mxu0 %v750_v7  ;;  %734 = vmatpush3.bf16.msra.mxu1 %v750_v7 }
  0x1c   : > { %701 = vmatprep.subr.bf16.mxu0 %v751_v8  ;;  %727 = vmatprep.subr.bf16.mxu1 %v751_v8 }
  0x1f   : > { %702 = vmatpush3.bf16.msra.mxu0 %v751_v8  ;;  %735 = vmatpush3.bf16.msra.mxu1 %v751_v8 }
  0x20   : > { %703 = vmatprep.subr.bf16.mxu0 %v752_v9  ;;  %728 = vmatprep.subr.bf16.mxu1 %v752_v9 }
  0x23   : > { %704 = vmatpush3.bf16.msra.mxu0 %v752_v9  ;;  %736 = vmatpush3.bf16.msra.mxu1 %v752_v9 }
  0x26   : > { %706 = vmatmul.mubr.bf16.vlgmr.msra.gmra.mrb[0].mxu0 %v755_v10  ;;  %714 = vmatmul.mubr.bf16.vlgmr.msra.gmra.mrb[0].mxu1 %v756_v11  ;;  %v649_v11 = vunpack.c.h.bf16 %v668_v49 }
  0x27   : > { %709 = vmatprep.mubr.bf16.mxu0 %v757_v12  ;;  %717 = vmatprep.mubr.bf16.mxu1 %v758_v13  ;;  %v665_v12 = vunpack.c.h.bf16 %v672_v50 }
  0x2e   : > { %710 = vmatmul.mubr.bf16.gmra.mrb[4].mxu0 %v759_v14  ;;  %718 = vmatmul.mubr.bf16.gmra.mrb[4].mxu1 %v760_v15 }
  0xf9   : > { %v707_v23 = vpop.f32.mrb[0].mxu0  ;;  %v715_v24 = vpop.f32.mrb[0].mxu1 }
  0xfa   : > { %v402_v27 = vadd.f32 %v707_v23, %v858_v20  ;;  %v434_v28 = vadd.f32 %v715_v24, %v858_v20  ;;  %v393_v29 = vpop.f32.mrb[1].mxu0  ;;  %v425_v30 = vpop.f32.mrb[1].mxu1 }
  0xfb   : > { %v394_v33 = vadd.f32 %v858_v20, %v393_v29  ;;  %v426_v34 = vadd.f32 %v858_v20, %v425_v30  ;;  %v708_v35 = vpop.f32.mrb[2].mxu0  ;;  %v716_v36 = vpop.f32.mrb[2].mxu1 }
  0xfc   : > { %v490_v39 = vadd.f32 %v640_v21, %v402_v27  ;;  %v498_v40 = vadd.f32 %v656_v22, %v434_v28  ;;  %v405_v41 = vadd.f32 %v708_v35, %v858_v20  ;;  %v437_v42 = vadd.f32 %v716_v36, %v858_v20  ;;  %v396_v43 = vpop.f32.mrb[3].mxu0  ;;  %v428_v44 = vpop.f32.mrb[3].mxu1 }
  0xfd   : > { %v488_v45 = vadd.f32 %v636_v25, %v394_v33  ;;  %v496_v46 = vadd.f32 %v652_v26, %v426_v34  ;;  %v397_v47 = vadd.f32 %v858_v20, %v396_v43  ;;  %v429_v48 = vadd.f32 %v858_v20, %v428_v44 }
  0xfe   : > { %v506_v51 = vmax.f32 %v490_v39, 0.0  ;;  %v514_v52 = vmax.f32 %v498_v40, 0.0  ;;  %v491_v53 = vadd.f32 %v641_v31, %v405_v41  ;;  %v499_v54 = vadd.f32 %v657_v32, %v437_v42 }
  0xff   : > { %v504_v57 = vmax.f32 %v488_v45, 0.0  ;;  %v512_v58 = vmax.f32 %v496_v46, 0.0  ;;  %v489_v59 = vadd.f32 %v637_v37, %v397_v47  ;;  %v497_v60 = vadd.f32 %v653_v38, %v429_v48 }
 0x100   : > { %522 = vst [vmem:[%s870_s21 + $0x10] sm:$0xff] %v506_v51  ;;  %530 = vst [vmem:[%s870_s21 + $0x50] sm:$0xff] %v514_v52  ;;  %v507_v61 = vmax.f32 %v491_v53, 0.0  ;;  %v515_v62 = vmax.f32 %v499_v54, 0.0 }
 0x101   : > { %520 = vst [vmem:[%s870_s21] sm:$0xff] %v504_v57  ;;  %528 = vst [vmem:[%s870_s21 + $0x40] sm:$0xff] %v512_v58  ;;  %v505_v1 = vmax.f32 %v489_v59, 0.0  ;;  %v513_v2 = vmax.f32 %v497_v60, 0.0  ;;  %v711_v3 = vpop.f32.mrb[4].mxu0  ;;  %v719_v4 = vpop.f32.mrb[4].mxu1 }
 0x102   : > { %523 = vst [vmem:[%s870_s21 + $0x18] sm:$0xff] %v507_v61  ;;  %531 = vst [vmem:[%s870_s21 + $0x58] sm:$0xff] %v515_v62  ;;  %v418_v7 = vadd.f32 %v711_v3, %v858_v20  ;;  %v450_v8 = vadd.f32 %v719_v4, %v858_v20  ;;  %v409_v9 = vpop.f32.mrb[5].mxu0  ;;  %v441_v10 = vpop.f32.mrb[5].mxu1 }
 0x103   : > { %521 = vst [vmem:[%s870_s21 + $0x8] sm:$0xff] %v505_v1  ;;  %529 = vst [vmem:[%s870_s21 + $0x48] sm:$0xff] %v513_v2  ;;  %v410_v13 = vadd.f32 %v858_v20, %v409_v9  ;;  %v442_v14 = vadd.f32 %v858_v20, %v441_v10  ;;  %v712_v15 = vpop.f32.mrb[6].mxu0  ;;  %v720_v16 = vpop.f32.mrb[6].mxu1 }
 0x104   : > { %v494_v19 = vadd.f32 %v648_v63, %v418_v7  ;;  %v502_v21 = vadd.f32 %v664_v0, %v450_v8  ;;  %v421_v22 = vadd.f32 %v712_v15, %v858_v20  ;;  %v453_v23 = vadd.f32 %v720_v16, %v858_v20  ;;  %v412_v24 = vpop.f32.mrb[7].mxu0  ;;  %v444_v25 = vpop.f32.mrb[7].mxu1 }
 0x105   : > { %v492_v26 = vadd.f32 %v644_v5, %v410_v13  ;;  %v500_v27 = vadd.f32 %v660_v6, %v442_v14  ;;  %v413_v28 = vadd.f32 %v858_v20, %v412_v24  ;;  %v445_v29 = vadd.f32 %v858_v20, %v444_v25 }
 0x106   : > { %v510_v30 = vmax.f32 %v494_v19, 0.0  ;;  %v518_v31 = vmax.f32 %v502_v21, 0.0  ;;  %v495_v32 = vadd.f32 %v649_v11, %v421_v22  ;;  %v503_v33 = vadd.f32 %v665_v12, %v453_v23 }
 0x107   : > { %v508_v34 = vmax.f32 %v492_v26, 0.0  ;;  %v516_v35 = vmax.f32 %v500_v27, 0.0  ;;  %v493_v36 = vadd.f32 %v645_v17, %v413_v28  ;;  %v501_v37 = vadd.f32 %v661_v18, %v445_v29 }
 0x108   : > { %526 = vst [vmem:[%s870_s21 + $0x30] sm:$0xff] %v510_v30  ;;  %534 = vst [vmem:[%s870_s21 + $0x70] sm:$0xff] %v518_v31  ;;  %v511_v38 = vmax.f32 %v495_v32, 0.0  ;;  %v519_v39 = vmax.f32 %v503_v33, 0.0 }
 0x109   : > { %524 = vst [vmem:[%s870_s21 + $0x20] sm:$0xff] %v508_v34  ;;  %532 = vst [vmem:[%s870_s21 + $0x60] sm:$0xff] %v516_v35  ;;  %v509_v40 = vmax.f32 %v493_v36, 0.0  ;;  %v517_v20 = vmax.f32 %v501_v37, 0.0 }
 0x10a   : > { %527 = vst [vmem:[%s870_s21 + $0x38] sm:$0xff] %v511_v38  ;;  %535 = vst [vmem:[%s870_s21 + $0x78] sm:$0xff] %v519_v39 }
 0x10b   : > { %525 = vst [vmem:[%s870_s21 + $0x28] sm:$0xff] %v509_v40  ;;  %533 = vst [vmem:[%s870_s21 + $0x68] sm:$0xff] %v517_v20 }
 0x10c PF: > { %s14_s15 = sadd.s32 1, %s767_s15  }
 0x10d   : > { %p11_p4 = scmp.ge.s32.totalorder %s14_s15, 6  }
 0x10f   :  { %13 = sbr.rel (!%p11_p4) target bundleno = 1 (0x1), region = 69 }

// kernel: bottleneck_forward.3
= control target key start
LH: loop header
LB: loop body
LE: loop exit
PB: predicated region body
PF: predicated region fallthrough
CT: control target
= control target key end

     0   :  { %s1304_s21 = smov 0   ;;  %s1449_s0 = inlined_call_operand.vmem [shape: bf16[512,128], index: 0, kind: input, shape index: {}]   ;;  %s1450_s1 = inlined_call_operand.vmem [shape: bf16[128,128], index: 1, kind: input, shape index: {}]   ;;  %s1451_s2 = inlined_call_operand.vmem [shape: f32[1,128], index: 2, kind: input, shape index: {}]   ;;  %s1452_s3 = inlined_call_operand.vmem [shape: bf16[128,128], index: 3, kind: input, shape index: {}]   ;;  %s1453_s4 = inlined_call_operand.vmem [shape: f32[1,128], index: 4, kind: input, shape index: {}]   ;;  %s1454_s5 = inlined_call_operand.vmem [shape: bf16[512,128], index: 5, kind: output, shape index: {0}]   ;;  %s1455_s6 = inlined_call_operand.vmem [shape: bf16[512,128], index: 6, kind: output, shape index: {1}]  }
   0x1 LB: > { %s936_s22 = sadd.s32 4294967295, %s1267_s21   ;;  %p940_p0 = scmp.ge.s32.totalorder %s1267_s21, 1  ;;  %s1267_s21 = sphi %s1304_s21, %s17_s21  }
   0x2   : > { %p216_p1 = scmp.lt.s32.totalorder %s1267_s21, 5 }
   0x4   : > { %p217_p2 = pnand %p940_p0, %p216_p1 }
   0x5   : > { %v1237_v0 = vld [vmem:[%s1450_s1] sm:$0xff] (!%p217_p2)   ;;  %s941_s25 = sshll.u32 (!%p217_p2), %s936_s22, 4  ;;  %v1239_v2 = vld [vmem:[%s1450_s1 + $0x8] sm:$0xff] (!%p217_p2)   ;;  %v1241_v4 = vld [vmem:[%s1450_s1 + $0x10] sm:$0xff] (!%p217_p2)  }
   0x6   : > { %220 = sbr.rel (%p217_p2) target bundleno = 284 (0x11c), region = 40  ;;  %v1238_v1 = vld [vmem:[%s1452_s3] sm:$0xff] (!%p217_p2)   ;;  %1165 = vmatprep.subr.bf16.mxu0 (!%p217_p2), %v1237_v0  ;;  %p252_p3 = scmp.lt.s32.totalorder (!%p217_p2), %s941_s25, 63  ;;  %v1240_v3 = vld [vmem:[%s1452_s3 + $0x8] sm:$0xff] (!%p217_p2)   ;;  %v1242_v5 = vld [vmem:[%s1452_s3 + $0x10] sm:$0xff] (!%p217_p2)  }
   0x7   : > { %1197 = vmatprep.subr.bf16.mxu1 (!%p217_p2), %v1238_v1  ;;  %1166 = vmatpush3.bf16.msra.mxu0 (!%p217_p2), %v1237_v0  ;;  %v1243_v6 = vld [vmem:[%s1450_s1 + $0x18] sm:$0xff] (!%p217_p2)   ;;  %v1245_v8 = vld [vmem:[%s1450_s1 + $0x20] sm:$0xff] (!%p217_p2)   ;;  %v1247_v10 = vld [vmem:[%s1450_s1 + $0x28] sm:$0xff] (!%p217_p2)  }
   0x8   : > { %1198 = vmatpush3.bf16.msra.mxu1 (!%p217_p2), %v1238_v1  ;;  %1167 = vmatprep.subr.bf16.mxu0 (!%p217_p2), %v1239_v2  ;;  %v1244_v7 = vld [vmem:[%s1452_s3 + $0x18] sm:$0xff] (!%p217_p2)   ;;  %v1246_v9 = vld [vmem:[%s1452_s3 + $0x20] sm:$0xff] (!%p217_p2)   ;;  %v1248_v12 = vld [vmem:[%s1452_s3 + $0x28] sm:$0xff] (!%p217_p2)  }
   0x9   : > { %1199 = vmatprep.subr.bf16.mxu1 (!%p217_p2), %v1240_v3  ;;  %v1249_v13 = vld [vmem:[%s1450_s1 + $0x30] sm:$0xff] (!%p217_p2)   ;;  %v1251_v15 = vld [vmem:[%s1450_s1 + $0x38] sm:$0xff] (!%p217_p2)   ;;  %v1379_v24 = vld [vmem:[%s1451_s2] ss:$0 sm:$0xff] (!%p217_p2) }
   0xa   : > { %v1250_v14 = vld [vmem:[%s1452_s3 + $0x30] sm:$0xff] (!%p217_p2)   ;;  %v1252_v16 = vld [vmem:[%s1452_s3 + $0x38] sm:$0xff] (!%p217_p2)   ;;  %v1384_v25 = vld [vmem:[%s1453_s4] ss:$0 sm:$0xff] (!%p217_p2) }
   0xb   : > { %1168 = vmatpush3.bf16.msra.mxu0 (!%p217_p2), %v1239_v2 }
   0xc   : > { %1200 = vmatpush3.bf16.msra.mxu1 (!%p217_p2), %v1240_v3  ;;  %1169 = vmatprep.subr.bf16.mxu0 (!%p217_p2), %v1241_v4 }
   0xd   : > { %s1457_s25 = smov (!%p252_p3, %s941_s25), 63  ;;  %1201 = vmatprep.subr.bf16.mxu1 %v1242_v5 }
   0xe   : > { %s1336_s16 = sshll.u32 %s1457_s25, 2 }
   0xf   : > { %1170 = vmatpush3.bf16.msra.mxu0 %v1241_v4  ;;  %s1348_s24 = scalar_lea.vmem %s1449_s0, %s1336_s16  ;;  %s1397_s20 = scalar_lea.vmem %s1455_s6, %s1336_s16 }
  0x10   : > { %1202 = vmatpush3.bf16.msra.mxu1 %v1242_v5  ;;  %1171 = vmatprep.subr.bf16.mxu0 %v1243_v6  ;;  %v1253_v11 = vld [vmem:[%s1348_s24] sm:$0xff]   ;;  %v1254_v17 = vld [vmem:[%s1348_s24 + $0x8] sm:$0xff]   ;;  %v1255_v18 = vld [vmem:[%s1348_s24 + $0x10] sm:$0xff]  }
  0x11   : > { %1203 = vmatprep.subr.bf16.mxu1 %v1244_v7  ;;  %1181 = vmatprep.mubr.bf16.mxu0 %v1253_v11  ;;  %v1256_v19 = vld [vmem:[%s1348_s24 + $0x18] sm:$0xff]   ;;  %v1257_v20 = vld [vmem:[%s1348_s24 + $0x20] sm:$0xff]   ;;  %v1258_v21 = vld [vmem:[%s1348_s24 + $0x28] sm:$0xff]  }
  0x12   : > { %1213 = vmatprep.mubr.bf16.mxu1 %v1253_v11  ;;  %v1259_v22 = vld [vmem:[%s1348_s24 + $0x30] sm:$0xff]   ;;  %v1260_v23 = vld [vmem:[%s1348_s24 + $0x38] sm:$0xff]   ;;  %s1404_s24 = scalar_lea.vmem %s1454_s5, %s1336_s16 }
  0x13   : > { %1172 = vmatpush3.bf16.msra.mxu0 %v1243_v6 }
  0x14   : > { %1204 = vmatpush3.bf16.msra.mxu1 %v1244_v7  ;;  %1173 = vmatprep.subr.bf16.mxu0 %v1245_v8 }
  0x15   : > { %1205 = vmatprep.subr.bf16.mxu1 %v1246_v9 }
  0x17   : > { %1174 = vmatpush3.bf16.msra.mxu0 %v1245_v8 }
  0x18   : > { %1206 = vmatpush3.bf16.msra.mxu1 %v1246_v9  ;;  %1175 = vmatprep.subr.bf16.mxu0 %v1247_v10 }
  0x19   : > { %1207 = vmatprep.subr.bf16.mxu1 %v1248_v12 }
  0x1b   : > { %1176 = vmatpush3.bf16.msra.mxu0 %v1247_v10 }
  0x1c   : > { %1208 = vmatpush3.bf16.msra.mxu1 %v1248_v12  ;;  %1177 = vmatprep.subr.bf16.mxu0 %v1249_v13 }
  0x1d   : > { %1209 = vmatprep.subr.bf16.mxu1 %v1250_v14 }
  0x1f   : > { %1178 = vmatpush3.bf16.msra.mxu0 %v1249_v13 }
  0x20   : > { %1210 = vmatpush3.bf16.msra.mxu1 %v1250_v14  ;;  %1179 = vmatprep.subr.bf16.mxu0 %v1251_v15 }
  0x21   : > { %1211 = vmatprep.subr.bf16.mxu1 %v1252_v16 }
  0x23   : > { %1180 = vmatpush3.bf16.msra.mxu0 %v1251_v15 }
  0x24   : > { %1212 = vmatpush3.bf16.msra.mxu1 %v1252_v16 }
  0x26   : > { %1182 = vmatmul.mubr.bf16.vlgmr.msra.gmra.mrb[0].mxu0 %v1254_v17 }
  0x27   : > { %1214 = vmatmul.mubr.bf16.vlgmr.msra.gmra.mrb[0].mxu1 %v1254_v17  ;;  %1185 = vmatprep.mubr.bf16.mxu0 %v1255_v18 }
  0x28   : > { %1217 = vmatprep.mubr.bf16.mxu1 %v1255_v18 }
  0x2e   : > { %1186 = vmatmul.mubr.bf16.gmra.mrb[4].mxu0 %v1256_v19 }
  0x2f   : > { %1218 = vmatmul.mubr.bf16.gmra.mrb[4].mxu1 %v1256_v19  ;;  %1189 = vmatprep.mubr.bf16.mxu0 %v1257_v20 }
  0x30   : > { %1221 = vmatprep.mubr.bf16.mxu1 %v1257_v20 }
  0x36   : > { %1190 = vmatmul.mubr.bf16.gmra.mrb[8].mxu0 %v1258_v21 }
  0x37   : > { %1222 = vmatmul.mubr.bf16.gmra.mrb[8].mxu1 %v1258_v21  ;;  %1193 = vmatprep.mubr.bf16.mxu0 %v1259_v22 }
  0x38   : > { %1225 = vmatprep.mubr.bf16.mxu1 %v1259_v22 }
  0x3e   : > { %1194 = vmatmul.mubr.bf16.gmra.mrb[12].mxu0 %v1260_v23 }
  0x3f   : > { %1226 = vmatmul.mubr.bf16.gmra.mrb[12].mxu1 %v1260_v23 }
  0xf9   : > { %v1183_v26 = vpop.f32.mrb[0].mxu0 }
  0xfa   : > { %v448_v27 = vadd.f32 %v1183_v26, %v1379_v24  ;;  %v1215_v28 = vpop.f32.mrb[0].mxu1  ;;  %v439_v29 = vpop.f32.mrb[1].mxu0 }
  0xfb   : > { %v712_v30 = vadd.f32 %v1215_v28, %v1384_v25  ;;  %v440_v31 = vadd.f32 %v1379_v24, %v439_v29  ;;  %v703_v32 = vpop.f32.mrb[1].mxu1  ;;  %v1184_v33 = vpop.f32.mrb[2].mxu0 }
  0xfc   : > { %v704_v34 = vadd.f32 %v1384_v25, %v703_v32  ;;  %v451_v35 = vadd.f32 %v1184_v33, %v1379_v24  ;;  %v1216_v36 = vpop.f32.mrb[2].mxu1  ;;  %v442_v37 = vpop.f32.mrb[3].mxu0  ;;  %v504_v41 = vmax.f32 %v448_v27, 0.0 }
  0xfd   : > { %v715_v38 = vadd.f32 %v1216_v36, %v1384_v25  ;;  %v443_v39 = vadd.f32 %v1379_v24, %v442_v37  ;;  %v706_v40 = vpop.f32.mrb[3].mxu1  ;;  %v502_v44 = vmax.f32 %v440_v31, 0.0 }
  0xfe   : > { %v505_v42 = vmax.f32 %v451_v35, 0.0  ;;  %v707_v43 = vadd.f32 %v1384_v25, %v706_v40 }
  0xff   : > { %v1087_v45 = vpack.c.bf16 %v715_v38, %v712_v30  ;;  %v503_v46 = vmax.f32 %v443_v39, 0.0 }
 0x100   : > { %v1047_v47 = vpack.c.bf16 %v505_v42, %v504_v41  ;;  %v1082_v48 = vpack.c.bf16 %v707_v43, %v704_v34 }
 0x101   : > { %1126 = vst [vmem:[%s1397_s20 + $0x8] sm:$0xff] %v1087_v45   ;;  %v1042_v49 = vpack.c.bf16 %v503_v46, %v502_v44  ;;  %v1187_v50 = vpop.f32.mrb[4].mxu0 }
 0x102   : > { %1119 = vst [vmem:[%s1404_s24 + $0x8] sm:$0xff] %v1047_v47   ;;  %1083 = vst [vmem:[%s1397_s20] sm:$0xff] %v1082_v48   ;;  %v464_v51 = vadd.f32 %v1187_v50, %v1379_v24  ;;  %v1219_v52 = vpop.f32.mrb[4].mxu1  ;;  %v455_v53 = vpop.f32.mrb[5].mxu0 }
 0x103   : > { %1043 = vst [vmem:[%s1404_s24] sm:$0xff] %v1042_v49   ;;  %v728_v54 = vadd.f32 %v1219_v52, %v1384_v25  ;;  %v456_v55 = vadd.f32 %v1379_v24, %v455_v53  ;;  %v719_v56 = vpop.f32.mrb[5].mxu1  ;;  %v1188_v57 = vpop.f32.mrb[6].mxu0 }
 0x104   : > { %v720_v58 = vadd.f32 %v1384_v25, %v719_v56  ;;  %v467_v59 = vadd.f32 %v1188_v57, %v1379_v24  ;;  %v1220_v60 = vpop.f32.mrb[6].mxu1  ;;  %v458_v61 = vpop.f32.mrb[7].mxu0  ;;  %v508_v1 = vmax.f32 %v464_v51, 0.0 }
 0x105   : > { %v731_v62 = vadd.f32 %v1220_v60, %v1384_v25  ;;  %v459_v63 = vadd.f32 %v1379_v24, %v458_v61  ;;  %v722_v0 = vpop.f32.mrb[7].mxu1  ;;  %v506_v4 = vmax.f32 %v456_v55, 0.0 }
 0x106   : > { %v509_v2 = vmax.f32 %v467_v59, 0.0  ;;  %v723_v3 = vadd.f32 %v1384_v25, %v722_v0 }
 0x107   : > { %v1097_v5 = vpack.c.bf16 %v731_v62, %v728_v54  ;;  %v507_v6 = vmax.f32 %v459_v63, 0.0 }
 0x108   : > { %v1057_v7 = vpack.c.bf16 %v509_v2, %v508_v1  ;;  %v1092_v8 = vpack.c.bf16 %v723_v3, %v720_v58 }
 0x109   : > { %1128 = vst [vmem:[%s1397_s20 + $0x18] sm:$0xff] %v1097_v5   ;;  %v1052_v9 = vpack.c.bf16 %v507_v6, %v506_v4  ;;  %v1191_v10 = vpop.f32.mrb[8].mxu0 }
 0x10a   : > { %1121 = vst [vmem:[%s1404_s24 + $0x18] sm:$0xff] %v1057_v7   ;;  %1127 = vst [vmem:[%s1397_s20 + $0x10] sm:$0xff] %v1092_v8   ;;  %v480_v11 = vadd.f32 %v1191_v10, %v1379_v24  ;;  %v1223_v12 = vpop.f32.mrb[8].mxu1  ;;  %v471_v13 = vpop.f32.mrb[9].mxu0 }
 0x10b   : > { %1120 = vst [vmem:[%s1404_s24 + $0x10] sm:$0xff] %v1052_v9   ;;  %v744_v14 = vadd.f32 %v1223_v12, %v1384_v25  ;;  %v472_v15 = vadd.f32 %v1379_v24, %v471_v13  ;;  %v735_v16 = vpop.f32.mrb[9].mxu1  ;;  %v1192_v17 = vpop.f32.mrb[10].mxu0 }
 0x10c   : > { %v736_v18 = vadd.f32 %v1384_v25, %v735_v16  ;;  %v483_v19 = vadd.f32 %v1192_v17, %v1379_v24  ;;  %v1224_v20 = vpop.f32.mrb[10].mxu1  ;;  %v474_v21 = vpop.f32.mrb[11].mxu0  ;;  %v512_v27 = vmax.f32 %v480_v11, 0.0 }
 0x10d   : > { %v747_v22 = vadd.f32 %v1224_v20, %v1384_v25  ;;  %v475_v23 = vadd.f32 %v1379_v24, %v474_v21  ;;  %v738_v26 = vpop.f32.mrb[11].mxu1  ;;  %v510_v30 = vmax.f32 %v472_v15, 0.0 }
 0x10e   : > { %v513_v28 = vmax.f32 %v483_v19, 0.0  ;;  %v739_v29 = vadd.f32 %v1384_v25, %v738_v26 }
 0x10f   : > { %v1107_v31 = vpack.c.bf16 %v747_v22, %v744_v14  ;;  %v511_v32 = vmax.f32 %v475_v23, 0.0 }
 0x110   : > { %v1067_v33 = vpack.c.bf16 %v513_v28, %v512_v27  ;;  %v1102_v34 = vpack.c.bf16 %v739_v29, %v736_v18 }
 0x111   : > { %1130 = vst [vmem:[%s1397_s20 + $0x28] sm:$0xff] %v1107_v31   ;;  %v1062_v35 = vpack.c.bf16 %v511_v32, %v510_v30  ;;  %v1195_v36 = vpop.f32.mrb[12].mxu0 }
 0x112   : > { %1123 = vst [vmem:[%s1404_s24 + $0x28] sm:$0xff] %v1067_v33   ;;  %1129 = vst [vmem:[%s1397_s20 + $0x20] sm:$0xff] %v1102_v34   ;;  %v496_v37 = vadd.f32 %v1195_v36, %v1379_v24  ;;  %v1227_v38 = vpop.f32.mrb[12].mxu1  ;;  %v487_v39 = vpop.f32.mrb[13].mxu0 }
 0x113   : > { %1122 = vst [vmem:[%s1404_s24 + $0x20] sm:$0xff] %v1062_v35   ;;  %v760_v40 = vadd.f32 %v1227_v38, %v1384_v25  ;;  %v488_v41 = vadd.f32 %v1379_v24, %v487_v39  ;;  %v751_v42 = vpop.f32.mrb[13].mxu1  ;;  %v1196_v43 = vpop.f32.mrb[14].mxu0 }
 0x114   : > { %v752_v44 = vadd.f32 %v1384_v25, %v751_v42  ;;  %v499_v45 = vadd.f32 %v1196_v43, %v1379_v24  ;;  %v1228_v46 = vpop.f32.mrb[14].mxu1  ;;  %v490_v47 = vpop.f32.mrb[15].mxu0  ;;  %v516_v51 = vmax.f32 %v496_v37, 0.0 }
 0x115   : > { %v763_v48 = vadd.f32 %v1228_v46, %v1384_v25  ;;  %v491_v49 = vadd.f32 %v1379_v24, %v490_v47  ;;  %v754_v50 = vpop.f32.mrb[15].mxu1  ;;  %v514_v54 = vmax.f32 %v488_v41, 0.0 }
 0x116   : > { %v517_v52 = vmax.f32 %v499_v45, 0.0  ;;  %v755_v53 = vadd.f32 %v1384_v25, %v754_v50 }
 0x117   : > { %v1117_v55 = vpack.c.bf16 %v763_v48, %v760_v40  ;;  %v515_v56 = vmax.f32 %v491_v49, 0.0 }
 0x118   : > { %v1077_v57 = vpack.c.bf16 %v517_v52, %v516_v51  ;;  %v1112_v58 = vpack.c.bf16 %v755_v53, %v752_v44 }
 0x119   : > { %1132 = vst [vmem:[%s1397_s20 + $0x38] sm:$0xff] %v1117_v55   ;;  %v1072_v59 = vpack.c.bf16 %v515_v56, %v514_v54 }
 0x11a   : > { %1125 = vst [vmem:[%s1404_s24 + $0x38] sm:$0xff] %v1077_v57   ;;  %1131 = vst [vmem:[%s1397_s20 + $0x30] sm:$0xff] %v1112_v58  }
 0x11b   : > { %1124 = vst [vmem:[%s1404_s24 + $0x30] sm:$0xff] %v1072_v59  }
 0x11c PF: > { %s17_s21 = sadd.s32 1, %s1267_s21  }
 0x11d   : > { %p14_p4 = scmp.ge.s32.totalorder %s17_s21, 6  }
 0x11f   :  { %16 = sbr.rel (!%p14_p4) target bundleno = 1 (0x1), region = 82 }

// kernel: bottleneck_forward.4
= control target key start
LH: loop header
LB: loop body
LE: loop exit
PB: predicated region body
PF: predicated region fallthrough
CT: control target
= control target key end

     0   :  { %s7169_s12 = smov 0   ;;  %s9015_s0 = inlined_call_operand.vmem [shape: bf16[2,18,18,128], index: 0, kind: input, shape index: {}]   ;;  %s9016_s1 = inlined_call_operand.vmem [shape: bf16[9,128,128], index: 1, kind: input, shape index: {}]   ;;  %s9017_s2 = inlined_call_operand.vmem [shape: f32[1,128], index: 2, kind: input, shape index: {}]   ;;  %s9018_s3 = inlined_call_operand.vmem [shape: bf16[2,16,16,128], index: 3, kind: output, shape index: {}]  }
   0x1 LB: > { %s5267_s13 = sadd.s32 4294967295, %s7147_s12   ;;  %p5271_p0 = scmp.ge.s32.totalorder %s7147_s12, 1  ;;  %s7147_s12 = sphi %s7169_s12, %s13_s12  }
   0x2   : > { %p137_p1 = scmp.lt.s32.totalorder %s7147_s12, 3 }
   0x4   : > { %p138_p2 = pnand %p5271_p0, %p137_p1 }
   0x6   : > { %141 = sbr.rel (%p138_p2) target bundleno = 589 (0x24d), region = 32 }
   0xd   : > { %v6951_v0 = vld [vmem:[%s9016_s1 + $0x40] sm:$0xff]   ;;  %p161_p3 = scmp.lt.s32.totalorder %s5267_s13, 1  ;;  %v6953_v2 = vld [vmem:[%s9016_s1 + $0x48] sm:$0xff]   ;;  %v6955_v4 = vld [vmem:[%s9016_s1 + $0x50] sm:$0xff]   ;;  %vm236_vm0 = vsmask.f32 3328 }
   0xe   : > { %v6952_v1 = vld [vmem:[%s9016_s1 + $0x100] sm:$0xff]   ;;  %6238 = vmatprep.subr.bf16.mxu1 %v6951_v0  ;;  %v6954_v3 = vld [vmem:[%s9016_s1 + $0x108] sm:$0xff]   ;;  %v6956_v5 = vld [vmem:[%s9016_s1 + $0x110] sm:$0xff]   ;;  %vm237_vm1 = vsmask.f32 7440  ;;  %vm1266_vm3 = vcmask 1042432  }
   0xf   : > { %6430 = vmatprep.subr.bf16.mxu0 %v6952_v1  ;;  %6239 = vmatpush3.bf16.msra.mxu1 %v6951_v0  ;;  %s9086_s13 = smov (!%p161_p3, %s5267_s13), 1  ;;  %v6957_v6 = vld [vmem:[%s9016_s1 + $0x58] sm:$0xff]   ;;  %v6959_v8 = vld [vmem:[%s9016_s1 + $0x60] sm:$0xff]   ;;  %v6961_v10 = vld [vmem:[%s9016_s1 + $0x68] sm:$0xff]   ;;  %vm1267_vm4 = vcmask 1046532  }
  0x10   : > { %6431 = vmatpush3.bf16.msra.mxu0 %v6952_v1  ;;  %6240 = vmatprep.subr.bf16.mxu1 %v6953_v2  ;;  %v6958_v7 = vld [vmem:[%s9016_s1 + $0x118] sm:$0xff]   ;;  %s6942_s30 = smul.u32 216, %s9086_s13  ;;  %v6960_v9 = vld [vmem:[%s9016_s1 + $0x120] sm:$0xff]   ;;  %v6962_v11 = vld [vmem:[%s9016_s1 + $0x128] sm:$0xff]   ;;  %s5894_s7 = sshll.u32 %s9086_s13, 7 }
  0x11   : > { %6432 = vmatprep.subr.bf16.mxu0 %v6954_v3  ;;  %v6963_v25 = vld [vmem:[%s9016_s1 + $0x70] sm:$0xff]   ;;  %v6965_v36 = vld [vmem:[%s9016_s1 + $0x78] sm:$0xff]   ;;  %vm7245_vm2 = vmor %vm236_vm0, %vm237_vm1  ;;  %s8962_s11 = scalar_lea.vmem %s9018_s3, %s5894_s7 }
  0x12   : > { %s7213_s10 = scalar_lea.vmem %s9015_s0, %s6942_s30  ;;  %v6964_v30 = vld [vmem:[%s9016_s1 + $0x130] sm:$0xff]   ;;  %v6966_v51 = vld [vmem:[%s9016_s1 + $0x138] sm:$0xff]   ;;  %vm7491_vm5 = vmor %vm1266_vm3, %vm1267_vm4 }
  0x13   : > { %6241 = vmatpush3.bf16.msra.mxu1 %v6953_v2  ;;  %v172_v12 = vld [vmem:[%s7213_s10] sm:$0xf]  ;;  %v173_v13 = vld [vmem:[%s7213_s10 + $0x4] sm:$0xf]  ;;  %v220_v14 = vld [vmem:[%s7213_s10 + $0x8] sm:$0x1] }
  0x14   : > { %6433 = vmatpush3.bf16.msra.mxu0 %v6954_v3  ;;  %6242 = vmatprep.subr.bf16.mxu1 %v6955_v4  ;;  %v240_v15 = vshrl.u32 %v172_v12, 16  ;;  %v243_v16 = vshll.u32 %v172_v12, 16  ;;  %v249_v17 = vshll.u32 %v173_v13, 16  ;;  %v253_v18 = vshrl.u32 %v173_v13, 16  ;;  %v5467_v20 = vld [vmem:[%s7213_s10 + $0xc] sm:$0xf] }
  0x15   : > { %6434 = vmatprep.subr.bf16.mxu0 %v6956_v5  ;;  %v259_v19 = vshll.u32 %v220_v14, 16  ;;  %v7226_v23 = vld [vmem:[%s7213_s10 + $0x10] sm:$0xf]  ;;  %v7229_v24 = vld [vmem:[%s7213_s10 + $0x14] sm:$0x1]  ;;  %v2139_v29 = vshrl.u32 %v5467_v20, 16 }
  0x16   : > { %v242_v21 = vrot.slane %v240_v15, 4  ;;  %v245_v22 = vrot.slane %v243_v16, 5  ;;  %v251_v26 = vrot.slane %v249_v17, 5  ;;  %v255_v27 = vrot.slane %v253_v18, 4  ;;  %v174_v35 = vld [vmem:[%s7213_s10 + $0xc] sm:$0xf] }
  0x17   : > { %6243 = vmatpush3.bf16.msra.mxu1 %v6955_v4  ;;  %v261_v28 = vrot.slane %v259_v19, 5  ;;  %v2142_v32 = vshll.u32 %v5467_v20, 16  ;;  %v2148_v33 = vshll.u32 %v7226_v23, 16  ;;  %v2152_v34 = vshrl.u32 %v7226_v23, 16  ;;  %v175_v42 = vld [vmem:[%s7213_s10 + $0x10] sm:$0xf] }
  0x18   : > { %6435 = vmatpush3.bf16.msra.mxu0 %v6956_v5  ;;  %6244 = vmatprep.subr.bf16.mxu1 %v6957_v6  ;;  %v246_v31 = vor.u32 %v245_v22, %v242_v21  ;;  %v256_v38 = vor.u32 %v255_v27, %v251_v26  ;;  %v2141_v39 = vrot.slane %v2139_v29, 4  ;;  %v2158_v40 = vshll.u32 %v7229_v24, 16  ;;  %v221_v55 = vld [vmem:[%s7213_s10 + $0x14] sm:$0x1]  ;;  %v5470_v57 = vld [vmem:[%s7213_s10 + $0x18] sm:$0xf] }
  0x19   : > { %6436 = vmatprep.subr.bf16.mxu0 %v6958_v7  ;;  %v2913_v41 = vrot.slane %v7229_v24, 5  ;;  %v2144_v44 = vrot.slane %v2142_v32, 5  ;;  %v2150_v45 = vrot.slane %v2148_v33, 5  ;;  %v2154_v46 = vrot.slane %v2152_v34, 4  ;;  %v7262_v62 = vld [vmem:[%s7213_s10 + $0x1c] sm:$0xf] }
  0x1a   : > { %v247_v43 = vrot.slane %v246_v31, 4  ;;  %v257_v47 = vrot.slane %v256_v38, 4  ;;  %v2160_v48 = vrot.slane %v2158_v40, 5  ;;  %v264_v49 = vshrl.u32 %v174_v35, 16  ;;  %v6967_v3 = vld [vmem:[%s9016_s1] sm:$0xff]  }
  0x1b   : > { %6245 = vmatpush3.bf16.msra.mxu1 %v6957_v6  ;;  %v267_v50 = vshll.u32 %v174_v35, 16  ;;  %v2145_v53 = vor.u32 %v2144_v44, %v2141_v39  ;;  %v2155_v54 = vor.u32 %v2154_v46, %v2150_v45  ;;  %v273_v56 = vshll.u32 %v175_v42, 16  ;;  %v7270_v4 = vld [vmem:[%s9016_s1 + $0x140] sm:$0xff]   ;;  %v176_v21 = vld [vmem:[%s7213_s10 + $0x18] sm:$0xf]  ;;  %v6970_v46 = vld [vmem:[%s9016_s1 + $0x8] sm:$0xff]  }
  0x1c   : > { %6437 = vmatpush3.bf16.msra.mxu0 %v6958_v7  ;;  %6246 = vmatprep.subr.bf16.mxu1 %v6959_v8  ;;  %v252_v52 = vsel %vm7245_vm2, %v247_v43, %v251_v26  ;;  %v262_v58 = vsel %vm7245_vm2, %v257_v47, %v261_v28  ;;  %v266_v59 = vrot.slane %v264_v49, 4  ;;  %v277_v61 = vshrl.u32 %v175_v42, 16  ;;  %v177_v28 = vld [vmem:[%s7213_s10 + $0x1c] sm:$0xf]  ;;  %v222_v33 = vld [vmem:[%s7213_s10 + $0x20] sm:$0x1] }
  0x1d   : > { %6438 = vmatprep.subr.bf16.mxu0 %v6960_v9  ;;  %v269_v60 = vrot.slane %v267_v50, 5  ;;  %v5291_v63 = vcombine.low %v252_v52, %v262_v58  ;;  %v2146_v0 = vrot.slane %v2145_v53, 4  ;;  %v2156_v1 = vrot.slane %v2155_v54, 4  ;;  %v5473_v39 = vld [vmem:[%s7213_s10 + $0x24] sm:$0xf] }
  0x1e   : > { %v275_v2 = vrot.slane %v273_v56, 5  ;;  %v279_v6 = vrot.slane %v277_v61, 4  ;;  %v283_v7 = vshll.u32 %v221_v55, 16  ;;  %v2166_v12 = vshll.u32 %v5470_v57, 16  ;;  %v178_v52 = vld [vmem:[%s7213_s10 + $0x24] sm:$0xf] }
  0x1f   : > { %6247 = vmatpush3.bf16.msra.mxu1 %v6959_v8  ;;  %v270_v5 = vor.u32 %v269_v60, %v266_v59  ;;  %v7273_v8 = vld [vmem:[%s7213_s10 + $0x20] sm:$0x1]  ;;  %6254 = vmatprep.mubr.bf16.mxu1 %v5291_v63  ;;  %v2172_v19 = vshll.u32 %v7262_v62, 16  ;;  %v2176_v20 = vshrl.u32 %v7262_v62, 16  ;;  %v2917_v27 = vrot.slane %v7262_v62, 5  ;;  %v6969_v63 = vld [vmem:[%s9016_s1 + $0x148] sm:$0xff]  }
  0x20   : > { %6439 = vmatpush3.bf16.msra.mxu0 %v6960_v9  ;;  %6248 = vmatprep.subr.bf16.mxu1 %v6961_v10  ;;  %v2151_v9 = vsel %vm7245_vm2, %v2146_v0, %v2150_v45  ;;  %v280_v15 = vor.u32 %v279_v6, %v275_v2  ;;  %v285_v16 = vrot.slane %v283_v7, 5  ;;  %v2168_v18 = vrot.slane %v2166_v12, 5  ;;  %v7298_v45 = vld [vmem:[%s7213_s10 + $0x28] sm:$0xf] }
  0x21   : > { %6440 = vmatprep.subr.bf16.mxu0 %v6962_v11  ;;  %v271_v14 = vrot.slane %v270_v5, 4  ;;  %v2182_v26 = vshll.u32 %v7273_v8, 16  ;;  %v2178_v31 = vrot.slane %v2176_v20, 4  ;;  %v2920_v32 = vrot.slane %v7273_v8, 5  ;;  %v179_v5 = vld [vmem:[%s7213_s10 + $0x28] sm:$0xf] }
  0x22   : > { %v288_v38 = vshrl.u32 %v176_v21, 16  ;;  %v291_v44 = vshll.u32 %v176_v21, 16  ;;  %v301_v49 = vshrl.u32 %v177_v28, 16  ;;  %v307_v50 = vshll.u32 %v222_v33, 16  ;;  %v7329_v33 = vld [vmem:[%s7213_s10 + $0x34] sm:$0xf] }
  0x23   : > { %6249 = vmatpush3.bf16.msra.mxu1 %v6961_v10  ;;  %v2161_v10 = vsel %vm7245_vm2, %v2156_v1, %v2160_v48  ;;  %v276_v22 = vsel %vm7245_vm2, %v271_v14, %v275_v2  ;;  %v2184_v35 = vrot.slane %v2182_v26, 5  ;;  %v297_v48 = vshll.u32 %v177_v28, 16 }
  0x24   : > { %6441 = vmatpush3.bf16.msra.mxu0 %v6962_v11  ;;  %6250 = vmatprep.subr.bf16.mxu1 %v6963_v25  ;;  %v2163_v11 = vshrl.u32 %v5470_v57, 16  ;;  %v5531_v13 = vcombine.low %v2151_v9, %v2161_v10  ;;  %v290_v47 = vrot.slane %v288_v38, 4  ;;  %v293_v55 = vrot.slane %v291_v44, 5 }
  0x25   : > { %6442 = vmatprep.subr.bf16.mxu0 %v6964_v30  ;;  %v2187_v56 = vshrl.u32 %v5473_v39, 16  ;;  %v299_v57 = vrot.slane %v297_v48, 5  ;;  %v303_v58 = vrot.slane %v301_v49, 4  ;;  %v309_v59 = vrot.slane %v307_v50, 5  ;;  %v6972_v48 = vld [vmem:[%s9016_s1 + $0x158] sm:$0xff]  }
  0x26   : > { %v2165_v17 = vrot.slane %v2163_v11, 4  ;;  %6446 = vmatprep.mubr.bf16.mxu0 %v5531_v13  ;;  %v2190_v60 = vshll.u32 %v5473_v39, 16  ;;  %v294_v0 = vor.u32 %v293_v55, %v290_v47  ;;  %v2196_v2 = vshll.u32 %v7298_v45, 16  ;;  %v223_v11 = vld [vmem:[%s7213_s10 + $0x2c] sm:$0x1] }
  0x27   : > { %6251 = vmatpush3.bf16.msra.mxu1 %v6963_v25  ;;  %v281_v25 = vrot.slane %v280_v15, 4  ;;  %v2189_v1 = vrot.slane %v2187_v56, 4  ;;  %v304_v7 = vor.u32 %v303_v58, %v299_v57  ;;  %v2200_v10 = vshrl.u32 %v7298_v45, 16 }
  0x28   : > { %6443 = vmatpush3.bf16.msra.mxu0 %v6964_v30  ;;  %6252 = vmatprep.subr.bf16.mxu1 %v6965_v36  ;;  %v2169_v29 = vor.u32 %v2168_v18, %v2165_v17  ;;  %v2174_v30 = vrot.slane %v2172_v19, 5  ;;  %v2192_v9 = vrot.slane %v2190_v60, 5  ;;  %v295_v12 = vrot.slane %v294_v0, 4  ;;  %v6979_v60 = vld [vmem:[%s9016_s1 + $0x20] sm:$0xff]  }
  0x29   : > { %6444 = vmatprep.subr.bf16.mxu0 %v6966_v51  ;;  %v286_v34 = vsel %vm7245_vm2, %v281_v25, %v285_v16  ;;  %v2198_v13 = vrot.slane %v2196_v2, 5  ;;  %v312_v15 = vshrl.u32 %v178_v52, 16  ;;  %v5476_v16 = vld [vmem:[%s7213_s10 + $0x30] sm:$0xf]  ;;  %v305_v17 = vrot.slane %v304_v7, 4 }
  0x2a   : > { %v5292_v40 = vcombine.low %v276_v22, %v286_v34  ;;  %v2170_v42 = vrot.slane %v2169_v29, 4  ;;  %v2179_v43 = vor.u32 %v2178_v31, %v2174_v30  ;;  %v2193_v18 = vor.u32 %v2192_v9, %v2189_v1  ;;  %v6976_v34 = vld [vmem:[%s9016_s1 + $0x18] sm:$0xff]  }
  0x2b   : > { %6253 = vmatpush3.bf16.msra.mxu1 %v6965_v36  ;;  %v7294_v36 = vrot.slane %v2917_v27, 4  ;;  %v2202_v19 = vrot.slane %v2200_v10, 4  ;;  %v315_v20 = vshll.u32 %v178_v52, 16  ;;  %v300_v21 = vsel %vm7245_vm2, %v295_v12, %v299_v57  ;;  %v224_v2 = vld [vmem:[%s7213_s10 + $0x38] sm:$0x1] }
  0x2c   : > { %6445 = vmatpush3.bf16.msra.mxu0 %v6966_v51  ;;  %6286 = vmatprep.subr.bf16.mxu1 %v6967_v3  ;;  %v7304_v51 = vld [vmem:[%s7213_s10 + $0x2c] sm:$0x1]  ;;  %v2175_v53 = vsel %vm7245_vm2, %v2170_v42, %v2174_v30  ;;  %v2180_v54 = vrot.slane %v2179_v43, 4  ;;  %v314_v25 = vrot.slane %v312_v15, 4  ;;  %v321_v26 = vshll.u32 %v179_v5, 16 }
  0x2d   : > { %6478 = vmatprep.subr.bf16.mxu0 %v7270_v4  ;;  %v2206_v14 = vshll.u32 %v7304_v51, 16  ;;  %v310_v28 = vsel %vm7245_vm2, %v305_v17, %v309_v59  ;;  %v2194_v29 = vrot.slane %v2193_v18, 4  ;;  %v2203_v30 = vor.u32 %v2202_v19, %v2198_v13  ;;  %v181_v59 = vld [vmem:[%s7213_s10 + $0x34] sm:$0xf]  ;;  %v5479_v9 = vld [vmem:[%s7213_s10 + $0x3c] sm:$0xf] }
  0x2e   : > { %6255 = vmatmul.mubr.bf16.vlgmr.msra.gmra.mrb[0].mxu1 %v5292_v40  ;;  %v2185_v61 = vsel %vm7245_vm2, %v2180_v54, %v2184_v35  ;;  %v317_v31 = vrot.slane %v315_v20, 5  ;;  %v5293_v35 = vcombine.low %v300_v21, %v310_v28  ;;  %v323_v38 = vrot.slane %v321_v26, 5  ;;  %v180_v54 = vld [vmem:[%s7213_s10 + $0x30] sm:$0xf]  ;;  %v7363_v19 = vld [vmem:[%s7213_s10 + $0x40] sm:$0xf] }
  0x2f   : > { %6287 = vmatpush3.bf16.msra.mxu1 %v6967_v3  ;;  %v6973_v3 = vld [vmem:[%s9016_s1 + $0x10] sm:$0xff]   ;;  %v5532_v6 = vcombine.low %v2175_v53, %v2185_v61  ;;  %v2208_v22 = vrot.slane %v2206_v14, 5  ;;  %v325_v39 = vshrl.u32 %v179_v5, 16  ;;  %v331_v40 = vshll.u32 %v223_v11, 16  ;;  %v6981_v14 = vld [vmem:[%s9016_s1 + $0x28] sm:$0xff]   ;;  %v6974_v20 = vld [vmem:[%s9016_s1 + $0x160] sm:$0xff]  }
  0x30   : > { %6288 = vmatprep.subr.bf16.mxu1 %v6970_v46  ;;  %v2199_v42 = vsel %vm7245_vm2, %v2194_v29, %v2198_v13  ;;  %v2204_v43 = vrot.slane %v2203_v30, 4  ;;  %v318_v44 = vor.u32 %v317_v31, %v314_v25  ;;  %v2211_v47 = vshrl.u32 %v5476_v16, 16  ;;  %6258 = vmatprep.mubr.bf16.mxu1 %v5293_v35  ;;  %v7371_v28 = vld [vmem:[%s7213_s10 + $0x44] sm:$0x1]  ;;  %v6983_v35 = vld [vmem:[%s9016_s1 + $0x30] sm:$0xff]  }
  0x31   : > { %6447 = vmatmul.mubr.bf16.vlgmr.msra.gmra.mrb[0].mxu0 %v5532_v6  ;;  %v327_v49 = vrot.slane %v325_v39, 4  ;;  %v333_v50 = vrot.slane %v331_v40, 5  ;;  %v2214_v52 = vshll.u32 %v5476_v16, 16  ;;  %v2220_v53 = vshll.u32 %v7329_v33, 16 }
  0x32   : > { %6479 = vmatpush3.bf16.msra.mxu0 %v7270_v4  ;;  %v6971_v4 = vld [vmem:[%s9016_s1 + $0x150] sm:$0xff]   ;;  %v2209_v55 = vsel %vm7245_vm2, %v2204_v43, %v2208_v22  ;;  %v319_v56 = vrot.slane %v318_v44, 4  ;;  %v2213_v57 = vrot.slane %v2211_v47, 4  ;;  %v2224_v58 = vshrl.u32 %v7329_v33, 16 }
  0x33   : > { %6289 = vmatpush3.bf16.msra.mxu1 %v6970_v46  ;;  %6480 = vmatprep.subr.bf16.mxu0 %v6969_v63  ;;  %v7340_v46 = vld [vmem:[%s7213_s10 + $0x38] sm:$0x1]  ;;  %v5533_v61 = vcombine.low %v2199_v42, %v2209_v55  ;;  %v2216_v0 = vrot.slane %v2214_v52, 5  ;;  %v2222_v1 = vrot.slane %v2220_v53, 5  ;;  %v336_v7 = vshrl.u32 %v180_v54, 16 }
  0x34   : > { %6290 = vmatprep.subr.bf16.mxu1 %v6973_v3  ;;  %v324_v5 = vsel %vm7245_vm2, %v319_v56, %v323_v38  ;;  %v2230_v6 = vshll.u32 %v7340_v46, 16  ;;  %v339_v12 = vshll.u32 %v180_v54, 16  ;;  %v345_v13 = vshll.u32 %v181_v59, 16  ;;  %v183_v55 = vld [vmem:[%s7213_s10 + $0x40] sm:$0xf] }
  0x35   : > { %6450 = vmatprep.mubr.bf16.mxu0 %v5533_v61  ;;  %v2217_v11 = vor.u32 %v2216_v0, %v2213_v57  ;;  %v338_v17 = vrot.slane %v336_v7, 4  ;;  %v349_v18 = vshrl.u32 %v181_v59, 16  ;;  %v2235_v40 = vshrl.u32 %v5479_v9, 16 }
  0x36   : > { %6481 = vmatpush3.bf16.msra.mxu0 %v6969_v63  ;;  %v328_v63 = vor.u32 %v327_v49, %v323_v38  ;;  %v2232_v16 = vrot.slane %v2230_v6, 5  ;;  %v341_v25 = vrot.slane %v339_v12, 5  ;;  %v347_v26 = vrot.slane %v345_v13, 5 }
  0x37   : > { %6291 = vmatpush3.bf16.msra.mxu1 %v6973_v3  ;;  %6482 = vmatprep.subr.bf16.mxu0 %v6971_v4  ;;  %v2226_v3 = vrot.slane %v2224_v58, 4  ;;  %v2218_v22 = vrot.slane %v2217_v11, 4  ;;  %v351_v31 = vrot.slane %v349_v18, 4  ;;  %v2238_v42 = vshll.u32 %v5479_v9, 16  ;;  %v5482_v9 = vld [vmem:[%s7213_s10 + $0x48] sm:$0xf] }
  0x38   : > { %6292 = vmatprep.subr.bf16.mxu1 %v6976_v34  ;;  %v329_v10 = vrot.slane %v328_v63, 4  ;;  %v342_v39 = vor.u32 %v341_v25, %v338_v17  ;;  %v2244_v49 = vshll.u32 %v7363_v19, 16  ;;  %v2237_v53 = vrot.slane %v2235_v40, 4  ;;  %v225_v63 = vld [vmem:[%s7213_s10 + $0x44] sm:$0x1] }
  0x39   : > { %v2227_v15 = vor.u32 %v2226_v3, %v2222_v1  ;;  %v2223_v38 = vsel %vm7245_vm2, %v2218_v22, %v2222_v1  ;;  %v352_v44 = vor.u32 %v351_v31, %v347_v26  ;;  %v2240_v54 = vrot.slane %v2238_v42, 5  ;;  %v7404_v22 = vld [vmem:[%s7213_s10 + $0x50] sm:$0x1]  ;;  %v6978_v31 = vld [vmem:[%s9016_s1 + $0x178] sm:$0xff]  }
  0x3a   : > { %6483 = vmatpush3.bf16.msra.mxu0 %v6971_v4  ;;  %v334_v21 = vsel %vm7245_vm2, %v329_v10, %v333_v50  ;;  %v355_v4 = vshll.u32 %v224_v2, 16  ;;  %v343_v52 = vrot.slane %v342_v39, 4  ;;  %v2246_v57 = vrot.slane %v2244_v49, 5  ;;  %v6985_v2 = vld [vmem:[%s9016_s1 + $0x38] sm:$0xff]  }
  0x3b   : > { %6293 = vmatpush3.bf16.msra.mxu1 %v6976_v34  ;;  %6484 = vmatprep.subr.bf16.mxu0 %v6972_v48  ;;  %v5294_v29 = vcombine.low %v324_v5, %v334_v21  ;;  %v2228_v30 = vrot.slane %v2227_v15, 4  ;;  %v182_v34 = vld [vmem:[%s7213_s10 + $0x3c] sm:$0xf]  ;;  %v353_v56 = vrot.slane %v352_v44, 4  ;;  %v2248_v58 = vshrl.u32 %v7363_v19, 16  ;;  %v6977_v15 = vld [vmem:[%s9016_s1 + $0x170] sm:$0xff]  }
  0x3c   : > { %6294 = vmatprep.subr.bf16.mxu1 %v6979_v60  ;;  %v357_v47 = vrot.slane %v355_v4, 5  ;;  %v2254_v59 = vshll.u32 %v7371_v28, 16  ;;  %v2241_v61 = vor.u32 %v2240_v54, %v2237_v53  ;;  %v360_v0 = vshrl.u32 %v182_v34, 16  ;;  %v7415_v4 = vld [vmem:[%s9016_s1 + $0x80] sm:$0xff]   ;;  %v185_v53 = vld [vmem:[%s7213_s10 + $0x4c] sm:$0xf] }
  0x3d   : > { %6259 = vmatmul.mubr.bf16.gmra.mrb[4].mxu1 %v5294_v29  ;;  %v2233_v43 = vsel %vm7245_vm2, %v2228_v30, %v2232_v16  ;;  %v363_v1 = vshll.u32 %v182_v34, 16  ;;  %v2250_v3 = vrot.slane %v2248_v58, 4  ;;  %v369_v7 = vshll.u32 %v183_v55, 16  ;;  %v184_v30 = vld [vmem:[%s7213_s10 + $0x48] sm:$0xf] }
  0x3e   : > { %6485 = vmatpush3.bf16.msra.mxu0 %v6972_v48  ;;  %v5534_v50 = vcombine.low %v2223_v38, %v2233_v43  ;;  %v6975_v48 = vld [vmem:[%s9016_s1 + $0x168] sm:$0xff]   ;;  %v358_v5 = vsel %vm7245_vm2, %v353_v56, %v357_v47  ;;  %v2256_v6 = vrot.slane %v2254_v59, 5  ;;  %v2242_v11 = vrot.slane %v2241_v61, 4  ;;  %v226_v54 = vld [vmem:[%s7213_s10 + $0x50] sm:$0x1] }
  0x3f   : > { %6295 = vmatpush3.bf16.msra.mxu1 %v6979_v60  ;;  %6486 = vmatprep.subr.bf16.mxu0 %v6974_v20  ;;  %v348_v60 = vsel %vm7245_vm2, %v343_v52, %v347_v26  ;;  %v362_v12 = vrot.slane %v360_v0, 4  ;;  %v365_v13 = vrot.slane %v363_v1, 5  ;;  %v2251_v16 = vor.u32 %v2250_v3, %v2246_v57  ;;  %v5485_v58 = vld [vmem:[%s7213_s10 + $0x54] sm:$0xf]  ;;  %v7429_v0 = vld [vmem:[%s7213_s10 + $0x58] sm:$0xf] }
  0x40   : > { %6296 = vmatprep.subr.bf16.mxu1 %v6981_v14  ;;  %6451 = vmatmul.mubr.bf16.gmra.mrb[4].mxu0 %v5534_v50  ;;  %v5295_v10 = vcombine.low %v348_v60, %v358_v5  ;;  %v371_v17 = vrot.slane %v369_v7, 5  ;;  %v373_v18 = vshrl.u32 %v183_v55, 16  ;;  %v379_v21 = vshll.u32 %v225_v63, 16 }
  0x41   : > { %v366_v25 = vor.u32 %v365_v13, %v362_v12  ;;  %v2259_v26 = vshrl.u32 %v5482_v9, 16  ;;  %v2262_v29 = vshll.u32 %v5482_v9, 16  ;;  %v2252_v34 = vrot.slane %v2251_v16, 4 }
  0x42   : > { %6487 = vmatpush3.bf16.msra.mxu0 %v6974_v20  ;;  %6262 = vmatprep.mubr.bf16.mxu1 %v5295_v10  ;;  %v2247_v20 = vsel %vm7245_vm2, %v2242_v11, %v2246_v57  ;;  %v381_v38 = vrot.slane %v379_v21, 5  ;;  %v2278_v52 = vshll.u32 %v7404_v22, 16  ;;  %v384_v61 = vshrl.u32 %v184_v30, 16 }
  0x43   : > { %6297 = vmatpush3.bf16.msra.mxu1 %v6981_v14  ;;  %v7398_v14 = vld [vmem:[%s7213_s10 + $0x4c] sm:$0xf]  ;;  %6488 = vmatprep.subr.bf16.mxu0 %v6975_v48  ;;  %v367_v40 = vrot.slane %v366_v25, 4  ;;  %v2261_v42 = vrot.slane %v2259_v26, 4  ;;  %v2264_v43 = vrot.slane %v2262_v29, 5  ;;  %v2257_v47 = vsel %vm7245_vm2, %v2252_v34, %v2256_v6  ;;  %v7434_v6 = vld [vmem:[%s9016_s1 + $0x180] sm:$0xff]  }
  0x44   : > { %6298 = vmatprep.subr.bf16.mxu1 %v6983_v35  ;;  %v2268_v39 = vshll.u32 %v7398_v14, 16  ;;  %v2272_v44 = vshrl.u32 %v7398_v14, 16  ;;  %v5535_v55 = vcombine.low %v2247_v20, %v2257_v47  ;;  %v2280_v60 = vrot.slane %v2278_v52, 5  ;;  %v7441_v20 = vld [vmem:[%s7213_s10 + $0x5c] sm:$0x1] }
  0x45   : > { %v2265_v56 = vor.u32 %v2264_v43, %v2261_v42  ;;  %v387_v63 = vshll.u32 %v184_v30, 16  ;;  %v397_v3 = vshrl.u32 %v185_v53, 16  ;;  %v386_v9 = vrot.slane %v384_v61, 4  ;;  %v187_v43 = vld [vmem:[%s7213_s10 + $0x58] sm:$0xf] }
  0x46   : > { %6489 = vmatpush3.bf16.msra.mxu0 %v6975_v48  ;;  %v2270_v50 = vrot.slane %v2268_v39, 5  ;;  %v372_v48 = vsel %vm7245_vm2, %v367_v40, %v371_v17  ;;  %v2274_v57 = vrot.slane %v2272_v44, 4  ;;  %6454 = vmatprep.mubr.bf16.mxu0 %v5535_v55  ;;  %v403_v11 = vshll.u32 %v226_v54, 16  ;;  %v5488_v52 = vld [vmem:[%s7213_s10 + $0x60] sm:$0xf] }
  0x47   : > { %6299 = vmatpush3.bf16.msra.mxu1 %v6983_v35  ;;  %v375_v35 = vrot.slane %v373_v18, 4  ;;  %6490 = vmatprep.subr.bf16.mxu0 %v6977_v15  ;;  %v2266_v1 = vrot.slane %v2265_v56, 4  ;;  %v389_v10 = vrot.slane %v387_v63, 5  ;;  %v399_v18 = vrot.slane %v397_v3, 4 }
  0x48   : > { %6300 = vmatprep.subr.bf16.mxu1 %v6985_v2  ;;  %v2275_v5 = vor.u32 %v2274_v57, %v2270_v50  ;;  %v405_v21 = vrot.slane %v403_v11, 5  ;;  %v2283_v25 = vshrl.u32 %v5485_v58, 16  ;;  %v2286_v29 = vshll.u32 %v5485_v58, 16 }
  0x49   : > { %v376_v49 = vor.u32 %v375_v35, %v371_v17  ;;  %v2271_v13 = vsel %vm7245_vm2, %v2266_v1, %v2270_v50  ;;  %v390_v17 = vor.u32 %v389_v10, %v386_v9  ;;  %v2292_v30 = vshll.u32 %v7429_v0, 16  ;;  %v186_v35 = vld [vmem:[%s7213_s10 + $0x54] sm:$0xf]  ;;  %v227_v50 = vld [vmem:[%s7213_s10 + $0x5c] sm:$0x1] }
  0x4a   : > { %6491 = vmatpush3.bf16.msra.mxu0 %v6977_v15  ;;  %v2276_v15 = vrot.slane %v2275_v5, 4  ;;  %v2296_v34 = vshrl.u32 %v7429_v0, 16  ;;  %v2285_v42 = vrot.slane %v2283_v25, 4  ;;  %v408_v55 = vshrl.u32 %v186_v35, 16  ;;  %v7469_v25 = vld [vmem:[%s7213_s10 + $0x60] sm:$0xf] }
  0x4b   : > { %6301 = vmatpush3.bf16.msra.mxu1 %v6985_v2  ;;  %v377_v59 = vrot.slane %v376_v49, 4  ;;  %v393_v2 = vshll.u32 %v185_v53, 16  ;;  %6492 = vmatprep.subr.bf16.mxu0 %v6978_v31  ;;  %v391_v39 = vrot.slane %v390_v17, 4  ;;  %v2294_v44 = vrot.slane %v2292_v30, 5  ;;  %v7465_v17 = vld [vmem:[%s7213_s10 + $0x68] sm:$0x1] }
  0x4c   : > { %6334 = vmatprep.subr.bf16.mxu1 %v7415_v4  ;;  %v2281_v26 = vsel %vm7245_vm2, %v2276_v15, %v2280_v60  ;;  %v2298_v47 = vrot.slane %v2296_v34, 4  ;;  %v2302_v49 = vshll.u32 %v7441_v20, 16  ;;  %v7456_v60 = vld [vmem:[%s7213_s10 + $0x64] sm:$0xf]  ;;  %v410_v63 = vrot.slane %v408_v55, 4 }
  0x4d   : > { %v382_v7 = vsel %vm7245_vm2, %v377_v59, %v381_v38  ;;  %v395_v16 = vrot.slane %v393_v2, 5  ;;  %v5536_v38 = vcombine.low %v2271_v13, %v2281_v26  ;;  %v417_v59 = vshll.u32 %v187_v43, 16 }
  0x4e   : > { %v5296_v12 = vcombine.low %v372_v48, %v382_v7  ;;  %6493 = vmatpush3.bf16.msra.mxu0 %v6978_v31  ;;  %v2288_v31 = vrot.slane %v2286_v29, 5  ;;  %v411_v48 = vshll.u32 %v186_v35, 16  ;;  %v2299_v57 = vor.u32 %v2298_v47, %v2294_v44  ;;  %v7472_v35 = vld [vmem:[%s7213_s10 + $0x64] sm:$0xf] }
  0x4f   : > { %6526 = vmatprep.subr.bf16.mxu0 %v7434_v6  ;;  %v400_v40 = vor.u32 %v399_v18, %v395_v16  ;;  %6455 = vmatmul.mubr.bf16.gmra.mrb[8].mxu0 %v5536_v38  ;;  %v396_v53 = vsel %vm7245_vm2, %v391_v39, %v395_v16  ;;  %v2304_v58 = vrot.slane %v2302_v49, 5  ;;  %v421_v5 = vshrl.u32 %v187_v43, 16  ;;  %v228_v43 = vld [vmem:[%s7213_s10 + $0x68] sm:$0x1] }
  0x50   : > { %6263 = vmatmul.mubr.bf16.gmra.mrb[8].mxu1 %v5296_v12  ;;  %v2289_v56 = vor.u32 %v2288_v31, %v2285_v42  ;;  %v413_v1 = vrot.slane %v411_v48, 5  ;;  %v2300_v7 = vrot.slane %v2299_v57, 4  ;;  %v419_v9 = vrot.slane %v417_v59, 5 }
  0x51   : > { %v401_v54 = vrot.slane %v400_v40, 4  ;;  %v423_v11 = vrot.slane %v421_v5, 4  ;;  %v427_v12 = vshll.u32 %v227_v50, 16  ;;  %v2307_v13 = vshrl.u32 %v5488_v52, 16  ;;  %v5555_v50 = vld [vmem:[%s7213_s10 + $0xc] sm:$0xe] }
  0x52   : > { %v2290_v3 = vrot.slane %v2289_v56, 4  ;;  %v414_v10 = vor.u32 %v413_v1, %v410_v63  ;;  %v2305_v16 = vsel %vm7245_vm2, %v2300_v7, %v2304_v58  ;;  %v2310_v18 = vshll.u32 %v5488_v52, 16  ;;  %v7487_v5 = vld [vmem:[%s7213_s10 + $0x6c] sm:$0xf] }
  0x53   : > { %v406_v61 = vsel %vm7245_vm2, %v401_v54, %v405_v21  ;;  %v2316_v21 = vshll.u32 %v7456_v60, 16  ;;  %v424_v30 = vor.u32 %v423_v11, %v419_v9  ;;  %v429_v34 = vrot.slane %v427_v12, 5 }
  0x54   : > { %v5297_v2 = vcombine.low %v396_v53, %v406_v61  ;;  %v2295_v15 = vsel %vm7245_vm2, %v2290_v3, %v2294_v44  ;;  %v415_v29 = vrot.slane %v414_v10, 4  ;;  %v2309_v38 = vrot.slane %v2307_v13, 4 }
  0x55   : > { %v5537_v26 = vcombine.low %v2295_v15, %v2305_v16  ;;  %v2312_v39 = vrot.slane %v2310_v18, 5  ;;  %v2318_v40 = vrot.slane %v2316_v21, 5  ;;  %v2320_v42 = vshrl.u32 %v7456_v60, 16  ;;  %v7499_v21 = vld [vmem:[%s7213_s10 + $0x70] sm:$0xf] }
  0x56   : > { %6266 = vmatprep.mubr.bf16.mxu1 %v5297_v2  ;;  %v420_v31 = vsel %vm7245_vm2, %v415_v29, %v419_v9  ;;  %v425_v44 = vrot.slane %v424_v30, 4  ;;  %v2326_v47 = vshll.u32 %v7465_v17, 16  ;;  %v432_v49 = vshrl.u32 %v7469_v25, 16  ;;  %v7069_v9 = vld [vmem:[%s7213_s10 + $0xb4] sm:$0xff]  }
  0x57   : > { %6458 = vmatprep.mubr.bf16.mxu0 %v5537_v26  ;;  %v2313_v52 = vor.u32 %v2312_v39, %v2309_v38  ;;  %v2322_v53 = vrot.slane %v2320_v42, 4  ;;  %v435_v54 = vshll.u32 %v7469_v25, 16  ;;  %v441_v55 = vshll.u32 %v7472_v35, 16 }
  0x58   : > { %v430_v48 = vsel %vm7245_vm2, %v425_v44, %v429_v34  ;;  %v2328_v56 = vrot.slane %v2326_v47, 5  ;;  %v434_v57 = vrot.slane %v432_v49, 4  ;;  %v445_v58 = vshrl.u32 %v7472_v35, 16  ;;  %v7510_v47 = vld [vmem:[%s7213_s10 + $0x78] sm:$0xf] }
  0x59   : > { %v5298_v59 = vcombine.low %v420_v31, %v430_v48  ;;  %v2314_v61 = vrot.slane %v2313_v52, 4  ;;  %v2323_v63 = vor.u32 %v2322_v53, %v2318_v40  ;;  %v437_v1 = vrot.slane %v435_v54, 5  ;;  %v7521_v54 = vld [vmem:[%s7213_s10 + $0x7c] sm:$0xf] }
  0x5a   : > { %v443_v2 = vrot.slane %v441_v55, 5  ;;  %v447_v3 = vrot.slane %v445_v58, 4  ;;  %v451_v7 = vshll.u32 %v228_v43, 16  ;;  %v5571_v10 = vrot.slane %v5555_v50, 9  ;;  %v230_v58 = vld [vmem:[%s7213_s10 + $0x80] sm:$0x1] }
  0x5b   : > { %6267 = vmatmul.mubr.bf16.gmra.mrb[12].mxu1 %v5298_v59  ;;  %v2319_v11 = vsel %vm7245_vm2, %v2314_v61, %v2318_v40  ;;  %v2324_v12 = vrot.slane %v2323_v63, 4  ;;  %v438_v13 = vor.u32 %v437_v1, %v434_v57  ;;  %v2910_v15 = vrot.slane %v7226_v23, 5  ;;  %v229_v40 = vld [vmem:[%s7213_s10 + $0x74] sm:$0x1]  ;;  %v5556_v23 = vld [vmem:[%s7213_s10 + $0x18] sm:$0xe] }
  0x5c   : > { %v448_v16 = vor.u32 %v447_v3, %v443_v2  ;;  %v453_v18 = vrot.slane %v451_v7, 5  ;;  %v456_v26 = vshrl.u32 %v7487_v5, 16  ;;  %v459_v29 = vshll.u32 %v7487_v5, 16 }
  0x5d   : > { %v2329_v30 = vsel %vm7245_vm2, %v2324_v12, %v2328_v56  ;;  %v439_v34 = vrot.slane %v438_v13, 4  ;;  %v2911_v38 = vsel %vm7491_vm5, %v5571_v10, %v2910_v15  ;;  %v2912_v39 = vrot.slane %v2910_v15, 4  ;;  %v5557_v13 = vld [vmem:[%s7213_s10 + $0x24] sm:$0xe] }
  0x5e   : > { %v5538_v42 = vcombine.low %v2319_v11, %v2329_v30  ;;  %v449_v43 = vrot.slane %v448_v16, 4  ;;  %v458_v31 = vrot.slane %v456_v26, 4  ;;  %v461_v44 = vrot.slane %v459_v29, 5  ;;  %v7543_v16 = vld [vmem:[%s7213_s10 + $0x84] sm:$0xf]  ;;  %v6982_v29 = vld [vmem:[%s9016_s1 + $0x188] sm:$0xff]  }
  0x5f   : > { %v444_v49 = vsel %vm7245_vm2, %v439_v34, %v443_v2  ;;  %v2914_v50 = vsel %vm7491_vm5, %v2912_v39, %v2913_v41  ;;  %v465_v52 = vshll.u32 %v7499_v21, 16  ;;  %v469_v53 = vshrl.u32 %v7499_v21, 16 }
  0x60   : > { %6459 = vmatmul.mubr.bf16.gmra.mrb[12].mxu0 %v5538_v42  ;;  %v454_v55 = vsel %vm7245_vm2, %v449_v43, %v453_v18  ;;  %v5603_v48 = vcombine.low %v2911_v38, %v2914_v50  ;;  %v462_v56 = vor.u32 %v461_v44, %v458_v31  ;;  %v475_v57 = vshll.u32 %v229_v40, 16  ;;  %v7551_v40 = vld [vmem:[%s7213_s10 + $0x88] sm:$0xf]  ;;  %v231_v31 = vld [vmem:[%s7213_s10 + $0x8c] sm:$0x1] }
  0x61   : > { %v5299_v59 = vcombine.low %v444_v49, %v454_v55  ;;  %v467_v24 = vrot.slane %v465_v52, 5  ;;  %v471_v61 = vrot.slane %v469_v53, 4  ;;  %v5572_v63 = vrot.slane %v5556_v23, 9 }
  0x62   : > { %6494 = vmatprep.mubr.bf16.mxu0 %v5603_v48  ;;  %v463_v41 = vrot.slane %v462_v56, 4  ;;  %v477_v1 = vrot.slane %v475_v57, 5  ;;  %v2921_v2 = vsel %vm7491_vm5, %v7294_v36, %v2920_v32  ;;  %v480_v3 = vshrl.u32 %v7510_v47, 16 }
  0x63   : > { %6270 = vmatprep.mubr.bf16.mxu1 %v5299_v59  ;;  %v472_v7 = vor.u32 %v471_v61, %v467_v24  ;;  %v2918_v10 = vsel %vm7491_vm5, %v5572_v63, %v2917_v27  ;;  %v483_v11 = vshll.u32 %v7510_v47, 16  ;;  %v489_v12 = vshll.u32 %v7521_v54, 16 }
  0x64   : > { %v468_v8 = vsel %vm7245_vm2, %v463_v41, %v467_v24  ;;  %v5604_v15 = vcombine.low %v2918_v10, %v2921_v2  ;;  %v482_v32 = vrot.slane %v480_v3, 4  ;;  %v493_v36 = vshrl.u32 %v7521_v54, 16  ;;  %v7572_v2 = vld [vmem:[%s7213_s10 + $0x90] sm:$0xf]  ;;  %v7575_v3 = vld [vmem:[%s7213_s10 + $0x94] sm:$0xf] }
  0x65   : > { %v473_v62 = vrot.slane %v472_v7, 4  ;;  %v485_v18 = vrot.slane %v483_v11, 5  ;;  %v491_v26 = vrot.slane %v489_v12, 5  ;;  %v499_v27 = vshll.u32 %v230_v58, 16 }
  0x66   : > { %v495_v30 = vrot.slane %v493_v36, 4  ;;  %v5573_v34 = vrot.slane %v5557_v13, 9  ;;  %v2924_v38 = vrot.slane %v7298_v45, 5  ;;  %v2927_v39 = vrot.slane %v7304_v51, 5  ;;  %v5558_v45 = vld [vmem:[%s7213_s10 + $0x30] sm:$0xe] }
  0x67   : > { %v478_v23 = vsel %vm7245_vm2, %v473_v62, %v477_v1  ;;  %v486_v42 = vor.u32 %v485_v18, %v482_v32  ;;  %v501_v43 = vrot.slane %v499_v27, 5  ;;  %v504_v44 = vshrl.u32 %v7543_v16, 16  ;;  %v232_v62 = vld [vmem:[%s7213_s10 + $0x98] sm:$0x1] }
  0x68   : > { %v5300_v49 = vcombine.low %v468_v8, %v478_v23  ;;  %6495 = vmatmul.mubr.bf16.vlgmr.msra.gmra.mrb[0].mxu0 %v5604_v15  ;;  %v496_v50 = vor.u32 %v495_v30, %v491_v26  ;;  %v2925_v52 = vsel %vm7491_vm5, %v5573_v34, %v2924_v38  ;;  %v2926_v53 = vrot.slane %v2924_v38, 4  ;;  %v6986_v30 = vld [vmem:[%s9016_s1 + $0x198] sm:$0xff]  }
  0x69   : > { %6527 = vmatpush3.bf16.msra.mxu0 %v7434_v6  ;;  %v487_v51 = vrot.slane %v486_v42, 4  ;;  %v506_v55 = vrot.slane %v504_v44, 4  ;;  %v507_v48 = vshll.u32 %v7543_v16, 16  ;;  %v513_v56 = vshll.u32 %v7551_v40, 16  ;;  %v6984_v6 = vld [vmem:[%s9016_s1 + $0x190] sm:$0xff]  }
  0x6a   : > { %6271 = vmatmul.mubr.bf16.gmra.mrb[16].mxu1 %v5300_v49  ;;  %v497_v57 = vrot.slane %v496_v50, 4  ;;  %v2928_v58 = vsel %vm7491_vm5, %v2926_v53, %v2927_v39  ;;  %v517_v59 = vshrl.u32 %v7551_v40, 16  ;;  %v523_v24 = vshll.u32 %v231_v31, 16  ;;  %6528 = vmatprep.subr.bf16.mxu0 %v6982_v29  ;;  %v5559_v38 = vld [vmem:[%s7213_s10 + $0x3c] sm:$0xe] }
  0x6b   : > { %v492_v61 = vsel %vm7245_vm2, %v487_v51, %v491_v26  ;;  %v5605_v63 = vcombine.low %v2925_v52, %v2928_v58  ;;  %v509_v41 = vrot.slane %v507_v48, 5  ;;  %v515_v1 = vrot.slane %v513_v56, 5  ;;  %v7593_v31 = vld [vmem:[%s7213_s10 + $0x9c] sm:$0xf]  ;;  %v7602_v48 = vld [vmem:[%s7213_s10 + $0xa0] sm:$0xf] }
  0x6c   : > { %v502_v7 = vsel %vm7245_vm2, %v497_v57, %v501_v43  ;;  %v519_v10 = vrot.slane %v517_v59, 4  ;;  %v525_v11 = vrot.slane %v523_v24, 5  ;;  %v5574_v12 = vrot.slane %v5558_v45, 9  ;;  %v6990_v56 = vld [vmem:[%s9016_s1 + $0x1a0] sm:$0xff]  }
  0x6d   : > { %v5301_v13 = vcombine.low %v492_v61, %v502_v7  ;;  %6498 = vmatprep.mubr.bf16.mxu0 %v5605_v63  ;;  %v510_v8 = vor.u32 %v509_v41, %v506_v55  ;;  %v2931_v15 = vrot.slane %v7329_v33, 5  ;;  %v2934_v32 = vrot.slane %v7340_v46, 5  ;;  %6529 = vmatpush3.bf16.msra.mxu0 %v6982_v29  ;;  %v233_v61 = vld [vmem:[%s7213_s10 + $0xa4] sm:$0x1] }
  0x6e   : > { %v520_v36 = vor.u32 %v519_v10, %v515_v1  ;;  %v528_v18 = vshrl.u32 %v7572_v2, 16  ;;  %v531_v26 = vshll.u32 %v7572_v2, 16  ;;  %v537_v27 = vshll.u32 %v7575_v3, 16  ;;  %6530 = vmatprep.subr.bf16.mxu0 %v6984_v6 }
  0x6f   : > { %6274 = vmatprep.mubr.bf16.mxu1 %v5301_v13  ;;  %v511_v34 = vrot.slane %v510_v8, 4  ;;  %v2932_v33 = vsel %vm7491_vm5, %v5574_v12, %v2931_v15  ;;  %v2933_v46 = vrot.slane %v2931_v15, 4  ;;  %v541_v29 = vshrl.u32 %v7575_v3, 16  ;;  %v5560_v15 = vld [vmem:[%s7213_s10 + $0x48] sm:$0xe] }
  0x70   : > { %v521_v39 = vrot.slane %v520_v36, 4  ;;  %v530_v23 = vrot.slane %v528_v18, 4  ;;  %v533_v42 = vrot.slane %v531_v26, 5  ;;  %v539_v43 = vrot.slane %v537_v27, 5  ;;  %v7627_v27 = vld [vmem:[%s7213_s10 + $0xa8] sm:$0xf] }
  0x71   : > { %v516_v44 = vsel %vm7245_vm2, %v511_v34, %v515_v1  ;;  %v2935_v49 = vsel %vm7491_vm5, %v2933_v46, %v2934_v32  ;;  %v543_v50 = vrot.slane %v541_v29, 4  ;;  %v547_v52 = vshll.u32 %v232_v62, 16  ;;  %6531 = vmatpush3.bf16.msra.mxu0 %v6984_v6  ;;  %v6994_v32 = vld [vmem:[%s9016_s1 + $0x1a8] sm:$0xff]  }
  0x72   : > { %v526_v53 = vsel %vm7245_vm2, %v521_v39, %v525_v11  ;;  %v5606_v45 = vcombine.low %v2932_v33, %v2935_v49  ;;  %v534_v51 = vor.u32 %v533_v42, %v530_v23  ;;  %v5575_v55 = vrot.slane %v5559_v38, 9  ;;  %6532 = vmatprep.subr.bf16.mxu0 %v6986_v30  ;;  %v7630_v29 = vld [vmem:[%s7213_s10 + $0xac] sm:$0xf] }
  0x73   : > { %v5302_v57 = vcombine.low %v516_v44, %v526_v53  ;;  %v544_v58 = vor.u32 %v543_v50, %v539_v43  ;;  %v549_v59 = vrot.slane %v547_v52, 5  ;;  %v2938_v24 = vrot.slane %v7363_v19, 5  ;;  %v5561_v53 = vld [vmem:[%s7213_s10 + $0x54] sm:$0xe] }
  0x74   : > { %6499 = vmatmul.mubr.bf16.gmra.mrb[4].mxu0 %v5606_v45  ;;  %v535_v6 = vrot.slane %v534_v51, 4  ;;  %v2941_v63 = vrot.slane %v7371_v28, 5  ;;  %v552_v41 = vshrl.u32 %v7593_v31, 16  ;;  %v555_v1 = vshll.u32 %v7593_v31, 16  ;;  %v6998_v45 = vld [vmem:[%s9016_s1 + $0x1b0] sm:$0xff]  }
  0x75   : > { %6275 = vmatmul.mubr.bf16.gmra.mrb[20].mxu1 %v5302_v57  ;;  %v545_v7 = vrot.slane %v544_v58, 4  ;;  %v2939_v10 = vsel %vm7491_vm5, %v5575_v55, %v2938_v24  ;;  %v2940_v11 = vrot.slane %v2938_v24, 4  ;;  %v561_v12 = vshll.u32 %v7602_v48, 16  ;;  %6533 = vmatpush3.bf16.msra.mxu0 %v6986_v30 }
  0x76   : > { %v540_v19 = vsel %vm7245_vm2, %v535_v6, %v539_v43  ;;  %v554_v13 = vrot.slane %v552_v41, 4  ;;  %v557_v28 = vrot.slane %v555_v1, 5  ;;  %v565_v8 = vshrl.u32 %v7602_v48, 16  ;;  %6534 = vmatprep.subr.bf16.mxu0 %v6990_v56  ;;  %v234_v43 = vld [vmem:[%s7213_s10 + $0xb0] sm:$0x1] }
  0x77   : > { %v550_v36 = vsel %vm7245_vm2, %v545_v7, %v549_v59  ;;  %v2942_v62 = vsel %vm7491_vm5, %v2940_v11, %v2941_v63  ;;  %v563_v18 = vrot.slane %v561_v12, 5  ;;  %v571_v26 = vshll.u32 %v233_v61, 16  ;;  %v7650_v41 = vld [vmem:[%s7213_s10 + $0xb4] sm:$0xf]  ;;  %v7655_v12 = vld [vmem:[%s7213_s10 + $0xb8] sm:$0xf] }
  0x78   : > { %v5303_v30 = vcombine.low %v540_v19, %v550_v36  ;;  %v5607_v34 = vcombine.low %v2939_v10, %v2942_v62  ;;  %v558_v33 = vor.u32 %v557_v28, %v554_v13  ;;  %v567_v46 = vrot.slane %v565_v8, 4  ;;  %v235_v19 = vld [vmem:[%s7213_s10 + $0xbc] sm:$0x1] }
  0x79   : > { %v573_v38 = vrot.slane %v571_v26, 5  ;;  %v5576_v39 = vrot.slane %v5560_v15, 9  ;;  %v2945_v23 = vrot.slane %v7398_v14, 5  ;;  %v2948_v42 = vrot.slane %v7404_v22, 5  ;;  %6535 = vmatpush3.bf16.msra.mxu0 %v6990_v56  ;;  %v7002_v13 = vld [vmem:[%s9016_s1 + $0x1b8] sm:$0xff]  }
  0x7a   : > { %6278 = vmatprep.mubr.bf16.mxu1 %v5303_v30  ;;  %6502 = vmatprep.mubr.bf16.mxu0 %v5607_v34  ;;  %v559_v44 = vrot.slane %v558_v33, 4  ;;  %v568_v49 = vor.u32 %v567_v46, %v563_v18  ;;  %v576_v50 = vshrl.u32 %v7627_v27, 16  ;;  %v579_v52 = vshll.u32 %v7627_v27, 16  ;;  %v5562_v30 = vld [vmem:[%s7213_s10 + $0x60] sm:$0xe] }
  0x7b   : > { %v2946_v14 = vsel %vm7491_vm5, %v5576_v39, %v2945_v23  ;;  %v2947_v22 = vrot.slane %v2945_v23, 4  ;;  %v585_v51 = vshll.u32 %v7630_v29, 16  ;;  %v589_v55 = vshrl.u32 %v7630_v29, 16  ;;  %6536 = vmatprep.subr.bf16.mxu0 %v6994_v32  ;;  %v5492_v39 = vld [vmem:[%s7213_s10 + $0x70] sm:$0xf] }
  0x7c   : > { %v564_v56 = vsel %vm7245_vm2, %v559_v44, %v563_v18  ;;  %v569_v57 = vrot.slane %v568_v49, 4  ;;  %v578_v58 = vrot.slane %v576_v50, 4  ;;  %v581_v59 = vrot.slane %v579_v52, 5  ;;  %v7677_v44 = vld [vmem:[%s9016_s1 + $0x1c0] sm:$0xff]  }
  0x7d   : > { %v2949_v24 = vsel %vm7491_vm5, %v2947_v22, %v2948_v42  ;;  %v587_v61 = vrot.slane %v585_v51, 5  ;;  %v591_v6 = vrot.slane %v589_v55, 4  ;;  %v595_v63 = vshll.u32 %v234_v43, 16  ;;  %6537 = vmatpush3.bf16.msra.mxu0 %v6994_v32  ;;  %v5563_v43 = vld [vmem:[%s7213_s10 + $0x6c] sm:$0xe] }
  0x7e   : > { %v574_v1 = vsel %vm7245_vm2, %v569_v57, %v573_v38  ;;  %v5608_v7 = vcombine.low %v2946_v14, %v2949_v24  ;;  %v582_v10 = vor.u32 %v581_v59, %v578_v58  ;;  %v5577_v11 = vrot.slane %v5561_v53, 9  ;;  %6538 = vmatprep.subr.bf16.mxu0 %v6998_v45  ;;  %v5493_v55 = vld [vmem:[%s7213_s10 + $0x74] sm:$0x1]  ;;  %v5564_v24 = vld [vmem:[%s7213_s10 + $0x78] sm:$0xe] }
  0x7f   : > { %v5304_v28 = vcombine.low %v564_v56, %v574_v1  ;;  %v592_v8 = vor.u32 %v591_v6, %v587_v61  ;;  %v597_v15 = vrot.slane %v595_v63, 5  ;;  %v2952_v32 = vrot.slane %v7429_v0, 5 }
  0x80   : > { %6503 = vmatmul.mubr.bf16.gmra.mrb[8].mxu0 %v5608_v7  ;;  %v583_v36 = vrot.slane %v582_v10, 4  ;;  %v2955_v62 = vrot.slane %v7441_v20, 5  ;;  %v600_v18 = vshrl.u32 %v7650_v41, 16  ;;  %v603_v26 = vshll.u32 %v7650_v41, 16 }
  0x81   : > { %6279 = vmatmul.mubr.bf16.gmra.mrb[24].mxu1 %v5304_v28  ;;  %v593_v34 = vrot.slane %v592_v8, 4  ;;  %v2953_v33 = vsel %vm7491_vm5, %v5577_v11, %v2952_v32  ;;  %v2954_v46 = vrot.slane %v2952_v32, 4  ;;  %v609_v38 = vshll.u32 %v7655_v12, 16  ;;  %6539 = vmatpush3.bf16.msra.mxu0 %v6998_v45  ;;  %v7690_v11 = vld [vmem:[%s7213_s10 + $0x7c] sm:$0xf] }
  0x82   : > { %v588_v0 = vsel %vm7245_vm2, %v583_v36, %v587_v61  ;;  %v602_v20 = vrot.slane %v600_v18, 4  ;;  %v605_v23 = vrot.slane %v603_v26, 5  ;;  %v613_v42 = vshrl.u32 %v7655_v12, 16  ;;  %6540 = vmatprep.subr.bf16.mxu0 %v7002_v13  ;;  %v7071_v36 = vld [vmem:[%s7213_s10] sm:$0xf] }
  0x83   : > { %v598_v49 = vsel %vm7245_vm2, %v593_v34, %v597_v15  ;;  %v2956_v50 = vsel %vm7491_vm5, %v2954_v46, %v2955_v62  ;;  %v611_v52 = vrot.slane %v609_v38, 5  ;;  %v619_v53 = vshll.u32 %v235_v19, 16  ;;  %v5498_v15 = vld [vmem:[%s7213_s10 + $0x88] sm:$0xf]  ;;  %v7705_v62 = vld [vmem:[%s7213_s10 + $0x4] sm:$0xf] }
  0x84   : > { %v5305_v45 = vcombine.low %v588_v0, %v598_v49  ;;  %v5609_v14 = vcombine.low %v2953_v33, %v2956_v50  ;;  %v606_v22 = vor.u32 %v605_v23, %v602_v20  ;;  %v615_v51 = vrot.slane %v613_v42, 4  ;;  %v5499_v26 = vld [vmem:[%s7213_s10 + $0x8c] sm:$0x1]  ;;  %v5502_v23 = vld [vmem:[%s7213_s10 + $0x98] sm:$0x1] }
  0x85   : > { %v621_v56 = vrot.slane %v619_v53, 5  ;;  %v5578_v57 = vrot.slane %v5562_v30, 9  ;;  %v2959_v58 = vrot.slane %v7456_v60, 5  ;;  %v2962_v59 = vrot.slane %v7465_v17, 5  ;;  %6541 = vmatpush3.bf16.msra.mxu0 %v7002_v13  ;;  %v7693_v17 = vld [vmem:[%s7213_s10 + $0x80] sm:$0x1] }
  0x86   : > { %6282 = vmatprep.mubr.bf16.mxu1 %v5305_v45  ;;  %6506 = vmatprep.mubr.bf16.mxu0 %v5609_v14  ;;  %v607_v61 = vrot.slane %v606_v22, 4  ;;  %v616_v6 = vor.u32 %v615_v51, %v611_v52  ;;  %v5579_v63 = vrot.slane %v5563_v43, 9  ;;  %v2966_v1 = vrot.slane %v5492_v39, 5  ;;  %v5565_v30 = vld [vmem:[%s7213_s10 + $0x84] sm:$0xe] }
  0x87   : > { %v2960_v7 = vsel %vm7491_vm5, %v5578_v57, %v2959_v58  ;;  %v2961_v10 = vrot.slane %v2959_v58, 4  ;;  %v2969_v60 = vrot.slane %v5493_v55, 5  ;;  %6574 = vmatprep.subr.bf16.mxu0 %v7677_v44  ;;  %v5315_v18 = vcombine.low %v7071_v36, %v7705_v62  ;;  %v5501_v39 = vld [vmem:[%s7213_s10 + $0x94] sm:$0xf]  ;;  %v5566_v42 = vld [vmem:[%s7213_s10 + $0x90] sm:$0xe] }
  0x88   : > { %v612_v19 = vsel %vm7245_vm2, %v607_v61, %v611_v52  ;;  %v617_v13 = vrot.slane %v616_v6, 4  ;;  %v2967_v28 = vsel %vm7491_vm5, %v5579_v63, %v2966_v1  ;;  %v2968_v8 = vrot.slane %v2966_v1, 4  ;;  %v5567_v50 = vld [vmem:[%s7213_s10 + $0x9c] sm:$0xe]  ;;  %v5504_v14 = vld [vmem:[%s7213_s10 + $0xa0] sm:$0xf] }
  0x89   : > { %v2963_v32 = vsel %vm7491_vm5, %v2961_v10, %v2962_v59  ;;  %v5580_v38 = vrot.slane %v5564_v24, 9  ;;  %v2973_v43 = vrot.slane %v7690_v11, 5  ;;  %v2976_v49 = vrot.slane %v7693_v17, 5  ;;  %v5505_v22 = vld [vmem:[%s7213_s10 + $0xa4] sm:$0x1] }
  0x8a   : > { %v622_v34 = vsel %vm7245_vm2, %v617_v13, %v621_v56  ;;  %v5610_v33 = vcombine.low %v2960_v7, %v2963_v32  ;;  %v2970_v46 = vsel %vm7491_vm5, %v2968_v8, %v2969_v60  ;;  %v5581_v52 = vrot.slane %v5565_v30, 9  ;;  %v5507_v59 = vld [vmem:[%s7213_s10 + $0xac] sm:$0xf]  ;;  %v7729_v61 = vld [vmem:[%s7213_s10 + $0x10] sm:$0xf] }
  0x8b   : > { %v5306_v0 = vcombine.low %v612_v19, %v622_v34  ;;  %v5611_v20 = vcombine.low %v2967_v28, %v2970_v46  ;;  %v2980_v53 = vrot.slane %v5498_v15, 5  ;;  %v2983_v45 = vrot.slane %v5499_v26, 5  ;;  %v7073_v24 = vld [vmem:[%s7213_s10 + $0xc] sm:$0xf]  ;;  %v7075_v8 = vld [vmem:[%s7213_s10 + $0x18] sm:$0xf] }
  0x8c   : > { %6507 = vmatmul.mubr.bf16.gmra.mrb[12].mxu0 %v5610_v33  ;;  %v2974_v51 = vsel %vm7491_vm5, %v5580_v38, %v2973_v43  ;;  %v2975_v55 = vrot.slane %v2973_v43, 4  ;;  %v2987_v58 = vrot.slane %v5501_v39, 5  ;;  %v5316_v6 = vcombine.low %v7073_v24, %v7729_v61  ;;  %v6993_v19 = vld [vmem:[%s9016_s1 + $0x88] sm:$0xff]   ;;  %v7741_v15 = vld [vmem:[%s7213_s10 + $0x1c] sm:$0xf] }
  0x8d   : > { %6283 = vmatmul.mubr.bf16.gmra.mrb[28].mxu1 %v5306_v0  ;;  %6510 = vmatprep.mubr.bf16.mxu0 %v5611_v20  ;;  %v2981_v56 = vsel %vm7491_vm5, %v5581_v52, %v2980_v53  ;;  %v2982_v57 = vrot.slane %v2980_v53, 4  ;;  %v5582_v1 = vrot.slane %v5566_v42, 9  ;;  %v2990_v7 = vrot.slane %v5502_v23, 5  ;;  %v5508_v30 = vld [vmem:[%s7213_s10 + $0xb0] sm:$0x1] }
  0x8e   : > { %6302 = vmatprep.mubr.bf16.mxu1 %v5315_v18  ;;  %v2977_v63 = vsel %vm7491_vm5, %v2975_v55, %v2976_v49  ;;  %v2989_v13 = vrot.slane %v2987_v58, 4  ;;  %v5583_v28 = vrot.slane %v5567_v50, 9  ;;  %v5317_v32 = vcombine.low %v7075_v8, %v7741_v15  ;;  %v5568_v34 = vld [vmem:[%s7213_s10 + $0xa8] sm:$0xe]  ;;  %v5510_v33 = vld [vmem:[%s7213_s10 + $0xb8] sm:$0xf] }
  0x8f   : > { %v5612_v10 = vcombine.low %v2974_v51, %v2977_v63  ;;  %v2984_v60 = vsel %vm7491_vm5, %v2982_v57, %v2983_v45  ;;  %v2994_v18 = vrot.slane %v5504_v14, 5  ;;  %v2997_v26 = vrot.slane %v5505_v22, 5  ;;  %v5511_v20 = vld [vmem:[%s7213_s10 + $0xbc] sm:$0x1]  ;;  %v5569_v23 = vld [vmem:[%s7213_s10 + $0xb4] sm:$0xe] }
  0x90   : > { %v5613_v36 = vcombine.low %v2981_v56, %v2984_v60  ;;  %v3001_v38 = vrot.slane %v5507_v59, 5  ;;  %v2988_v39 = vsel %vm7491_vm5, %v5582_v1, %v2987_v58  ;;  %v2991_v0 = vsel %vm7491_vm5, %v2989_v13, %v2990_v7  ;;  %v6997_v50 = vld [vmem:[%s9016_s1 + $0x90] sm:$0xff]   ;;  %v5513_v53 = vld [vmem:[%s7213_s10 + $0xc4] sm:$0xf]  ;;  %v7764_v51 = vld [vmem:[%s7213_s10 + $0x28] sm:$0xf] }
  0x91   : > { %v2996_v46 = vrot.slane %v2994_v18, 4  ;;  %v2995_v42 = vsel %vm7491_vm5, %v5583_v28, %v2994_v18  ;;  %v3008_v49 = vrot.slane %v5510_v33, 5  ;;  %v5584_v52 = vrot.slane %v5568_v34, 9  ;;  %v7077_v22 = vld [vmem:[%s7213_s10 + $0x24] sm:$0xf]  ;;  %v7001_v1 = vld [vmem:[%s9016_s1 + $0x98] sm:$0xff]  }
  0x92   : > { %v5614_v45 = vcombine.low %v2988_v39, %v2991_v0  ;;  %v3003_v14 = vrot.slane %v3001_v38, 4  ;;  %v5318_v55 = vcombine.low %v7077_v22, %v7764_v51  ;;  %v7079_v57 = vld [vmem:[%s7213_s10 + $0x30] sm:$0xf]  ;;  %v7769_v58 = vld [vmem:[%s7213_s10 + $0x34] sm:$0xf]  ;;  %v5585_v24 = vrot.slane %v5569_v23, 9 }
  0x93   : > { %v2998_v43 = vsel %vm7491_vm5, %v2996_v46, %v2997_v26  ;;  %v5319_v59 = vcombine.low %v7079_v57, %v7769_v58  ;;  %v3011_v63 = vrot.slane %v5511_v20, 5  ;;  %v5570_v7 = vld [vmem:[%s7213_s10 + $0xc0] sm:$0xe]  ;;  %v3002_v60 = vsel %vm7491_vm5, %v5584_v52, %v3001_v38  ;;  %v5514_v8 = vld [vmem:[%s7213_s10 + $0xc8] sm:$0x1]  ;;  %v7004_v22 = vld [vmem:[%s7213_s10 + $0x18] sm:$0xff]  }
  0x94   : > { %6511 = vmatmul.mubr.bf16.gmra.mrb[16].mxu0 %v5612_v10  ;;  %v5615_v56 = vcombine.low %v2995_v42, %v2998_v43  ;;  %v3015_v10 = vrot.slane %v5513_v53, 5  ;;  %v3009_v13 = vsel %vm7491_vm5, %v5585_v24, %v3008_v49  ;;  %v5586_v18 = vrot.slane %v5570_v7, 9  ;;  %v7081_v26 = vld [vmem:[%s7213_s10 + $0x3c] sm:$0xf]  ;;  %v7083_v39 = vld [vmem:[%s7213_s10 + $0x48] sm:$0xf] }
  0x95   : > { %6303 = vmatmul.mubr.bf16.vlgmr.msra.gmra.mrb[0].mxu1 %v5316_v6  ;;  %6514 = vmatprep.mubr.bf16.mxu0 %v5613_v36  ;;  %v3010_v6 = vrot.slane %v3008_v49, 4  ;;  %v3018_v38 = vrot.slane %v5514_v8, 5  ;;  %v7795_v0 = vld [vmem:[%s7213_s10 + $0x4c] sm:$0xf]  ;;  %v7018_v49 = vld [vmem:[%s9016_s1 + $0xb0] sm:$0xff]   ;;  %v2368_v52 = vshrl.u32 %v7690_v11, 16 }
  0x96   : > { %6335 = vmatpush3.bf16.msra.mxu1 %v7415_v4  ;;  %6306 = vmatprep.mubr.bf16.mxu1 %v5317_v32  ;;  %v3004_v4 = vrot.slane %v5508_v30, 5  ;;  %v7006_v32 = vld [vmem:[%s9016_s1 + $0xa0] sm:$0xff]   ;;  %v3017_v46 = vrot.slane %v3015_v10, 4  ;;  %v5321_v20 = vcombine.low %v7083_v39, %v7795_v0  ;;  %v7012_v23 = vld [vmem:[%s9016_s1 + $0xa8] sm:$0xff]   ;;  %v3016_v42 = vsel %vm7491_vm5, %v5586_v18, %v3015_v10  ;;  %v7010_v18 = vld [vmem:[%s7213_s10 + $0x30] sm:$0xff]  }
  0x97   : > { %6336 = vmatprep.subr.bf16.mxu1 %v6993_v19  ;;  %v3012_v28 = vsel %vm7491_vm5, %v3010_v6, %v3011_v63  ;;  %v7790_v30 = vld [vmem:[%s7213_s10 + $0x40] sm:$0xf]  ;;  %v7823_v57 = vrot.slane %v2368_v52, 4  ;;  %v7007_v6 = vld [vmem:[%s7213_s10 + $0x24] sm:$0xff]   ;;  %v1278_v7 = vrot.slane %v7729_v61, 5  ;;  %v2374_v8 = vshll.u32 %v7693_v17, 16 }
  0x98   : > { %v5320_v34 = vcombine.low %v7081_v26, %v7790_v30  ;;  %v5617_v33 = vcombine.low %v3009_v13, %v3012_v28  ;;  %v3019_v43 = vsel %vm7491_vm5, %v3017_v46, %v3018_v38  ;;  %v1218_v63 = vld [vmem:[%s7213_s10] sm:$0xe]  ;;  %v1219_v10 = vld [vmem:[%s7213_s10 + $0xc] sm:$0xe]  ;;  %v1285_v13 = vrot.slane %v7741_v15, 5 }
  0x99   : > { %v5618_v53 = vcombine.low %v3016_v42, %v3019_v43  ;;  %v1221_v61 = vld [vmem:[%s7213_s10 + $0x24] sm:$0xe]  ;;  %v5326_v15 = vcombine.low %v7543_v16, %v7551_v40  ;;  %v5327_v26 = vcombine.low %v7572_v2, %v7575_v3  ;;  %v5339_v17 = vrot.slane %v1218_v63, 9  ;;  %v7089_v38 = vld [vmem:[%s7213_s10 + $0x20] sm:$0x1]  ;;  %v7019_v2 = vld [vmem:[%s7213_s10 + $0x54] sm:$0xff]  }
  0x9a   : > { %6337 = vmatpush3.bf16.msra.mxu1 %v6993_v19  ;;  %v3005_v19 = vsel %vm7491_vm5, %v3003_v14, %v3004_v4  ;;  %v7812_v14 = vld [vmem:[%s7213_s10 + $0x58] sm:$0xf]  ;;  %v1287_v46 = vrot.slane %v1285_v13, 4  ;;  %v1288_v39 = vrot.slane %v7089_v38, 5  ;;  %v7090_v43 = vld [vmem:[%s7213_s10 + $0x2c] sm:$0x1] }
  0x9b   : > { %6338 = vmatprep.subr.bf16.mxu1 %v6997_v50  ;;  %v5616_v36 = vcombine.low %v3002_v60, %v3005_v19  ;;  %v7838_v60 = vld [vmem:[%s9016_s1 + $0xc0] sm:$0xff]   ;;  %v1220_v19 = vld [vmem:[%s7213_s10 + $0x18] sm:$0xe]  ;;  %v7093_v38 = vld [vmem:[%s7213_s10 + $0x50] sm:$0x1]  ;;  %v1320_v16 = vrot.slane %v7812_v14, 5 }
  0x9c   : > { %6515 = vmatmul.mubr.bf16.gmra.mrb[20].mxu0 %v5614_v45  ;;  %v7085_v45 = vld [vmem:[%s7213_s10 + $0x54] sm:$0xf]  ;;  %v7961_v40 = vld [vmem:[%s7213_s10 + $0x64] sm:$0xf] }
  0x9d   : > { %6307 = vmatmul.mubr.bf16.gmra.mrb[4].mxu1 %v5318_v55  ;;  %6518 = vmatprep.mubr.bf16.mxu0 %v5615_v56  ;;  %v5322_v4 = vcombine.low %v7085_v45, %v7812_v14  ;;  %v5323_v55 = vcombine.low %v7469_v25, %v7472_v35  ;;  %v7024_v56 = vld [vmem:[%s9016_s1 + $0xb8] sm:$0xff]   ;;  %v7088_v25 = vld [vmem:[%s7213_s10 + $0x14] sm:$0x1]  ;;  %v7022_v3 = vld [vmem:[%s7213_s10 + $0x60] sm:$0xff]  }
  0x9e   : > { %6310 = vmatprep.mubr.bf16.mxu1 %v5319_v59  ;;  %6339 = vmatpush3.bf16.msra.mxu1 %v6997_v50  ;;  %v2364_v50 = vshll.u32 %v7690_v11, 16  ;;  %v7826_v59 = vld [vmem:[%s7213_s10 + $0x8] sm:$0x1]  ;;  %v1281_v35 = vrot.slane %v7088_v25, 5 }
  0x9f   : > { %6340 = vmatprep.subr.bf16.mxu1 %v7001_v1  ;;  %v1274_v24 = vrot.slane %v7826_v59, 5 }
  0xa0   : > { %v7821_v11 = vrot.slane %v2364_v50, 5 }
  0xa2   : > { %6341 = vmatpush3.bf16.msra.mxu1 %v7001_v1  ;;  %v1271_v1 = vrot.slane %v7705_v62, 5  ;;  %v5324_v62 = vcombine.low %v7487_v5, %v7499_v21  ;;  %v5340_v21 = vrot.slane %v1219_v10, 9  ;;  %v5699_v10 = vld [vmem:[%s7213_s10 + $0x18] sm:$0xf] }
  0xa3   : > { %6342 = vmatprep.subr.bf16.mxu1 %v7006_v32 }
  0xa4   : > { %6519 = vmatmul.mubr.bf16.gmra.mrb[24].mxu0 %v5616_v36  ;;  %v5325_v36 = vcombine.low %v7510_v47, %v7521_v54  ;;  %v1273_v5 = vrot.slane %v1271_v1, 4  ;;  %v7014_v47 = vld [vmem:[%s9016_s1 + $0x1c8] sm:$0xff]   ;;  %v5341_v54 = vrot.slane %v1220_v19, 9  ;;  %v7881_v59 = vsel %vm7491_vm5, %v5339_v17, %v1271_v1  ;;  %v5700_v19 = vld [vmem:[%s7213_s10 + $0x1c] sm:$0xf] }
  0xa5   : > { %6311 = vmatmul.mubr.bf16.gmra.mrb[8].mxu1 %v5320_v34  ;;  %6522 = vmatprep.mubr.bf16.mxu0 %v5617_v33  ;;  %v1299_v34 = vrot.slane %v7769_v58, 5  ;;  %v1280_v33 = vrot.slane %v1278_v7, 4  ;;  %v5342_v58 = vrot.slane %v1221_v61, 9  ;;  %v1313_v1 = vrot.slane %v7795_v0, 5  ;;  %v7016_v0 = vld [vmem:[%s7213_s10 + $0x48] sm:$0xff]  }
  0xa6   : > { %6314 = vmatprep.mubr.bf16.mxu1 %v5321_v20  ;;  %6343 = vmatpush3.bf16.msra.mxu1 %v7006_v32  ;;  %v1292_v32 = vrot.slane %v7764_v51, 5  ;;  %v1222_v51 = vld [vmem:[%s7213_s10 + $0x30] sm:$0xe]  ;;  %v5328_v20 = vcombine.low %v7593_v31, %v7602_v48  ;;  %v7889_v25 = vsel %vm7491_vm5, %v1273_v5, %v1274_v24  ;;  %v7897_v63 = vsel %vm7491_vm5, %v5341_v54, %v1285_v13  ;;  %v1224_v13 = vld [vmem:[%s7213_s10 + $0x48] sm:$0xe] }
  0xa7   : > { %6344 = vmatprep.subr.bf16.mxu1 %v7012_v23  ;;  %v5343_v50 = vrot.slane %v1222_v51, 9  ;;  %v1301_v52 = vrot.slane %v1299_v34, 4  ;;  %v3778_v5 = vshrl.u32 %v5699_v10, 16  ;;  %v3791_v51 = vshrl.u32 %v5700_v19, 16  ;;  %v7025_v48 = vld [vmem:[%s7213_s10 + $0x6c] sm:$0xff]  }
  0xa8   : > { %v1294_v42 = vrot.slane %v1292_v32, 4  ;;  %v7909_v24 = vsel %vm7491_vm5, %v5342_v58, %v1292_v32  ;;  %v7092_v32 = vld [vmem:[%s7213_s10 + $0x44] sm:$0x1]  ;;  %v5345_v54 = vrot.slane %v1224_v13, 9  ;;  %v5703_v13 = vld [vmem:[%s7213_s10 + $0x28] sm:$0xf] }
  0xa9   : > { %v7919_v61 = vsel %vm7491_vm5, %v5343_v50, %v1299_v34  ;;  %v1309_v17 = vrot.slane %v7092_v32, 5  ;;  %v5701_v50 = vld [vmem:[%s7213_s10 + $0x20] sm:$0x1]  ;;  %v1226_v32 = vld [vmem:[%s7213_s10 + $0x60] sm:$0xe] }
  0xaa   : > { %6345 = vmatpush3.bf16.msra.mxu1 %v7012_v23  ;;  %v5329_v23 = vcombine.low %v7627_v27, %v7630_v29 }
  0xab   : > { %6346 = vmatprep.subr.bf16.mxu1 %v7018_v49 }
  0xac   : > { %6523 = vmatmul.mubr.bf16.gmra.mrb[28].mxu0 %v5618_v53  ;;  %v7091_v53 = vld [vmem:[%s7213_s10 + $0x38] sm:$0x1] }
  0xad   : > { %6315 = vmatmul.mubr.bf16.gmra.mrb[12].mxu1 %v5322_v4  ;;  %6542 = vmatprep.mubr.bf16.mxu0 %v7004_v22  ;;  %v1302_v45 = vrot.slane %v7091_v53, 5  ;;  %v1223_v4 = vld [vmem:[%s7213_s10 + $0x3c] sm:$0xe]  ;;  %v1306_v22 = vrot.slane %v7790_v30, 5  ;;  %v7885_v30 = vsel %vm7491_vm5, %v5340_v21, %v1278_v7  ;;  %v3781_v21 = vshll.u32 %v5699_v10, 16  ;;  %v7030_v53 = vld [vmem:[%s9016_s1 + $0x1e0] sm:$0xff]  }
  0xae   : > { %6318 = vmatprep.mubr.bf16.mxu1 %v5323_v55  ;;  %6347 = vmatpush3.bf16.msra.mxu1 %v7018_v49  ;;  %v1295_v49 = vrot.slane %v7090_v43, 5  ;;  %v7872_v55 = vrot.slane %v2374_v8, 5  ;;  %v7013_v7 = vld [vmem:[%s7213_s10 + $0x3c] sm:$0xff]   ;;  %v7905_v8 = vsel %vm7491_vm5, %v1287_v46, %v1288_v39  ;;  %v1315_v46 = vrot.slane %v1313_v1, 4  ;;  %v5705_v43 = vld [vmem:[%s7213_s10 + $0x30] sm:$0xf] }
  0xaf   : > { %6348 = vmatprep.subr.bf16.mxu1 %v7024_v56  ;;  %v1316_v39 = vrot.slane %v7093_v38, 5  ;;  %v3780_v10 = vrot.slane %v3778_v5, 4 }
  0xb0   : > { %9037 = vst [vmem:[#allocation2_spill] sm:$0xff] %v7872_v55 }
  0xb2   : > { %6349 = vmatpush3.bf16.msra.mxu1 %v7024_v56  ;;  %v7020_v56 = vld [vmem:[%s9016_s1 + $0x1d0] sm:$0xff]  }
  0xb3   : > { %6382 = vmatprep.subr.bf16.mxu1 %v7838_v60 }
  0xb4   : > { %6543 = vmatmul.mubr.bf16.vlgmr.msra.gmra.mrb[0].mxu0 %v7007_v6  ;;  %v7893_v6 = vsel %vm7491_vm5, %v1280_v33, %v1281_v35  ;;  %v7913_v35 = vsel %vm7491_vm5, %v1294_v42, %v1295_v49  ;;  %v3787_v33 = vshll.u32 %v5700_v19, 16  ;;  %v3783_v19 = vrot.slane %v3781_v21, 5  ;;  %v1227_v21 = vld [vmem:[%s7213_s10 + $0x6c] sm:$0xe] }
  0xb5   : > { %6319 = vmatmul.mubr.bf16.gmra.mrb[16].mxu1 %v5324_v62  ;;  %6575 = vmatpush3.bf16.msra.mxu0 %v7677_v44  ;;  %v5344_v62 = vrot.slane %v1223_v4, 9  ;;  %v5348_v58 = vrot.slane %v1227_v21, 9 }
  0xb6   : > { %6322 = vmatprep.mubr.bf16.mxu1 %v5325_v36  ;;  %6546 = vmatprep.mubr.bf16.mxu0 %v7010_v18  ;;  %v7923_v36 = vsel %vm7491_vm5, %v1301_v52, %v1302_v45  ;;  %v1308_v18 = vrot.slane %v1306_v22, 4  ;;  %v5702_v52 = vld [vmem:[%s7213_s10 + $0x24] sm:$0xf]  ;;  %v3815_v45 = vshrl.u32 %v5703_v13, 16 }
  0xb7   : > { %6576 = vmatprep.subr.bf16.mxu0 %v7014_v47  ;;  %v7940_v49 = vsel %vm7491_vm5, %v5344_v62, %v1306_v22  ;;  %v7957_v22 = vld [vmem:[%s7213_s10 + $0x54] sm:$0xe]  ;;  %v3793_v62 = vrot.slane %v3791_v51, 4  ;;  %v3802_v38 = vshrl.u32 %v5702_v52, 16  ;;  %v3805_v28 = vshll.u32 %v5702_v52, 16 }
  0xb8   : > { %v7954_v4 = vsel %vm7491_vm5, %v1308_v18, %v1309_v17  ;;  %v3797_v17 = vshll.u32 %v5701_v50, 16  ;;  %v5346_v5 = vrot.slane %v7957_v22, 9  ;;  %v7034_v50 = vld [vmem:[%s9016_s1 + $0x1e8] sm:$0xff]   ;;  %v1322_v52 = vrot.slane %v1320_v16, 4 }
  0xb9   : > { %6577 = vmatpush3.bf16.msra.mxu0 %v7014_v47  ;;  %v7026_v47 = vld [vmem:[%s9016_s1 + $0x1d8] sm:$0xff]   ;;  %v3784_v22 = vor.u32 %v3783_v19, %v3780_v10  ;;  %v3804_v34 = vrot.slane %v3802_v38, 4  ;;  %v3807_v44 = vrot.slane %v3805_v28, 5  ;;  %v7098_v10 = vld [vmem:[%s7213_s10 + $0x74] sm:$0x1]  ;;  %v3817_v28 = vrot.slane %v3815_v45, 4 }
  0xba   : > { %6578 = vmatprep.subr.bf16.mxu0 %v7020_v56  ;;  %v7995_v42 = vrot.slane %v3797_v17, 5  ;;  %v1337_v19 = vrot.slane %v7098_v10, 5  ;;  %v3826_v38 = vshrl.u32 %v5705_v43, 16  ;;  %v8020_v27 = vsel %vm7491_vm5, %v5346_v5, %v1320_v16 }
  0xbb   : > { %v3785_v21 = vrot.slane %v3784_v22, 4 }
  0xbc   : > { %6547 = vmatmul.mubr.bf16.gmra.mrb[4].mxu0 %v7013_v7  ;;  %v7967_v7 = vrot.slane %v3787_v33, 5  ;;  %v7096_v33 = vld [vmem:[%s7213_s10 + $0x70] sm:$0xf] }
  0xbd   : > { %6323 = vmatmul.mubr.bf16.gmra.mrb[20].mxu1 %v5326_v15  ;;  %6550 = vmatprep.mubr.bf16.mxu0 %v7016_v0  ;;  %v1327_v15 = vrot.slane %v7961_v40, 5  ;;  %v7095_v0 = vld [vmem:[%s7213_s10 + $0x5c] sm:$0x1]  ;;  %v1334_v51 = vrot.slane %v7096_v33, 5 }
  0xbe   : > { %6326 = vmatprep.mubr.bf16.mxu1 %v5327_v26  ;;  %6579 = vmatpush3.bf16.msra.mxu0 %v7020_v56  ;;  %v1323_v18 = vrot.slane %v7095_v0, 5  ;;  %v7976_v26 = vsel %vm7491_vm5, %v5345_v54, %v1313_v1  ;;  %v7980_v56 = vsel %vm7491_vm5, %v1315_v46, %v1316_v39  ;;  %v7097_v1 = vld [vmem:[%s7213_s10 + $0x68] sm:$0x1]  ;;  %v3811_v0 = vshll.u32 %v5703_v13, 16  ;;  %v7042_v40 = vld [vmem:[%s9016_s1 + $0x1f8] sm:$0xff]  }
  0xbf   : > { %6580 = vmatprep.subr.bf16.mxu0 %v7026_v47  ;;  %v1330_v54 = vrot.slane %v7097_v1, 5  ;;  %v5347_v46 = vrot.slane %v1226_v32, 9  ;;  %v1329_v39 = vrot.slane %v1327_v15, 4  ;;  %v3794_v33 = vor.u32 %v3793_v62, %v7967_v7  ;;  %v5706_v1 = vld [vmem:[%s7213_s10 + $0x34] sm:$0xf] }
  0xc0   : > { %v1336_v32 = vrot.slane %v1334_v51, 4  ;;  %v5704_v62 = vld [vmem:[%s7213_s10 + $0x2c] sm:$0x1]  ;;  %v8007_v17 = vrot.slane %v3811_v0, 5  ;;  %v3835_v13 = vshll.u32 %v5706_v1, 16  ;;  %v3839_v31 = vshrl.u32 %v5706_v1, 16 }
  0xc1   : > { %v3795_v10 = vrot.slane %v3794_v33, 4  ;;  %v8024_v29 = vsel %vm7491_vm5, %v1322_v52, %v1323_v18  ;;  %v8031_v45 = vsel %vm7491_vm5, %v5347_v46, %v1327_v15  ;;  %v8035_v14 = vsel %vm7491_vm5, %v1329_v39, %v1330_v54  ;;  %v1228_v18 = vld [vmem:[%s7213_s10 + $0x78] sm:$0xe] }
  0xc2   : > { %6581 = vmatpush3.bf16.msra.mxu0 %v7026_v47  ;;  %v8039_v16 = vsel %vm7491_vm5, %v5348_v58, %v1334_v51  ;;  %v8049_v15 = vsel %vm7491_vm5, %v1336_v32, %v1337_v19  ;;  %v3818_v5 = vor.u32 %v3817_v28, %v8007_v17  ;;  %v3828_v52 = vrot.slane %v3826_v38, 4  ;;  %v5708_v58 = vld [vmem:[%s7213_s10 + $0x3c] sm:$0xf]  ;;  %v5709_v51 = vld [vmem:[%s7213_s10 + $0x40] sm:$0xf] }
  0xc3   : > { %6582 = vmatprep.subr.bf16.mxu0 %v7030_v53  ;;  %v3790_v0 = vsel %vm7245_vm2, %v3785_v21, %v7967_v7  ;;  %v3800_v46 = vsel %vm7245_vm2, %v3795_v10, %v7995_v42  ;;  %v8060_v39 = vrot.slane %v3835_v13, 5  ;;  %v3841_v22 = vrot.slane %v3839_v31, 4  ;;  %v7100_v19 = vld [vmem:[%s7213_s10 + $0x80] sm:$0x1]  ;;  %v8219_v47 = vld [vmem:[%s7213_s10 + $0x68] sm:$0x1] }
  0xc4   : > { %6551 = vmatmul.mubr.bf16.gmra.mrb[8].mxu0 %v7019_v2  ;;  %v3829_v2 = vshll.u32 %v5705_v43, 16  ;;  %v3821_v43 = vshll.u32 %v5704_v62, 16  ;;  %v5349_v32 = vrot.slane %v1228_v18, 9  ;;  %v1229_v62 = vld [vmem:[%s7213_s10 + $0x84] sm:$0xe]  ;;  %v3850_v28 = vshrl.u32 %v5708_v58, 16 }
  0xc5   : > { %6327 = vmatmul.mubr.bf16.gmra.mrb[24].mxu1 %v5328_v20  ;;  %6554 = vmatprep.mubr.bf16.mxu0 %v7022_v3  ;;  %v7038_v20 = vld [vmem:[%s9016_s1 + $0x1f0] sm:$0xff]   ;;  %v7099_v3 = vld [vmem:[%s7213_s10 + $0x7c] sm:$0xf]  ;;  %v3853_v7 = vshll.u32 %v5708_v58, 16  ;;  %v3859_v38 = vshll.u32 %v5709_v51, 16  ;;  %v9038_v42 = vcombine.low %v7650_v41, %v7655_v12  ;;  %v8071_v13 = vrot.slane %v3818_v5, 4 }
  0xc6   : > { %6330 = vmatprep.mubr.bf16.mxu1 %v5329_v23  ;;  %6583 = vmatpush3.bf16.msra.mxu0 %v7030_v53  ;;  %v3808_v23 = vor.u32 %v3807_v44, %v3804_v34  ;;  %v7027_v53 = vld [vmem:[%s7213_s10 + $0x78] sm:$0xff]   ;;  %v1341_v44 = vrot.slane %v7099_v3, 5  ;;  %v3831_v54 = vrot.slane %v3829_v2, 5  ;;  %v8064_v1 = vrot.slane %v3821_v43, 5  ;;  %v8076_v21 = vld [vmem:[%s9016_s1 + $0x200] sm:$0xff]   ;;  %9046 = vst [vmem:[#allocation5_spill] sm:$0xff] %v8219_v47 }
  0xc7   : > { %6584 = vmatprep.subr.bf16.mxu0 %v7034_v50  ;;  %v5707_v34 = vld [vmem:[%s7213_s10 + $0x38] sm:$0x1]  ;;  %v3863_v2 = vshrl.u32 %v5709_v51, 16  ;;  %v7029_v43 = vld [vmem:[%s7213_s10 + $0x84] sm:$0xff]   ;;  %v3842_v12 = vor.u32 %v3841_v22, %v8060_v39  ;;  %v3855_v58 = vrot.slane %v3853_v7, 5  ;;  %v8098_v51 = vrot.slane %v3859_v38, 5 }
  0xc8   : > { %v8062_v33 = vrot.slane %v3808_v23, 4  ;;  %v1343_v10 = vrot.slane %v1341_v44, 4  ;;  %v3832_v31 = vor.u32 %v3831_v54, %v3828_v52  ;;  %v9039_v23 = vcombine.low %v7881_v59, %v7889_v25  ;;  %v7101_v18 = vld [vmem:[%s7213_s10 + $0x88] sm:$0xf]  ;;  %v5710_v5 = vld [vmem:[%s7213_s10 + $0x44] sm:$0x1] }
  0xc9   : > { %v1348_v3 = vrot.slane %v7101_v18, 5  ;;  %v8089_v59 = vcombine.low %v3790_v0, %v3800_v46  ;;  %v5711_v52 = vld [vmem:[%s7213_s10 + $0x48] sm:$0xf]  ;;  %v3852_v54 = vrot.slane %v3850_v28, 4  ;;  %v3865_v22 = vrot.slane %v3863_v2, 4 }
  0xca   : > { %6585 = vmatpush3.bf16.msra.mxu0 %v7034_v50  ;;  %v1344_v50 = vrot.slane %v7100_v19, 5  ;;  %v7031_v19 = vld [vmem:[%s7213_s10 + $0x90] sm:$0xff]   ;;  %v3814_v0 = vsel %vm7245_vm2, %v8062_v33, %v8007_v17  ;;  %v3833_v46 = vrot.slane %v3832_v31, 4  ;;  %v3824_v28 = vsel %vm7245_vm2, %v8071_v13, %v8064_v1  ;;  %v8120_v33 = vld [vmem:[%s7213_s10 + $0x58] sm:$0xf]  ;;  %v7032_v31 = vld [vmem:[%s9016_s1 + $0xc8] sm:$0xff]  }
  0xcb   : > { %6586 = vmatprep.subr.bf16.mxu0 %v7038_v20  ;;  %v3843_v38 = vrot.slane %v3842_v12, 4  ;;  %v1350_v2 = vrot.slane %v1348_v3, 4  ;;  %v5714_v17 = vld [vmem:[%s7213_s10 + $0x54] sm:$0xf]  ;;  %v3869_v1 = vshll.u32 %v5710_v5, 16  ;;  %v3874_v13 = vshrl.u32 %v5711_v52, 16 }
  0xcc   : > { %6555 = vmatmul.mubr.bf16.gmra.mrb[12].mxu0 %v7025_v48  ;;  %v3845_v48 = vshll.u32 %v5707_v34, 16  ;;  %v8116_v7 = vsel %vm7491_vm5, %v1343_v10, %v1344_v50  ;;  %v3877_v50 = vshll.u32 %v5711_v52, 16  ;;  %v3856_v10 = vor.u32 %v3855_v58, %v3852_v54  ;;  %v7033_v54 = vld [vmem:[%s7213_s10 + $0x9c] sm:$0xff]   ;;  %v7107_v41 = vld [vmem:[%s7213_s10 + $0xac] sm:$0xf] }
  0xcd   : > { %6331 = vmatmul.mubr.bf16.gmra.mrb[28].mxu1 %v9038_v42  ;;  %6558 = vmatprep.mubr.bf16.mxu0 %v7027_v53  ;;  %v5350_v53 = vrot.slane %v1229_v62, 9  ;;  %v7102_v42 = vld [vmem:[%s7213_s10 + $0x8c] sm:$0x1]  ;;  %v3907_v5 = vshll.u32 %v8120_v33, 16  ;;  %v9041_v52 = vcombine.low %v7897_v63, %v7905_v8  ;;  %v8156_v63 = vld [vmem:[%s7213_s10 + $0x50] sm:$0x1] }
  0xce   : > { %6350 = vmatprep.mubr.bf16.mxu1 %v9039_v23  ;;  %6587 = vmatpush3.bf16.msra.mxu0 %v7038_v20  ;;  %v8095_v20 = vsel %vm7491_vm5, %v5349_v32, %v1341_v44  ;;  %v3847_v62 = vrot.slane %v3845_v48, 5  ;;  %v1351_v23 = vrot.slane %v7102_v42, 5  ;;  %v1230_v44 = vld [vmem:[%s7213_s10 + $0x90] sm:$0xe]  ;;  %v8108_v32 = vld [vmem:[%s7213_s10 + $0x4c] sm:$0xf]  ;;  %v3866_v48 = vor.u32 %v3865_v22, %v8098_v51 }
  0xcf   : > { %6588 = vmatprep.subr.bf16.mxu0 %v7042_v40  ;;  %v3883_v12 = vshll.u32 %v8108_v32, 16  ;;  %v3887_v18 = vshrl.u32 %v8108_v32, 16  ;;  %v9040_v42 = vcombine.low %v7885_v30, %v7893_v6  ;;  %v7036_v30 = vld [vmem:[%s9016_s1 + $0xd0] sm:$0xff]   ;;  %v3838_v6 = vsel %vm7245_vm2, %v3833_v46, %v8060_v39  ;;  %v7035_v8 = vld [vmem:[%s7213_s10 + $0xa8] sm:$0xff]   ;;  %v8163_v39 = vld [vmem:[%s7213_s10 + $0x5c] sm:$0x1] }
  0xd0   : > { %v3848_v58 = vsel %vm7245_vm2, %v3843_v38, %v3847_v62  ;;  %v5351_v22 = vrot.slane %v1230_v44, 9  ;;  %v3879_v25 = vrot.slane %v3877_v50, 5  ;;  %9042 = vst [vmem:[#allocation3_spill] sm:$0xff] %v8163_v39  ;;  %v3857_v46 = vrot.slane %v3856_v10, 4 }
  0xd1   : > { %v3867_v62 = vrot.slane %v3866_v48, 4  ;;  %v8165_v38 = vrot.slane %v3883_v12, 5  ;;  %v8167_v34 = vrot.slane %v3907_v5, 5  ;;  %v8172_v50 = vcombine.low %v3814_v0, %v3824_v28  ;;  %v5717_v28 = vld [vmem:[%s7213_s10 + $0x60] sm:$0xf] }
  0xd2   : > { %6589 = vmatpush3.bf16.msra.mxu0 %v7042_v40  ;;  %v8128_v40 = vsel %vm7491_vm5, %v5350_v53, %v1348_v3  ;;  %v3898_v53 = vshrl.u32 %v5714_v17, 16  ;;  %v3901_v3 = vshll.u32 %v5714_v17, 16  ;;  %v7103_v17 = vld [vmem:[%s7213_s10 + $0x94] sm:$0xf]  ;;  %v8176_v48 = vcombine.low %v3838_v6, %v3848_v58 }
  0xd3   : > { %6622 = vmatprep.subr.bf16.mxu0 %v8076_v21  ;;  %v3893_v0 = vshll.u32 %v8156_v63, 16  ;;  %v3862_v6 = vsel %vm7245_vm2, %v3857_v46, %v8098_v51  ;;  %v9045_v46 = vcombine.low %v7919_v61, %v7923_v36 }
  0xd4   : > { %6559 = vmatmul.mubr.bf16.gmra.mrb[16].mxu0 %v7029_v43  ;;  %v3911_v43 = vshrl.u32 %v8120_v33, 16  ;;  %v3900_v44 = vrot.slane %v3898_v53, 4  ;;  %v7104_v53 = vld [vmem:[%s7213_s10 + $0x98] sm:$0x1] }
  0xd5   : > { %6351 = vmatmul.mubr.bf16.vlgmr.msra.gmra.mrb[0].mxu1 %v9040_v42  ;;  %6562 = vmatprep.mubr.bf16.mxu0 %v7031_v19  ;;  %v8159_v19 = vrot.slane %v3869_v1, 5  ;;  %v1355_v42 = vrot.slane %v7103_v17, 5  ;;  %v7105_v17 = vld [vmem:[%s7213_s10 + $0xa0] sm:$0xf]  ;;  %v3895_v36 = vrot.slane %v3893_v0, 5 }
  0xd6   : > { %6383 = vmatpush3.bf16.msra.mxu1 %v7838_v60  ;;  %6354 = vmatprep.mubr.bf16.mxu1 %v9041_v52  ;;  %v8153_v60 = vsel %vm7491_vm5, %v1350_v2, %v1351_v23  ;;  %v3876_v52 = vrot.slane %v3874_v13, 4  ;;  %v3889_v23 = vrot.slane %v3887_v18, 4  ;;  %v3903_v2 = vrot.slane %v3901_v3, 5  ;;  %v7040_v13 = vld [vmem:[%s9016_s1 + $0xd8] sm:$0xff]  }
  0xd7   : > { %6384 = vmatprep.subr.bf16.mxu1 %v7032_v31  ;;  %v3913_v1 = vrot.slane %v3911_v43, 4  ;;  %v1231_v18 = vld [vmem:[%s7213_s10 + $0x9c] sm:$0xe]  ;;  %v1358_v3 = vrot.slane %v7104_v53, 5  ;;  %v8189_v43 = vld [vmem:[%s7213_s10 + $0x64] sm:$0xf] }
  0xd8   : > { %v3880_v5 = vor.u32 %v3879_v25, %v3876_v52  ;;  %9043 = vst [vmem:[#allocation4_spill] sm:$0xff] %v8189_v43  ;;  %v3890_v58 = vor.u32 %v3889_v23, %v8165_v38  ;;  %v1362_v12 = vrot.slane %v7105_v17, 5  ;;  %v9044_v25 = vcombine.low %v7909_v24, %v7913_v35  ;;  %v7037_v23 = vld [vmem:[%s7213_s10 + $0xb4] sm:$0xff]   ;;  %v7043_v24 = vld [vmem:[%s9016_s1 + $0xe0] sm:$0xff]   ;;  %v5720_v17 = vld [vmem:[%s7213_s10 + $0x6c] sm:$0xf] }
  0xd9   : > { %v1357_v52 = vrot.slane %v1355_v42, 4  ;;  %v3904_v53 = vor.u32 %v3903_v2, %v3900_v44  ;;  %v3914_v51 = vor.u32 %v3913_v1, %v8167_v34  ;;  %v3922_v35 = vshrl.u32 %v5717_v28, 16  ;;  %v7106_v2 = vld [vmem:[%s7213_s10 + $0xa4] sm:$0x1] }
  0xda   : > { %6385 = vmatpush3.bf16.msra.mxu1 %v7032_v31  ;;  %v8183_v31 = vsel %vm7491_vm5, %v5351_v22, %v1355_v42  ;;  %v3917_v22 = vshll.u32 %v8163_v39, 16  ;;  %v3935_v42 = vshrl.u32 %v8189_v43, 16  ;;  %v3881_v61 = vrot.slane %v3880_v5, 4  ;;  %v8358_v39 = vld [vmem:[%s7213_s10 + $0x98] sm:$0x1] }
  0xdb   : > { %6386 = vmatprep.subr.bf16.mxu1 %v7036_v30  ;;  %v5352_v44 = vrot.slane %v1231_v18, 9  ;;  %v1365_v1 = vrot.slane %v7106_v2, 5  ;;  %v3905_v5 = vrot.slane %v3904_v53, 4  ;;  %v3915_v18 = vrot.slane %v3914_v51, 4  ;;  %9059 = vst [vmem:[#allocation14_spill] sm:$0xff] %v8358_v39 }
  0xdc   : > { %6563 = vmatmul.mubr.bf16.gmra.mrb[20].mxu0 %v7033_v54  ;;  %v3872_v54 = vsel %vm7245_vm2, %v3867_v62, %v8159_v19  ;;  %v3931_v19 = vshll.u32 %v8189_v43, 16  ;;  %v7039_v62 = vld [vmem:[%s7213_s10 + $0xc0] sm:$0xff]   ;;  %v3919_v10 = vrot.slane %v3917_v22, 5  ;;  %v8225_v43 = vsel %vm7491_vm5, %v1357_v52, %v1358_v3 }
  0xdd   : > { %6355 = vmatmul.mubr.bf16.gmra.mrb[4].mxu1 %v9044_v25  ;;  %6566 = vmatprep.mubr.bf16.mxu0 %v7035_v8  ;;  %v3925_v8 = vshll.u32 %v5717_v28, 16  ;;  %v3891_v25 = vrot.slane %v3890_v58, 4  ;;  %v1369_v28 = vrot.slane %v7107_v41, 5  ;;  %v8221_v55 = vcombine.low %v3862_v6, %v3872_v54  ;;  %v7045_v41 = vld [vmem:[%s9016_s1 + $0xe8] sm:$0xff]  }
  0xde   : > { %6358 = vmatprep.mubr.bf16.mxu1 %v9045_v46  ;;  %6387 = vmatpush3.bf16.msra.mxu1 %v7036_v30  ;;  %v1232_v30 = vld [vmem:[%s7213_s10 + $0xa8] sm:$0xe]  ;;  %v1364_v46 = vrot.slane %v1362_v12, 4  ;;  %v3924_v0 = vrot.slane %v3922_v35, 4  ;;  %v8227_v58 = vrot.slane %v3931_v19, 5  ;;  %v3937_v22 = vrot.slane %v3935_v42, 4 }
  0xdf   : > { %6388 = vmatprep.subr.bf16.mxu1 %v7040_v13  ;;  %v3927_v2 = vrot.slane %v3925_v8, 5  ;;  %v3886_v3 = vsel %vm7245_vm2, %v3881_v61, %v8165_v38  ;;  %v8237_v6 = vsel %vm7491_vm5, %v5352_v44, %v1362_v12  ;;  %v3946_v54 = vshrl.u32 %v5720_v17, 16  ;;  %v7108_v38 = vld [vmem:[%s7213_s10 + $0xb0] sm:$0x1]  ;;  %v1233_v19 = vld [vmem:[%s7213_s10 + $0xb4] sm:$0xe] }
  0xe0   : > { %v3949_v52 = vshll.u32 %v5720_v17, 16  ;;  %v3896_v53 = vsel %vm7245_vm2, %v3891_v25, %v3895_v36  ;;  %v8246_v51 = vsel %vm7491_vm5, %v1364_v46, %v1365_v1  ;;  %v5353_v35 = vrot.slane %v1232_v30, 9  ;;  %v8268_v30 = vld [vmem:[%s7213_s10 + $0x74] sm:$0x1]  ;;  %v7109_v25 = vld [vmem:[%s7213_s10 + $0xb8] sm:$0xf] }
  0xe1   : > { %v1372_v8 = vrot.slane %v7108_v38, 5  ;;  %v9048_v12 = vcombine.low %v7940_v49, %v7954_v4  ;;  %v3910_v42 = vsel %vm7245_vm2, %v3905_v5, %v8167_v34  ;;  %v3920_v61 = vsel %vm7245_vm2, %v3915_v18, %v3919_v10  ;;  %v7041_v4 = vld [vmem:[%s7213_s10 + $0xcc] sm:$0xff]   ;;  %9050 = vst [vmem:[#allocation7_spill] sm:$0xff] %v8268_v30  ;;  %v5726_v38 = vld [vmem:[%s7213_s10 + $0x84] sm:$0xf] }
  0xe2   : > { %6389 = vmatpush3.bf16.msra.mxu1 %v7040_v13  ;;  %v8240_v13 = vld [vmem:[%s7213_s10 + $0x70] sm:$0xf]  ;;  %v1371_v36 = vrot.slane %v1369_v28, 4  ;;  %v3941_v44 = vshll.u32 %v8219_v47, 16  ;;  %v9049_v49 = vcombine.low %v7976_v26, %v7980_v56  ;;  %v3938_v1 = vor.u32 %v3937_v22, %v8227_v58  ;;  %v8285_v22 = vld [vmem:[%s7213_s10 + $0x7c] sm:$0xf] }
  0xe3   : > { %6390 = vmatprep.subr.bf16.mxu1 %v7043_v24  ;;  %9047 = vst [vmem:[#allocation6_spill] sm:$0xff] %v8240_v13  ;;  %v3955_v34 = vshll.u32 %v8240_v13, 16  ;;  %v3959_v10 = vshrl.u32 %v8240_v13, 16  ;;  %v5354_v17 = vrot.slane %v1233_v19, 9  ;;  %v1376_v46 = vrot.slane %v7109_v25, 5  ;;  %9051 = vst [vmem:[#allocation8_spill] sm:$0xff] %v8285_v22 }
  0xe4   : > { %6567 = vmatmul.mubr.bf16.gmra.mrb[24].mxu0 %v7037_v23  ;;  %v7047_v23 = vld [vmem:[%s9016_s1 + $0xf0] sm:$0xff]   ;;  %v3948_v26 = vrot.slane %v3946_v54, 4  ;;  %v3951_v56 = vrot.slane %v3949_v52, 5  ;;  %v8276_v18 = vcombine.low %v3886_v3, %v3896_v53  ;;  %v8288_v19 = vcombine.low %v3910_v42, %v3920_v61  ;;  %v7110_v3 = vld [vmem:[%s7213_s10 + $0xbc] sm:$0x1] }
  0xe5   : > { %6359 = vmatmul.mubr.bf16.gmra.mrb[8].mxu1 %v9048_v12  ;;  %6570 = vmatprep.mubr.bf16.mxu0 %v7039_v62  ;;  %v3928_v62 = vor.u32 %v3927_v2, %v3924_v0  ;;  %v8282_v2 = vsel %vm7491_vm5, %v5353_v35, %v1369_v28  ;;  %v8292_v54 = vsel %vm7491_vm5, %v1371_v36, %v1372_v8  ;;  %v8294_v52 = vrot.slane %v3941_v44, 5  ;;  %v7049_v12 = vld [vmem:[%s9016_s1 + $0xf8] sm:$0xff]   ;;  %v8301_v28 = vld [vmem:[%s7213_s10 + $0x88] sm:$0xf] }
  0xe6   : > { %6362 = vmatprep.mubr.bf16.mxu1 %v9049_v49  ;;  %6391 = vmatpush3.bf16.msra.mxu1 %v7043_v24  ;;  %v5723_v24 = vld [vmem:[%s7213_s10 + $0x78] sm:$0xf]  ;;  %v1379_v53 = vrot.slane %v7110_v3, 5  ;;  %9052 = vst [vmem:[#allocation9_spill] sm:$0xff] %v8301_v28  ;;  %v8305_v42 = vrot.slane %v3938_v1, 4  ;;  %v8307_v61 = vrot.slane %v3955_v34, 5  ;;  %v8311_v36 = vsel %vm7491_vm5, %v5354_v17, %v1376_v46 }
  0xe7   : > { %6392 = vmatprep.subr.bf16.mxu1 %v7045_v41  ;;  %v8303_v35 = vrot.slane %v3928_v62, 4  ;;  %v3961_v8 = vrot.slane %v3959_v10, 4  ;;  %v1378_v44 = vrot.slane %v1376_v46, 4  ;;  %v3952_v49 = vor.u32 %v3951_v56, %v3948_v26  ;;  %v5729_v3 = vld [vmem:[%s7213_s10 + $0x90] sm:$0xf] }
  0xe8   : > { %v3965_v25 = vshll.u32 %v8268_v30, 16  ;;  %v3973_v0 = vshll.u32 %v5723_v24, 16  ;;  %v3979_v62 = vshll.u32 %v8285_v22, 16  ;;  %v3983_v1 = vshrl.u32 %v8285_v22, 16  ;;  %v8318_v34 = vld [vmem:[%s7213_s10 + $0x94] sm:$0xf] }
  0xe9   : > { %9053 = vst [vmem:[#allocation10_spill] sm:$0xff] %v8318_v34  ;;  %v9054_v10 = vcombine.low %v8020_v27, %v8024_v29  ;;  %v3994_v17 = vshrl.u32 %v5726_v38, 16  ;;  %v3997_v46 = vshll.u32 %v5726_v38, 16  ;;  %v4007_v26 = vshrl.u32 %v8301_v28, 16  ;;  %v5732_v38 = vld [vmem:[%s7213_s10 + $0x9c] sm:$0xf] }
  0xea   : > { %6393 = vmatpush3.bf16.msra.mxu1 %v7045_v41  ;;  %v3970_v41 = vshrl.u32 %v5723_v24, 16  ;;  %v9055_v56 = vcombine.low %v8031_v45, %v8035_v14  ;;  %v3962_v29 = vor.u32 %v3961_v8, %v8307_v61  ;;  %v4021_v24 = vshll.u32 %v5729_v3, 16  ;;  %v8340_v45 = vld [vmem:[%s7213_s10 + $0x80] sm:$0x1] }
  0xeb   : > { %6394 = vmatprep.subr.bf16.mxu1 %v7047_v23  ;;  %v8337_v5 = vrot.slane %v3965_v25, 5  ;;  %9056 = vst [vmem:[#allocation11_spill] sm:$0xff] %v8340_v45  ;;  %v4027_v14 = vshll.u32 %v8318_v34, 16  ;;  %v3975_v27 = vrot.slane %v3973_v0, 5  ;;  %v3985_v8 = vrot.slane %v3983_v1, 4 }
  0xec   : > { %6571 = vmatmul.mubr.bf16.gmra.mrb[28].mxu0 %v7041_v4  ;;  %v4003_v4 = vshll.u32 %v8301_v28, 16  ;;  %v8344_v28 = vrot.slane %v3979_v62, 5  ;;  %v8350_v22 = vld [vmem:[%s7213_s10 + $0xa0] sm:$0xf]  ;;  %v3996_v25 = vrot.slane %v3994_v17, 4  ;;  %v3999_v30 = vrot.slane %v3997_v46, 5 }
  0xed   : > { %6363 = vmatmul.mubr.bf16.gmra.mrb[12].mxu1 %v9054_v10  ;;  %6590 = vmatprep.mubr.bf16.mxu0 %v8089_v59  ;;  %v4018_v59 = vshrl.u32 %v5729_v3, 16  ;;  %v8335_v10 = vrot.slane %v3952_v49, 4  ;;  %v8347_v3 = vld [vmem:[%s7213_s10 + $0x8c] sm:$0x1]  ;;  %9058 = vst [vmem:[#allocation13_spill] sm:$0xff] %v8350_v22  ;;  %v4009_v47 = vrot.slane %v4007_v26, 4  ;;  %v8367_v62 = vsel %vm7491_vm5, %v1378_v44, %v1379_v53 }
  0xee   : > { %6366 = vmatprep.mubr.bf16.mxu1 %v9055_v56  ;;  %6395 = vmatpush3.bf16.msra.mxu1 %v7047_v23  ;;  %v4031_v23 = vshrl.u32 %v8318_v34, 16  ;;  %v3972_v56 = vrot.slane %v3970_v41, 4  ;;  %9057 = vst [vmem:[#allocation12_spill] sm:$0xff] %v8347_v3  ;;  %v7046_v49 = vld [vmem:[%s9016_s1 + $0x208] sm:$0xff]   ;;  %v8355_v13 = vrot.slane %v4003_v4, 5  ;;  %v4023_v34 = vrot.slane %v4021_v24, 5 }
  0xef   : > { %6396 = vmatprep.subr.bf16.mxu1 %v7049_v12  ;;  %v5735_v41 = vld [vmem:[%s7213_s10 + $0xa8] sm:$0xf]  ;;  %v4020_v1 = vrot.slane %v4018_v59, 4  ;;  %v8372_v17 = vld [vmem:[%s9016_s1 + $0x100] sm:$0xff]   ;;  %v8375_v46 = vrot.slane %v4027_v14, 5  ;;  %v4042_v26 = vshrl.u32 %v5732_v38, 16  ;;  %v9061_v24 = vcombine.low %v8039_v16, %v8049_v15 }
  0xf0   : > { %9060 = vst [vmem:[#allocation15_spill] sm:$0xff] %v8372_v17  ;;  %v4033_v4 = vrot.slane %v4031_v23, 4  ;;  %v4045_v0 = vshll.u32 %v5732_v38, 16  ;;  %v8378_v53 = vrot.slane %v3962_v29, 4  ;;  %v4051_v44 = vshll.u32 %v8350_v22, 16  ;;  %v7048_v16 = vld [vmem:[%s9016_s1 + $0x210] sm:$0xff]  }
  0xf1   : > { %v4055_v59 = vshrl.u32 %v8350_v22, 16  ;;  %v3976_v14 = vor.u32 %v3975_v27, %v3972_v56  ;;  %v3986_v38 = vor.u32 %v3985_v8, %v8344_v28  ;;  %v4000_v23 = vor.u32 %v3999_v30, %v3996_v25  ;;  %v8390_v29 = vld [vmem:[%s7213_s10 + $0xac] sm:$0xf]  ;;  %v8403_v25 = vld [vmem:[%s7213_s10 + $0xa4] sm:$0x1] }
  0xf2   : > { %6397 = vmatpush3.bf16.msra.mxu1 %v7049_v12  ;;  %v3989_v12 = vshll.u32 %v8340_v45, 16  ;;  %9062 = vst [vmem:[#allocation16_spill] sm:$0xff] %v8390_v29  ;;  %v4010_v15 = vor.u32 %v4009_v47, %v8355_v13  ;;  %v4066_v27 = vshrl.u32 %v5735_v41, 16  ;;  %v4069_v30 = vshll.u32 %v5735_v41, 16 }
  0xf3   : > { %6670 = vmatprep.subr.bf16.mxu1 %v8372_v17  ;;  %v9063_v17 = vcombine.low %v8095_v20, %v8116_v7  ;;  %v4024_v56 = vor.u32 %v4023_v34, %v4020_v1  ;;  %v4034_v8 = vor.u32 %v4033_v4, %v8375_v46  ;;  %v4044_v20 = vrot.slane %v4042_v26, 4 }
  0xf4   : > { %6591 = vmatmul.mubr.bf16.vlgmr.msra.gmra.mrb[0].mxu0 %v8172_v50  ;;  %v4013_v50 = vshll.u32 %v8347_v3, 16  ;;  %v4047_v7 = vrot.slane %v4045_v0, 5  ;;  %v4079_v22 = vshrl.u32 %v8390_v29, 16  ;;  %v3977_v47 = vrot.slane %v3976_v14, 4  ;;  %v7050_v0 = vld [vmem:[%s9016_s1 + $0x218] sm:$0xff]  }
  0xf5   : > { %6367 = vmatmul.mubr.bf16.gmra.mrb[16].mxu1 %v9061_v24  ;;  %6623 = vmatpush3.bf16.msra.mxu0 %v8076_v21  ;;  %v4037_v21 = vshll.u32 %v8358_v39, 16  ;;  %v4075_v24 = vshll.u32 %v8390_v29, 16  ;;  %v3987_v39 = vrot.slane %v3986_v38, 4  ;;  %v3991_v3 = vrot.slane %v3989_v12, 5 }
  0xf6   : > { %6370 = vmatprep.mubr.bf16.mxu1 %v9063_v17  ;;  %6594 = vmatprep.mubr.bf16.mxu0 %v8176_v48  ;;  %v8405_v17 = vrot.slane %v4051_v44, 5  ;;  %v4057_v48 = vrot.slane %v4055_v59, 4  ;;  %v4015_v41 = vrot.slane %v4013_v50, 5  ;;  %v4001_v34 = vrot.slane %v4000_v23, 4 }
  0xf7   : > { %6624 = vmatprep.subr.bf16.mxu0 %v7046_v49  ;;  %v4011_v1 = vrot.slane %v4010_v15, 4  ;;  %v4068_v4 = vrot.slane %v4066_v27, 4  ;;  %v4071_v45 = vrot.slane %v4069_v30, 5  ;;  %v4025_v26 = vrot.slane %v4024_v56, 4  ;;  %v8471_v27 = vld [vmem:[%s7213_s10 + $0xbc] sm:$0x1] }
  0xf8   : > { %v4039_v44 = vrot.slane %v4037_v21, 5  ;;  %v4048_v59 = vor.u32 %v4047_v7, %v4044_v20  ;;  %v4061_v29 = vshll.u32 %v8403_v25, 16  ;;  %v4058_v12 = vor.u32 %v4057_v48, %v8405_v17  ;;  %v8438_v21 = vld [vmem:[%s7213_s10 + $0xb0] sm:$0x1] }
  0xf9   : > { %6625 = vmatpush3.bf16.msra.mxu0 %v7046_v49  ;;  %v4035_v49 = vrot.slane %v4034_v8, 4  ;;  %v8415_v14 = vrot.slane %v4075_v24, 5  ;;  %v4081_v38 = vrot.slane %v4079_v22, 4  ;;  %v9064_v23 = vor.u32 %v7823_v57, %v7821_v11 }
  0xfa   : > { %6626 = vmatprep.subr.bf16.mxu0 %v7048_v16  ;;  %v9065_v15 = vcombine.low %v8128_v40, %v8153_v60  ;;  %v3968_v22 = vsel %vm7245_vm2, %v8378_v53, %v8337_v5  ;;  %v3982_v57 = vsel %vm7245_vm2, %v3977_v47, %v8344_v28  ;;  %v9066_v40 = vcombine.low %v8183_v31, %v8225_v43  ;;  %v7053_v31 = vld [vmem:[%s9016_s1 + $0x220] sm:$0xff]  }
  0xfb   : > { %v8420_v50 = vrot.slane %v9064_v23, 4  ;;  %v3992_v60 = vsel %vm7245_vm2, %v3987_v39, %v3991_v3  ;;  %v4072_v5 = vor.u32 %v4071_v45, %v4068_v4  ;;  %v4016_v28 = vsel %vm7245_vm2, %v4011_v1, %v4015_v41  ;;  %v5791_v41 = vld [vmem:[%s7213_s10 + $0x48] sm:$0xe] }
  0xfc   : > { %6595 = vmatmul.mubr.bf16.gmra.mrb[4].mxu0 %v8221_v55  ;;  %v3958_v55 = vsel %vm7245_vm2, %v8335_v10, %v8307_v61  ;;  %v5738_v61 = vld [vmem:[%s7213_s10 + $0xb4] sm:$0xf]  ;;  %v8450_v10 = vld [vmem:[%s7213_s10 + $0xb8] sm:$0xf]  ;;  %v4030_v39 = vsel %vm7245_vm2, %v4025_v26, %v8375_v46  ;;  %v8460_v43 = vrot.slane %v4048_v59, 4  ;;  %v8462_v3 = vrot.slane %v4061_v29, 5 }
  0xfd   : > { %6371 = vmatmul.mubr.bf16.gmra.mrb[20].mxu1 %v9065_v15  ;;  %6598 = vmatprep.mubr.bf16.mxu0 %v8276_v18  ;;  %v4006_v18 = vsel %vm7245_vm2, %v4001_v34, %v8355_v13  ;;  %v4040_v13 = vsel %vm7245_vm2, %v4035_v49, %v4039_v44  ;;  %v8466_v45 = vrot.slane %v4058_v12, 4  ;;  %v4082_v53 = vor.u32 %v4081_v38, %v8415_v14  ;;  %v5792_v26 = vld [vmem:[%s7213_s10 + $0x54] sm:$0xe] }
  0xfe   : > { %6374 = vmatprep.mubr.bf16.mxu1 %v9066_v40  ;;  %6627 = vmatpush3.bf16.msra.mxu0 %v7048_v16  ;;  %v4085_v16 = vshll.u32 %v8438_v21, 16  ;;  %v9067_v46 = vsel %vm7245_vm2, %v8305_v42, %v8294_v52  ;;  %v9068_v29 = vsel %vm7245_vm2, %v8303_v35, %v8227_v58  ;;  %v4090_v56 = vshrl.u32 %v5738_v61, 16 }
  0xff   : > { %6628 = vmatprep.subr.bf16.mxu0 %v7050_v0  ;;  %v5769_v30 = vcombine.low %v9068_v29, %v9067_v46  ;;  %v4093_v8 = vshll.u32 %v5738_v61, 16  ;;  %v4099_v20 = vshll.u32 %v8450_v10, 16  ;;  %v5385_v7 = vcombine.low %v8282_v2, %v8292_v54  ;;  %v7056_v2 = vld [vmem:[%s9016_s1 + $0x228] sm:$0xff]   ;;  %v5741_v54 = vld [vmem:[%s7213_s10 + $0xc0] sm:$0xf]  ;;  %v9072_v29 = vld [vmem:[#allocation5_spill] sm:$0xff] }
 0x100   : > { %v5386_v48 = vcombine.low %v8311_v36, %v8367_v62  ;;  %v5770_v24 = vcombine.low %v3958_v55, %v3968_v22  ;;  %v8488_v52 = vrot.slane %v4072_v5, 4  ;;  %v5771_v42 = vcombine.low %v3982_v57, %v3992_v60 }
 0x101   : > { %v8490_v58 = vcombine.low %v4006_v18, %v4016_v28  ;;  %v8492_v35 = vcombine.low %v4030_v39, %v4040_v13  ;;  %v4054_v47 = vsel %vm7245_vm2, %v8460_v43, %v8405_v17  ;;  %v4064_v34 = vsel %vm7245_vm2, %v8466_v45, %v8462_v3  ;;  %v5794_v28 = vld [vmem:[%s7213_s10 + $0x6c] sm:$0xe] }
 0x102   : > { %6629 = vmatpush3.bf16.msra.mxu0 %v7050_v0  ;;  %v8508_v1 = vrot.slane %v4082_v53, 4  ;;  %v8510_v4 = vrot.slane %v4085_v16, 5  ;;  %v4103_v0 = vshrl.u32 %v8450_v10, 16  ;;  %v9069_v44 = vcombine.low %v8237_v6, %v8246_v51  ;;  %v7059_v6 = vld [vmem:[%s9016_s1 + $0x230] sm:$0xff]   ;;  %v8532_v51 = vld [vmem:[%s7213_s10 + $0xc4] sm:$0xf] }
 0x103   : > { %6630 = vmatprep.subr.bf16.mxu0 %v7053_v31  ;;  %v8517_v59 = vrot.slane %v4090_v56, 4  ;;  %v8521_v49 = vrot.slane %v4099_v20, 5  ;;  %v4109_v12 = vshll.u32 %v8471_v27, 16  ;;  %v4078_v38 = vsel %vm7245_vm2, %v8488_v52, %v8415_v14  ;;  %v5793_v14 = vld [vmem:[%s7213_s10 + $0x60] sm:$0xe]  ;;  %v9070_v39 = vld [vmem:[#allocation3_spill] sm:$0xff] }
 0x104   : > { %6599 = vmatmul.mubr.bf16.gmra.mrb[8].mxu0 %v8288_v19  ;;  %v8519_v19 = vrot.slane %v4093_v8, 5  ;;  %v4114_v23 = vshrl.u32 %v5741_v54, 16  ;;  %v5807_v15 = vrot.slane %v5791_v41, 9  ;;  %v4577_v55 = vrot.slane %v8108_v32, 5  ;;  %v7051_v13 = vld [vmem:[%s7213_s10 + $0xc] sm:$0xff]   ;;  %v7062_v56 = vld [vmem:[%s9016_s1 + $0x238] sm:$0xff]  }
 0x105   : > { %6375 = vmatmul.mubr.bf16.gmra.mrb[24].mxu1 %v9069_v44  ;;  %6602 = vmatprep.mubr.bf16.mxu0 %v5769_v30  ;;  %v4117_v22 = vshll.u32 %v5741_v54, 16  ;;  %v4580_v57 = vrot.slane %v8156_v63, 5  ;;  %v5808_v40 = vrot.slane %v5792_v26, 9  ;;  %v4584_v60 = vrot.slane %v8120_v33, 5  ;;  %v9071_v16 = vld [vmem:[#allocation4_spill] sm:$0xff]  ;;  %v9073_v52 = vld [vmem:[#allocation6_spill] sm:$0xff] }
 0x106   : > { %6378 = vmatprep.mubr.bf16.mxu1 %v5385_v7  ;;  %6631 = vmatpush3.bf16.msra.mxu0 %v7053_v31  ;;  %v4088_v18 = vsel %vm7245_vm2, %v8508_v1, %v8510_v4  ;;  %v8542_v5 = vrot.slane %v4103_v0, 4  ;;  %v8546_v61 = vsel %vm7491_vm5, %v5807_v15, %v4577_v55  ;;  %v4579_v32 = vrot.slane %v4577_v55, 4  ;;  %v9074_v4 = vld [vmem:[#allocation7_spill] sm:$0xff] }
 0x107   : > { %6632 = vmatprep.subr.bf16.mxu0 %v7056_v2  ;;  %v4123_v31 = vshll.u32 %v8532_v51, 16  ;;  %v8552_v63 = vsel %vm7491_vm5, %v5808_v40, %v4584_v60  ;;  %v4586_v33 = vrot.slane %v4584_v60, 4  ;;  %v4587_v3 = vrot.slane %v9070_v39, 5  ;;  %v8583_v26 = vld [vmem:[%s7213_s10 + $0xc8] sm:$0x1]  ;;  %v7052_v40 = vld [vmem:[%s7213_s10 + $0x18] sm:$0xff]  }
 0x108   : > { %v8558_v45 = vsel %vm7491_vm5, %v4579_v32, %v4580_v57  ;;  %v5809_v53 = vrot.slane %v5793_v14, 9  ;;  %v4591_v46 = vrot.slane %v9071_v16, 5  ;;  %v4594_v30 = vrot.slane %v9072_v29, 5  ;;  %v7054_v39 = vld [vmem:[%s7213_s10 + $0x24] sm:$0xff]  }
 0x109   : > { %v5839_v8 = vcombine.low %v8546_v61, %v8558_v45  ;;  %v8569_v20 = vsel %vm7491_vm5, %v4586_v33, %v4587_v3  ;;  %v5810_v7 = vrot.slane %v5794_v28, 9  ;;  %v4601_v0 = vrot.slane %v9074_v4, 5  ;;  %v9076_v28 = vld [vmem:[#allocation11_spill] sm:$0xff]  ;;  %v5500_v61 = vld [vmem:[%s7213_s10 + $0x90] sm:$0xf] }
 0x10a   : > { %6633 = vmatpush3.bf16.msra.mxu0 %v7056_v2  ;;  %v4598_v2 = vrot.slane %v9073_v52, 5  ;;  %v5840_v54 = vcombine.low %v8552_v63, %v8569_v20  ;;  %v8576_v41 = vsel %vm7491_vm5, %v5809_v53, %v4591_v46  ;;  %v4593_v1 = vrot.slane %v4591_v46, 4  ;;  %v9077_v53 = vld [vmem:[#allocation2_spill] sm:$0xff]  ;;  %v7068_v45 = vld [vmem:[%s7213_s10 + $0xa8] sm:$0xff]  }
 0x10b   : > { %6634 = vmatprep.subr.bf16.mxu0 %v7059_v6  ;;  %v8585_v44 = vrot.slane %v4114_v23, 4  ;;  %v8598_v36 = vcombine.low %v4054_v47, %v4064_v34  ;;  %v4096_v62 = vor.u32 %v8519_v19, %v8517_v59  ;;  %v5795_v23 = vld [vmem:[%s7213_s10 + $0x78] sm:$0xe]  ;;  %v8610_v57 = vrot.slane %v4109_v12, 5  ;;  %v5744_v12 = vld [vmem:[%s7213_s10 + $0xcc] sm:$0xf] }
 0x10c   : > { %6603 = vmatmul.mubr.bf16.gmra.mrb[12].mxu0 %v5770_v24  ;;  %v8587_v24 = vrot.slane %v4117_v22, 5  ;;  %v8591_v15 = vsel %vm7491_vm5, %v5810_v7, %v4598_v2  ;;  %v4600_v55 = vrot.slane %v4598_v2, 4  ;;  %v8608_v22 = vcombine.low %v4078_v38, %v4088_v18  ;;  %v5494_v47 = vld [vmem:[%s7213_s10 + $0x78] sm:$0xf]  ;;  %v9075_v18 = vld [vmem:[#allocation8_spill] sm:$0xff] }
 0x10d   : > { %6379 = vmatmul.mubr.bf16.gmra.mrb[28].mxu1 %v5386_v48  ;;  %6606 = vmatprep.mubr.bf16.mxu0 %v5771_v42  ;;  %v4127_v48 = vshrl.u32 %v8532_v51, 16  ;;  %v8605_v42 = vsel %vm7491_vm5, %v4593_v1, %v4594_v30  ;;  %v4106_v34 = vor.u32 %v8542_v5, %v8521_v49  ;;  %v8621_v59 = vrot.slane %v4123_v31, 5  ;;  %v8635_v31 = vld [vmem:[%s7213_s10 + $0xd0] sm:$0xf]  ;;  %v9078_v1 = vld [vmem:[#allocation9_spill] sm:$0xff] }
 0x10e   : > { %6398 = vmatprep.mubr.bf16.mxu1 %v7051_v13  ;;  %6635 = vmatpush3.bf16.msra.mxu0 %v7059_v6  ;;  %v5841_v17 = vcombine.low %v8576_v41, %v8605_v42  ;;  %v8616_v43 = vsel %vm7491_vm5, %v4600_v55, %v4601_v0  ;;  %v4133_v19 = vshll.u32 %v8583_v26, 16  ;;  %v5796_v6 = vld [vmem:[%s7213_s10 + $0x84] sm:$0xe]  ;;  %v4120_v60 = vor.u32 %v8587_v24, %v8585_v44  ;;  %v9079_v24 = vld [vmem:[#allocation12_spill] sm:$0xff]  ;;  %v7132_v63 = vld [vmem:[%s7213_s10 + $0x8c] sm:$0x1] }
 0x10f   : > { %6636 = vmatprep.subr.bf16.mxu0 %v7062_v56  ;;  %v5842_v38 = vcombine.low %v8591_v15, %v8616_v43  ;;  %v5811_v14 = vrot.slane %v5795_v23, 9  ;;  %v4605_v32 = vrot.slane %v9075_v18, 5  ;;  %v4608_v33 = vrot.slane %v9076_v28, 5 }
 0x110   : > { %v4129_v5 = vrot.slane %v4127_v48, 4  ;;  %v2355_v3 = vshrl.u32 %v5494_v47, 16  ;;  %v2358_v13 = vshll.u32 %v5494_v47, 16  ;;  %v2377_v16 = vsel %vm7245_vm2, %v8420_v50, %v9077_v53 }
 0x111   : > { %v4138_v46 = vshrl.u32 %v5744_v12, 16  ;;  %v8643_v29 = vsel %vm7491_vm5, %v5811_v14, %v4605_v32  ;;  %v4607_v30 = vrot.slane %v4605_v32, 4  ;;  %v5812_v7 = vrot.slane %v5796_v6, 9  ;;  %v7112_v6 = vld [vmem:[%s9016_s1 + $0x108] sm:$0xff]  }
 0x112   : > { %6637 = vmatpush3.bf16.msra.mxu0 %v7062_v56  ;;  %v4141_v52 = vshll.u32 %v5744_v12, 16  ;;  %v2357_v2 = vrot.slane %v2355_v3, 4  ;;  %v2360_v56 = vrot.slane %v2358_v13, 5  ;;  %v4612_v4 = vrot.slane %v9078_v1, 5  ;;  %v5797_v12 = vld [vmem:[%s7213_s10 + $0x90] sm:$0xe] }
 0x113   : > { %v4147_v50 = vshll.u32 %v8635_v31, 16  ;;  %v4151_v0 = vshrl.u32 %v8635_v31, 16  ;;  %v8652_v44 = vsel %vm7491_vm5, %v4607_v30, %v4608_v33  ;;  %v4615_v55 = vrot.slane %v9079_v24, 5  ;;  %v7055_v3 = vld [vmem:[%s7213_s10 + $0x30] sm:$0xff]  }
 0x114   : > { %6607 = vmatmul.mubr.bf16.gmra.mrb[16].mxu0 %v8490_v58  ;;  %v9080_v58 = vld [vmem:[#allocation15_spill] sm:$0xff]  ;;  %v4130_v48 = vor.u32 %v4129_v5, %v8621_v59  ;;  %v2361_v23 = vor.u32 %v2360_v56, %v2357_v2  ;;  %v4614_v47 = vrot.slane %v4612_v4, 4  ;;  %v4107_v14 = vrot.slane %v4106_v34, 4  ;;  %v8673_v13 = vld [vmem:[%s7213_s10 + $0xd4] sm:$0x1]  ;;  %v9081_v2 = vld [vmem:[#allocation10_spill] sm:$0xff] }
 0x115   : > { %6399 = vmatmul.mubr.bf16.vlgmr.msra.gmra.mrb[0].mxu1 %v7052_v40  ;;  %6610 = vmatprep.mubr.bf16.mxu0 %v8492_v35  ;;  %v5843_v35 = vcombine.low %v8643_v29, %v8652_v44  ;;  %v4097_v40 = vrot.slane %v4096_v62, 4  ;;  %v4135_v18 = vrot.slane %v4133_v19, 5  ;;  %v8665_v32 = vsel %vm7491_vm5, %v5812_v7, %v4612_v4  ;;  %v7057_v19 = vld [vmem:[%s7213_s10 + $0x3c] sm:$0xff]   ;;  %v7113_v1 = vld [vmem:[%s9016_s1 + $0x110] sm:$0xff]  }
 0x116   : > { %6678 = vmatpush3.bf16.msra.mxu1 %v9080_v58  ;;  %6402 = vmatprep.mubr.bf16.mxu1 %v7054_v39  ;;  %v4140_v28 = vrot.slane %v4138_v46, 4  ;;  %v4143_v33 = vrot.slane %v4141_v52, 5  ;;  %v2362_v39 = vrot.slane %v2361_v23, 4  ;;  %v8669_v5 = vsel %vm7491_vm5, %v4614_v47, %v4615_v55  ;;  %v7114_v47 = vld [vmem:[%s7213_s10 + $0x1c] sm:$0xf] }
 0x117   : > { %6671 = vmatprep.subr.bf16.mxu1 %v7112_v6  ;;  %v8675_v53 = vrot.slane %v4147_v50, 5  ;;  %v4153_v30 = vrot.slane %v4151_v0, 4  ;;  %v5844_v62 = vcombine.low %v8665_v32, %v8669_v5  ;;  %v5813_v34 = vrot.slane %v5797_v12, 9 }
 0x118   : > { %v4121_v7 = vrot.slane %v4120_v60, 4  ;;  %v4131_v46 = vrot.slane %v4130_v48, 4  ;;  %v2367_v52 = vsel %vm7245_vm2, %v2362_v39, %v7821_v11  ;;  %v4619_v56 = vrot.slane %v9081_v2, 5  ;;  %v9082_v11 = vld [vmem:[#allocation14_spill] sm:$0xff]  ;;  %v7058_v39 = vld [vmem:[%s7213_s10 + $0x48] sm:$0xff]  }
 0x119   : > { %v4102_v4 = vsel %vm7245_vm2, %v4097_v40, %v8521_v49  ;;  %v4112_v60 = vsel %vm7245_vm2, %v4107_v14, %v8610_v57  ;;  %v8693_v50 = vcombine.low %v2367_v52, %v2377_v16  ;;  %v4622_v0 = vrot.slane %v9082_v11, 5  ;;  %v5787_v57 = vld [vmem:[%s7213_s10 + $0x18] sm:$0xe]  ;;  %v5798_v16 = vld [vmem:[%s7213_s10 + $0x9c] sm:$0xe] }
 0x11a   : > { %6679 = vmatpush3.bf16.msra.mxu1 %v7112_v6  ;;  %v4144_v24 = vor.u32 %v4143_v33, %v4140_v28  ;;  %v4157_v55 = vshll.u32 %v8673_v13, 16  ;;  %v8700_v58 = vsel %vm7491_vm5, %v5813_v34, %v4619_v56  ;;  %v4621_v48 = vrot.slane %v4619_v56, 4  ;;  %v7115_v40 = vld [vmem:[%s9016_s1 + $0x118] sm:$0xff]   ;;  %v7116_v2 = vld [vmem:[%s7213_s10 + $0x20] sm:$0x1] }
 0x11b   : > { %6672 = vmatprep.subr.bf16.mxu1 %v7113_v1  ;;  %v4154_v49 = vor.u32 %v4153_v30, %v8675_v53  ;;  %v4136_v23 = vsel %vm7245_vm2, %v4131_v46, %v4135_v18  ;;  %v4549_v12 = vrot.slane %v7114_v47, 5  ;;  %v5776_v6 = vcombine.low %v4102_v4, %v4112_v60  ;;  %v9083_v34 = vld [vmem:[#allocation13_spill] sm:$0xff]  ;;  %v5799_v11 = vld [vmem:[%s7213_s10 + $0xa8] sm:$0xe] }
 0x11c   : > { %6611 = vmatmul.mubr.bf16.gmra.mrb[20].mxu0 %v8598_v36  ;;  %v4126_v36 = vsel %vm7245_vm2, %v4121_v7, %v8621_v59  ;;  %v4145_v14 = vrot.slane %v4144_v24, 4  ;;  %v4159_v28 = vrot.slane %v4157_v55, 5  ;;  %v5803_v18 = vrot.slane %v5787_v57, 9  ;;  %v7060_v46 = vld [vmem:[%s7213_s10 + $0x54] sm:$0xff]   ;;  %v5788_v55 = vld [vmem:[%s7213_s10 + $0x24] sm:$0xe] }
 0x11d   : > { %6403 = vmatmul.mubr.bf16.gmra.mrb[4].mxu1 %v7055_v3  ;;  %6614 = vmatprep.mubr.bf16.mxu0 %v8608_v22  ;;  %v8714_v22 = vsel %vm7491_vm5, %v4621_v48, %v4622_v0  ;;  %v5814_v33 = vrot.slane %v5798_v16, 9  ;;  %v5777_v3 = vcombine.low %v4126_v36, %v4136_v23  ;;  %v4155_v30 = vrot.slane %v4154_v49, 4  ;;  %v7118_v48 = vld [vmem:[%s7213_s10 + $0x28] sm:$0xf]  ;;  %v7119_v36 = vld [vmem:[%s7213_s10 + $0x34] sm:$0xf] }
 0x11e   : > { %6406 = vmatprep.mubr.bf16.mxu1 %v7057_v19  ;;  %6680 = vmatpush3.bf16.msra.mxu1 %v7113_v1  ;;  %v5845_v59 = vcombine.low %v8700_v58, %v8714_v22  ;;  %v4626_v19 = vrot.slane %v9083_v34, 5  ;;  %v4629_v7 = vrot.slane %v8403_v25, 5  ;;  %v4551_v52 = vrot.slane %v4549_v12, 4  ;;  %v7117_v1 = vld [vmem:[%s9016_s1 + $0x120] sm:$0xff]  }
 0x11f   : > { %6673 = vmatprep.subr.bf16.mxu1 %v7115_v40  ;;  %v4552_v56 = vrot.slane %v7116_v2, 5  ;;  %v4550_v25 = vsel %vm7491_vm5, %v5803_v18, %v4549_v12  ;;  %v4150_v0 = vsel %vm7245_vm2, %v4145_v14, %v8675_v53  ;;  %v4160_v24 = vsel %vm7245_vm2, %v4155_v30, %v4159_v28  ;;  %v5789_v12 = vld [vmem:[%s7213_s10 + $0x30] sm:$0xe]  ;;  %v7061_v30 = vld [vmem:[%s7213_s10 + $0x60] sm:$0xff]  }
 0x120   : > { %v8731_v4 = vsel %vm7491_vm5, %v5814_v33, %v4626_v19  ;;  %v4628_v60 = vrot.slane %v4626_v19, 4  ;;  %v4556_v49 = vrot.slane %v7118_v48, 5  ;;  %v4563_v23 = vrot.slane %v7119_v36, 5  ;;  %v7121_v33 = vld [vmem:[%s7213_s10 + $0x2c] sm:$0x1] }
 0x121   : > { %v4553_v16 = vsel %vm7491_vm5, %v4551_v52, %v4552_v56  ;;  %v5815_v47 = vrot.slane %v5799_v11, 9  ;;  %v5778_v28 = vcombine.low %v4150_v0, %v4160_v24  ;;  %v5804_v18 = vrot.slane %v5788_v55, 9  ;;  %v7063_v52 = vld [vmem:[%s7213_s10 + $0x6c] sm:$0xff]   ;;  %v5800_v11 = vld [vmem:[%s7213_s10 + $0xb4] sm:$0xe] }
 0x122   : > { %6681 = vmatpush3.bf16.msra.mxu1 %v7115_v40  ;;  %v8745_v57 = vsel %vm7491_vm5, %v4628_v60, %v4629_v7  ;;  %v9084_v40 = vld [vmem:[#allocation16_spill] sm:$0xff]  ;;  %v5835_v34 = vcombine.low %v4550_v25, %v4553_v16  ;;  %v4558_v19 = vrot.slane %v4556_v49, 4  ;;  %v5805_v2 = vrot.slane %v5789_v12, 9  ;;  %v5790_v0 = vld [vmem:[%s7213_s10 + $0x3c] sm:$0xe] }
 0x123   : > { %6674 = vmatprep.subr.bf16.mxu1 %v7117_v1  ;;  %v5846_v53 = vcombine.low %v8731_v4, %v8745_v57  ;;  %v4633_v14 = vrot.slane %v9084_v40, 5  ;;  %v4565_v56 = vrot.slane %v4563_v23, 4  ;;  %v7123_v24 = vld [vmem:[%s7213_s10 + $0x40] sm:$0xf]  ;;  %v4557_v48 = vsel %vm7491_vm5, %v5804_v18, %v4556_v49  ;;  %v7125_v18 = vld [vmem:[%s7213_s10 + $0x44] sm:$0x1] }
 0x124   : > { %6615 = vmatmul.mubr.bf16.gmra.mrb[24].mxu0 %v5776_v6  ;;  %v7120_v6 = vld [vmem:[%s9016_s1 + $0x128] sm:$0xff]   ;;  %v4570_v55 = vrot.slane %v7123_v24, 5  ;;  %v4640_v12 = vrot.slane %v8450_v10, 5  ;;  %v4564_v49 = vsel %vm7491_vm5, %v5805_v2, %v4563_v23  ;;  %v7126_v10 = vld [vmem:[%s9016_s1 + $0x138] sm:$0xff]   ;;  %v5801_v23 = vld [vmem:[%s7213_s10 + $0xc0] sm:$0xe] }
 0x125   : > { %6407 = vmatmul.mubr.bf16.gmra.mrb[8].mxu1 %v7058_v39  ;;  %6618 = vmatprep.mubr.bf16.mxu0 %v5777_v3  ;;  %v4559_v39 = vrot.slane %v7121_v33, 5  ;;  %v4636_v3 = vrot.slane %v8438_v21, 5  ;;  %v8762_v7 = vsel %vm7491_vm5, %v5815_v47, %v4633_v14  ;;  %v7124_v21 = vld [vmem:[%s9016_s1 + $0x130] sm:$0xff]   ;;  %v5816_v47 = vrot.slane %v5800_v11, 9 }
 0x126   : > { %6410 = vmatprep.mubr.bf16.mxu1 %v7060_v46  ;;  %6682 = vmatpush3.bf16.msra.mxu1 %v7117_v1  ;;  %v4635_v46 = vrot.slane %v4633_v14, 4  ;;  %v7122_v1 = vld [vmem:[%s7213_s10 + $0x38] sm:$0x1]  ;;  %v5806_v14 = vrot.slane %v5790_v0, 9  ;;  %v4573_v33 = vrot.slane %v7125_v18, 5  ;;  %v4647_v11 = vrot.slane %v8532_v51, 5 }
 0x127   : > { %6675 = vmatprep.subr.bf16.mxu1 %v7120_v6  ;;  %v4566_v60 = vrot.slane %v7122_v1, 5  ;;  %v4560_v36 = vsel %vm7491_vm5, %v4558_v19, %v4559_v39  ;;  %v4642_v39 = vrot.slane %v4640_v12, 4  ;;  %v5491_v19 = vld [vmem:[%s7213_s10 + $0x6c] sm:$0xf]  ;;  %v7066_v18 = vld [vmem:[%s7213_s10 + $0x90] sm:$0xff]   ;;  %v2398_v20 = vshll.u32 %v7132_v63, 16 }
 0x128   : > { %v8774_v25 = vsel %vm7491_vm5, %v4635_v46, %v4636_v3  ;;  %v5836_v3 = vcombine.low %v4557_v48, %v4560_v36  ;;  %v4571_v1 = vsel %vm7491_vm5, %v5806_v14, %v4570_v55  ;;  %v2331_v0 = vshrl.u32 %v5491_v19, 16  ;;  %v5802_v51 = vld [vmem:[%s7213_s10 + $0xcc] sm:$0xe] }
 0x129   : > { %v5847_v16 = vcombine.low %v8762_v7, %v8774_v25  ;;  %v4567_v40 = vsel %vm7491_vm5, %v4565_v56, %v4566_v60  ;;  %v5817_v56 = vrot.slane %v5801_v23, 9  ;;  %v2334_v24 = vshll.u32 %v5491_v19, 16 }
 0x12a   : > { %6683 = vmatpush3.bf16.msra.mxu1 %v7120_v6  ;;  %v4643_v6 = vrot.slane %v8471_v27, 5  ;;  %v8794_v27 = vsel %vm7491_vm5, %v5816_v47, %v4640_v12  ;;  %v4650_v36 = vrot.slane %v8583_v26, 5  ;;  %v4649_v12 = vrot.slane %v4647_v11, 4 }
 0x12b   : > { %6676 = vmatprep.subr.bf16.mxu1 %v7124_v21  ;;  %v2336_v26 = vrot.slane %v2334_v24, 5  ;;  %v4657_v23 = vrot.slane %v8673_v13, 5 }
 0x12c   : > { %6619 = vmatmul.mubr.bf16.gmra.mrb[28].mxu0 %v5778_v28  ;;  %v4572_v28 = vrot.slane %v4570_v55, 4  ;;  %v8801_v46 = vsel %vm7491_vm5, %v4642_v39, %v4643_v6  ;;  %v8815_v55 = vsel %vm7491_vm5, %v5817_v56, %v4647_v11  ;;  %v4654_v39 = vrot.slane %v8635_v31, 5  ;;  %v7128_v56 = vld [vmem:[%s7213_s10 + $0x74] sm:$0x1] }
 0x12d   : > { %6411 = vmatmul.mubr.bf16.gmra.mrb[12].mxu1 %v7061_v30  ;;  %6638 = vmatprep.mubr.bf16.mxu0 %v5835_v34  ;;  %v7064_v30 = vld [vmem:[%s7213_s10 + $0x78] sm:$0xff]   ;;  %v5837_v34 = vcombine.low %v4564_v49, %v4567_v40  ;;  %v5848_v2 = vcombine.low %v8794_v27, %v8801_v46  ;;  %v8820_v49 = vsel %vm7491_vm5, %v4649_v12, %v4650_v36  ;;  %v2333_v40 = vrot.slane %v2331_v0, 4  ;;  %v7129_v0 = vld [vmem:[%s7213_s10 + $0x88] sm:$0xf] }
 0x12e   : > { %6414 = vmatprep.mubr.bf16.mxu1 %v7063_v52  ;;  %6684 = vmatpush3.bf16.msra.mxu1 %v7124_v21  ;;  %v7065_v52 = vld [vmem:[%s7213_s10 + $0x84] sm:$0xff]   ;;  %v4574_v60 = vsel %vm7491_vm5, %v4572_v28, %v4573_v33  ;;  %v7127_v21 = vld [vmem:[%s7213_s10 + $0x70] sm:$0xf]  ;;  %v5849_v28 = vcombine.low %v8815_v55, %v8820_v49  ;;  %v4656_v19 = vrot.slane %v4654_v39, 4  ;;  %v2388_v24 = vshll.u32 %v7129_v0, 16 }
 0x12f   : > { %6677 = vmatprep.subr.bf16.mxu1 %v7126_v10  ;;  %v2340_v48 = vshll.u32 %v7127_v21, 16  ;;  %v2344_v47 = vshrl.u32 %v7127_v21, 16  ;;  %v5838_v6 = vcombine.low %v4571_v1, %v4574_v60  ;;  %v2350_v1 = vshll.u32 %v7128_v56, 16 }
 0x130   : > { %v8842_v11 = vsel %vm7491_vm5, %v4656_v19, %v4657_v23  ;;  %v2392_v21 = vshrl.u32 %v7129_v0, 16  ;;  %v7131_v19 = vld [vmem:[%s7213_s10 + $0xa0] sm:$0xf] }
 0x131   : > { %v8822_v14 = vrot.slane %v2340_v48, 5  ;;  %v2346_v33 = vrot.slane %v2344_v47, 4  ;;  %v2440_v56 = vshrl.u32 %v7131_v19, 16 }
 0x132   : > { %6685 = vmatpush3.bf16.msra.mxu1 %v7126_v10  ;;  %v5818_v10 = vrot.slane %v5802_v51, 9 }
 0x133   : > { %v2347_v31 = vor.u32 %v2346_v33, %v8822_v14  ;;  %v2406_v33 = vshll.u32 %v5500_v61, 16 }
 0x134   : > { %6639 = vmatmul.mubr.bf16.vlgmr.msra.gmra.mrb[0].mxu0 %v5836_v3  ;;  %v7067_v3 = vld [vmem:[%s7213_s10 + $0x9c] sm:$0xff]  }
 0x135   : > { %6415 = vmatmul.mubr.bf16.gmra.mrb[16].mxu1 %v7064_v30  ;;  %6642 = vmatprep.mubr.bf16.mxu0 %v5837_v34  ;;  %v5497_v30 = vld [vmem:[%s7213_s10 + $0x84] sm:$0xf]  ;;  %v8833_v34 = vsel %vm7491_vm5, %v5818_v10, %v4654_v39  ;;  %v2348_v47 = vrot.slane %v2347_v31, 4  ;;  %v7130_v10 = vld [vmem:[%s7213_s10 + $0x94] sm:$0xf]  ;;  %v2408_v0 = vrot.slane %v2406_v33, 5 }
 0x136   : > { %6418 = vmatprep.mubr.bf16.mxu1 %v7065_v52  ;;  %v2337_v52 = vor.u32 %v2336_v26, %v2333_v40  ;;  %v2379_v13 = vshrl.u32 %v5497_v30, 16  ;;  %v2382_v60 = vshll.u32 %v5497_v30, 16  ;;  %v5850_v48 = vcombine.low %v8833_v34, %v8842_v11 }
 0x137   : > { %v8851_v40 = vrot.slane %v2388_v24, 5  ;;  %v2394_v26 = vrot.slane %v2392_v21, 4  ;;  %v2412_v39 = vshll.u32 %v7130_v10, 16  ;;  %v2416_v23 = vshrl.u32 %v7130_v10, 16  ;;  %v7134_v10 = vld [vmem:[%s7213_s10 + $0xa4] sm:$0x1] }
 0x138   : > { %v2338_v36 = vrot.slane %v2337_v52, 4  ;;  %v2381_v12 = vrot.slane %v2379_v13, 4  ;;  %v2384_v51 = vrot.slane %v2382_v60, 5  ;;  %v2436_v52 = vshll.u32 %v7131_v19, 16  ;;  %v7135_v19 = vld [vmem:[%s7213_s10 + $0xac] sm:$0xf] }
 0x139   : > { %v2395_v13 = vor.u32 %v2394_v26, %v8851_v40  ;;  %v8868_v41 = vrot.slane %v2412_v39, 5  ;;  %v2418_v42 = vrot.slane %v2416_v23, 4  ;;  %v2442_v21 = vrot.slane %v2440_v56, 4  ;;  %v5509_v23 = vld [vmem:[%s7213_s10 + $0xb4] sm:$0xf] }
 0x13a   : > { %v2446_v39 = vshll.u32 %v7134_v10, 16  ;;  %v2464_v15 = vshrl.u32 %v7135_v19, 16  ;;  %v2478_v63 = vshll.u32 %v5509_v23, 16 }
 0x13b   : > { %v2419_v26 = vor.u32 %v2418_v42, %v8868_v41 }
 0x13c   : > { %6643 = vmatmul.mubr.bf16.gmra.mrb[4].mxu0 %v5838_v6  ;;  %v5503_v6 = vld [vmem:[%s7213_s10 + $0x9c] sm:$0xf] }
 0x13d   : > { %6419 = vmatmul.mubr.bf16.gmra.mrb[20].mxu1 %v7066_v18  ;;  %6646 = vmatprep.mubr.bf16.mxu0 %v5839_v8  ;;  %v2352_v8 = vrot.slane %v2350_v1, 5  ;;  %v2403_v18 = vshrl.u32 %v5500_v61, 16  ;;  %v2430_v30 = vshll.u32 %v5503_v6, 16  ;;  %v2343_v1 = vsel %vm7245_vm2, %v2338_v36, %v8822_v14  ;;  %v7070_v61 = vld [vmem:[%s7213_s10 + $0xc0] sm:$0xff]  }
 0x13e   : > { %6422 = vmatprep.mubr.bf16.mxu1 %v7067_v3  ;;  %v2427_v3 = vshrl.u32 %v5503_v6, 16  ;;  %v8870_v14 = vrot.slane %v2436_v52, 5  ;;  %v2460_v52 = vshll.u32 %v7135_v19, 16 }
 0x13f   : > { %v2353_v31 = vsel %vm7245_vm2, %v2348_v47, %v2352_v8  ;;  %v2405_v60 = vrot.slane %v2403_v18, 4  ;;  %v2432_v24 = vrot.slane %v2430_v30, 5  ;;  %v2400_v8 = vrot.slane %v2398_v20, 5  ;;  %v7136_v20 = vld [vmem:[%s7213_s10 + $0xb8] sm:$0xf] }
 0x140   : > { %v2396_v47 = vrot.slane %v2395_v13, 4  ;;  %v2443_v33 = vor.u32 %v2442_v21, %v8870_v14  ;;  %v2484_v29 = vshll.u32 %v7136_v20, 16  ;;  %v2488_v44 = vshrl.u32 %v7136_v20, 16 }
 0x142   : > { %v2444_v13 = vrot.slane %v2443_v33, 4 }
 0x144   : > { %6647 = vmatmul.mubr.bf16.gmra.mrb[8].mxu0 %v5840_v54  ;;  %v2385_v54 = vor.u32 %v2384_v51, %v2381_v12  ;;  %v2409_v12 = vor.u32 %v2408_v0, %v2405_v60  ;;  %v7133_v51 = vld [vmem:[%s7213_s10 + $0x98] sm:$0x1]  ;;  %v2448_v60 = vrot.slane %v2446_v39, 5 }
 0x145   : > { %6423 = vmatmul.mubr.bf16.gmra.mrb[24].mxu1 %v7068_v45  ;;  %6650 = vmatprep.mubr.bf16.mxu0 %v5841_v17  ;;  %v2429_v17 = vrot.slane %v2427_v3, 4  ;;  %v5539_v45 = vcombine.low %v2343_v1, %v2353_v31  ;;  %v2422_v6 = vshll.u32 %v7133_v51, 16  ;;  %v2475_v31 = vshrl.u32 %v5509_v23, 16 }
 0x146   : > { %6426 = vmatprep.mubr.bf16.mxu1 %v7069_v9  ;;  %v2386_v36 = vrot.slane %v2385_v54, 4  ;;  %v5506_v9 = vld [vmem:[%s7213_s10 + $0xa8] sm:$0xf]  ;;  %v2410_v56 = vrot.slane %v2409_v12, 4  ;;  %v2449_v32 = vsel %vm7245_vm2, %v2444_v13, %v2448_v60 }
 0x147   : > { %v2433_v18 = vor.u32 %v2432_v24, %v2429_v17  ;;  %v2451_v3 = vshrl.u32 %v5506_v9, 16  ;;  %v2454_v30 = vshll.u32 %v5506_v9, 16  ;;  %v2424_v1 = vrot.slane %v2422_v6, 5 }
 0x148   : > { %v2391_v43 = vsel %vm7245_vm2, %v2386_v36, %v8851_v40  ;;  %v2462_v17 = vrot.slane %v2460_v52, 5  ;;  %v2466_v24 = vrot.slane %v2464_v15, 4  ;;  %v2477_v21 = vrot.slane %v2475_v31, 4  ;;  %v5512_v36 = vld [vmem:[%s7213_s10 + $0xc0] sm:$0xf] }
 0x149   : > { %v2434_v54 = vrot.slane %v2433_v18, 4  ;;  %v2453_v0 = vrot.slane %v2451_v3, 4  ;;  %v2456_v42 = vrot.slane %v2454_v30, 5  ;;  %v2499_v9 = vshrl.u32 %v5512_v36, 16  ;;  %v7138_v18 = vld [vmem:[%s7213_s10 + $0xc4] sm:$0xf] }
 0x14a   : > { %v2508_v33 = vshll.u32 %v7138_v18, 16 }
 0x14b   : > { %v2439_v51 = vsel %vm7245_vm2, %v2434_v54, %v8870_v14  ;;  %v2457_v5 = vor.u32 %v2456_v42, %v2453_v0  ;;  %v2512_v14 = vshrl.u32 %v7138_v18, 16  ;;  %v2501_v19 = vrot.slane %v2499_v9, 4 }
 0x14c   : > { %6651 = vmatmul.mubr.bf16.gmra.mrb[12].mxu0 %v5842_v38  ;;  %v2401_v38 = vsel %vm7245_vm2, %v2396_v47, %v2400_v8  ;;  %v2490_v8 = vrot.slane %v2488_v44, 4  ;;  %v2415_v47 = vsel %vm7245_vm2, %v2410_v56, %v8868_v41  ;;  %v7137_v41 = vld [vmem:[%s7213_s10 + $0xb0] sm:$0x1]  ;;  %v5543_v58 = vcombine.low %v2439_v51, %v2449_v32  ;;  %v7140_v44 = vld [vmem:[%s7213_s10 + $0xc8] sm:$0x1] }
 0x14d   : > { %6427 = vmatmul.mubr.bf16.gmra.mrb[28].mxu1 %v7070_v61  ;;  %6654 = vmatprep.mubr.bf16.mxu0 %v5843_v35  ;;  %v2420_v35 = vrot.slane %v2419_v26, 4  ;;  %v5541_v40 = vcombine.low %v2391_v43, %v2401_v38  ;;  %v2480_v61 = vrot.slane %v2478_v63, 5  ;;  %v2470_v6 = vshll.u32 %v7137_v41, 16 }
 0x14e   : > { %6462 = vmatprep.mubr.bf16.mxu1 %v5539_v45  ;;  %v2486_v45 = vrot.slane %v2484_v29, 5  ;;  %v2502_v26 = vshll.u32 %v5512_v36, 16  ;;  %v2458_v22 = vrot.slane %v2457_v5, 4  ;;  %v2510_v15 = vrot.slane %v2508_v33, 5 }
 0x14f   : > { %v2425_v12 = vsel %vm7245_vm2, %v2420_v35, %v2424_v1  ;;  %v2481_v10 = vor.u32 %v2480_v61, %v2477_v21  ;;  %v2472_v30 = vrot.slane %v2470_v6, 5  ;;  %v2514_v43 = vrot.slane %v2512_v14, 4 }
 0x150   : > { %v2491_v39 = vor.u32 %v2490_v8, %v2486_v45  ;;  %v5542_v3 = vcombine.low %v2415_v47, %v2425_v12  ;;  %v2504_v52 = vrot.slane %v2502_v26, 5  ;;  %v2463_v31 = vsel %vm7245_vm2, %v2458_v22, %v2462_v17  ;;  %v8952_v8 = vld [vmem:[%s9017_s2] ss:$0 sm:$0xff] }
 0x151   : > { %v2482_v38 = vrot.slane %v2481_v10, 4  ;;  %v2515_v29 = vor.u32 %v2514_v43, %v2510_v15  ;;  %v2518_v35 = vshll.u32 %v7140_v44, 16 }
 0x152   : > { %v2492_v56 = vrot.slane %v2491_v39, 4  ;;  %v2505_v20 = vor.u32 %v2504_v52, %v2501_v19 }
 0x153   : > { %v2487_v4 = vsel %vm7245_vm2, %v2482_v38, %v2486_v45  ;;  %v2520_v54 = vrot.slane %v2518_v35, 5 }
 0x154   : > { %6655 = vmatmul.mubr.bf16.gmra.mrb[16].mxu0 %v5844_v62  ;;  %v2467_v62 = vor.u32 %v2466_v24, %v2462_v17  ;;  %v2506_v25 = vrot.slane %v2505_v20, 4 }
 0x155   : > { %6463 = vmatmul.mubr.bf16.vlgmr.msra.gmra.mrb[16].mxu1 %v8693_v50  ;;  %6658 = vmatprep.mubr.bf16.mxu0 %v5845_v59  ;;  %v7139_v50 = vld [vmem:[%s7213_s10 + $0xbc] sm:$0x1] }
 0x156   : > { %6466 = vmatprep.mubr.bf16.mxu1 %v5541_v40  ;;  %v2494_v23 = vshll.u32 %v7139_v50, 16  ;;  %v2468_v59 = vrot.slane %v2467_v62, 4  ;;  %v2511_v13 = vsel %vm7245_vm2, %v2506_v25, %v2510_v15 }
 0x158   : > { %v2496_v1 = vrot.slane %v2494_v23, 5  ;;  %v2473_v63 = vsel %vm7245_vm2, %v2468_v59, %v2472_v30 }
 0x15a   : > { %v2497_v57 = vsel %vm7245_vm2, %v2492_v56, %v2496_v1 }
 0x15b   : > { %v5545_v7 = vcombine.low %v2487_v4, %v2497_v57 }
 0x15c   : > { %6659 = vmatmul.mubr.bf16.gmra.mrb[20].mxu0 %v5846_v53  ;;  %v5544_v53 = vcombine.low %v2463_v31, %v2473_v63 }
 0x15d   : > { %6467 = vmatmul.mubr.bf16.gmra.mrb[20].mxu1 %v5542_v3  ;;  %6662 = vmatprep.mubr.bf16.mxu0 %v5847_v16  ;;  %v2516_v16 = vrot.slane %v2515_v29, 4 }
 0x15e   : > { %6470 = vmatprep.mubr.bf16.mxu1 %v5543_v58 }
 0x15f   : > { %v2521_v60 = vsel %vm7245_vm2, %v2516_v16, %v2520_v54 }
 0x160   : > { %v5546_v0 = vcombine.low %v2511_v13, %v2521_v60 }
 0x164   : > { %6663 = vmatmul.mubr.bf16.gmra.mrb[24].mxu0 %v5848_v2 }
 0x165   : > { %6471 = vmatmul.mubr.bf16.gmra.mrb[24].mxu1 %v5544_v53  ;;  %6666 = vmatprep.mubr.bf16.mxu0 %v5849_v28 }
 0x166   : > { %6474 = vmatprep.mubr.bf16.mxu1 %v5545_v7 }
 0x16c   : > { %6667 = vmatmul.mubr.bf16.gmra.mrb[28].mxu0 %v5850_v48 }
 0x16d   : > { %6475 = vmatmul.mubr.bf16.gmra.mrb[28].mxu1 %v5546_v0 }
 0x1e8   : > { %v6400_v27 = vpop.f32.mrb[0].mxu1 }
 0x1e9   : > { %v1931_v46 = vpop.f32.mrb[1].mxu1 }
 0x1ea   : > { %v6401_v2 = vpop.f32.mrb[2].mxu1 }
 0x1eb   : > { %v1934_v42 = vpop.f32.mrb[3].mxu1 }
 0x1f0   : > { %v6404_v17 = vpop.f32.mrb[4].mxu1 }
 0x1f1   : > { %v1947_v55 = vpop.f32.mrb[5].mxu1 }
 0x1f2   : > { %v6405_v49 = vpop.f32.mrb[6].mxu1 }
 0x1f3   : > { %v1950_v28 = vpop.f32.mrb[7].mxu1 }
 0x1f8   : > { %v6408_v24 = vpop.f32.mrb[8].mxu1 }
 0x1f9   : > { %v1963_v40 = vpop.f32.mrb[9].mxu1 }
 0x1fa   : > { %v6409_v21 = vpop.f32.mrb[10].mxu1 }
 0x1fb   : > { %v1966_v61 = vpop.f32.mrb[11].mxu1 }
 0x200   : > { %v8941_v37 = vpop.f32.mrb[12].mxu1 }
 0x201   : > { %v8943_v45 = vpop.f32.mrb[13].mxu1 }
 0x202   : > { %v8945_v34 = vpop.f32.mrb[14].mxu1 }
 0x203   : > { %v8947_v11 = vpop.f32.mrb[15].mxu1 }
 0x207   : > { %v6640_v48 = vpop.f32.mrb[0].mxu0 }
 0x208   : > { %v6686_v36 = vadd.f32 %v6640_v48, %v6400_v27  ;;  %v4822_v47 = vpop.f32.mrb[1].mxu0 }
 0x209   : > { %v6687_v12 = vadd.f32 %v4822_v47, %v1931_v46  ;;  %v6641_v51 = vpop.f32.mrb[2].mxu0 }
 0x20a   : > { %v4990_v32 = vadd.f32 %v6686_v36, %v8952_v8  ;;  %v6688_v5 = vadd.f32 %v6641_v51, %v6401_v2  ;;  %v4825_v62 = vpop.f32.mrb[3].mxu0 }
 0x20b   : > { %v4988_v41 = vadd.f32 %v6687_v12, %v8952_v8  ;;  %v6689_v6 = vadd.f32 %v4825_v62, %v1934_v42 }
 0x20c   : > { %v4991_v9 = vadd.f32 %v6688_v5, %v8952_v8  ;;  %v5022_v18 = vmax.f32 %v4990_v32, 0.0 }
 0x20d   : > { %v4989_v26 = vadd.f32 %v6689_v6, %v8952_v8  ;;  %v5020_v14 = vmax.f32 %v4988_v41, 0.0 }
 0x20e   : > { %v5023_v33 = vmax.f32 %v4991_v9, 0.0 }
 0x20f   : > { %v5021_v10 = vmax.f32 %v4989_v26, 0.0  ;;  %v6644_v39 = vpop.f32.mrb[4].mxu0 }
 0x210   : > { %v5935_v50 = vpack.c.bf16 %v5023_v33, %v5022_v18  ;;  %v6690_v23 = vadd.f32 %v6644_v39, %v6404_v17  ;;  %v4838_v3 = vpop.f32.mrb[5].mxu0 }
 0x211   : > { %v5930_v58 = vpack.c.bf16 %v5021_v10, %v5020_v14  ;;  %v6691_v22 = vadd.f32 %v4838_v3, %v1947_v55  ;;  %v6645_v59 = vpop.f32.mrb[6].mxu0 }
 0x212   : > { %6007 = vst [vmem:[%s8962_s11 + $0x8] sm:$0xff] %v5935_v50   ;;  %v4994_v30 = vadd.f32 %v6690_v23, %v8952_v8  ;;  %v6692_v19 = vadd.f32 %v6645_v59, %v6405_v49  ;;  %v4841_v52 = vpop.f32.mrb[7].mxu0 }
 0x213   : > { %5931 = vst [vmem:[%s8962_s11] sm:$0xff] %v5930_v58   ;;  %v4992_v15 = vadd.f32 %v6691_v22, %v8952_v8  ;;  %v6693_v43 = vadd.f32 %v4841_v52, %v1950_v28 }
 0x214   : > { %v4995_v38 = vadd.f32 %v6692_v19, %v8952_v8  ;;  %v5026_v1 = vmax.f32 %v4994_v30, 0.0 }
 0x215   : > { %v4993_v56 = vadd.f32 %v6693_v43, %v8952_v8  ;;  %v5024_v63 = vmax.f32 %v4992_v15, 0.0 }
 0x216   : > { %v5027_v31 = vmax.f32 %v4995_v38, 0.0 }
 0x217   : > { %v5025_v20 = vmax.f32 %v4993_v56, 0.0  ;;  %v6648_v29 = vpop.f32.mrb[8].mxu0 }
 0x218   : > { %v5945_v44 = vpack.c.bf16 %v5027_v31, %v5026_v1  ;;  %v6694_v35 = vadd.f32 %v6648_v29, %v6408_v24  ;;  %v4854_v4 = vpop.f32.mrb[9].mxu0 }
 0x219   : > { %v5940_v57 = vpack.c.bf16 %v5025_v20, %v5024_v63  ;;  %v6695_v53 = vadd.f32 %v4854_v4, %v1963_v40  ;;  %v6649_v7 = vpop.f32.mrb[10].mxu0 }
 0x21a   : > { %6009 = vst [vmem:[%s8962_s11 + $0x18] sm:$0xff] %v5945_v44   ;;  %v4998_v25 = vadd.f32 %v6694_v35, %v8952_v8  ;;  %v6696_v16 = vadd.f32 %v6649_v7, %v6409_v21  ;;  %v4857_v54 = vpop.f32.mrb[11].mxu0 }
 0x21b   : > { %6008 = vst [vmem:[%s8962_s11 + $0x10] sm:$0xff] %v5940_v57   ;;  %v4996_v13 = vadd.f32 %v6695_v53, %v8952_v8  ;;  %v6697_v60 = vadd.f32 %v4857_v54, %v1966_v61 }
 0x21c   : > { %v4999_v0 = vadd.f32 %v6696_v16, %v8952_v8  ;;  %v5030_v46 = vmax.f32 %v4998_v25, 0.0 }
 0x21d   : > { %v4997_v27 = vadd.f32 %v6697_v60, %v8952_v8  ;;  %v5028_v42 = vmax.f32 %v4996_v13, 0.0 }
 0x21e   : > { %v5031_v2 = vmax.f32 %v4999_v0, 0.0 }
 0x21f   : > { %v5029_v17 = vmax.f32 %v4997_v27, 0.0  ;;  %v6652_v55 = vpop.f32.mrb[12].mxu0 }
 0x220   : > { %v5955_v49 = vpack.c.bf16 %v5031_v2, %v5030_v46  ;;  %v6698_v28 = vadd.f32 %v6652_v55, %v8941_v37  ;;  %v4870_v24 = vpop.f32.mrb[13].mxu0 }
 0x221   : > { %v5950_v40 = vpack.c.bf16 %v5029_v17, %v5028_v42  ;;  %v6699_v21 = vadd.f32 %v4870_v24, %v8943_v45  ;;  %v6653_v48 = vpop.f32.mrb[14].mxu0 }
 0x222   : > { %6011 = vst [vmem:[%s8962_s11 + $0x28] sm:$0xff] %v5955_v49   ;;  %v5002_v61 = vadd.f32 %v6698_v28, %v8952_v8  ;;  %v6700_v36 = vadd.f32 %v6653_v48, %v8945_v34  ;;  %v4873_v47 = vpop.f32.mrb[15].mxu0 }
 0x223   : > { %6010 = vst [vmem:[%s8962_s11 + $0x20] sm:$0xff] %v5950_v40   ;;  %v5000_v12 = vadd.f32 %v6699_v21, %v8952_v8  ;;  %v6701_v51 = vadd.f32 %v4873_v47, %v8947_v11 }
 0x224   : > { %v5003_v32 = vadd.f32 %v6700_v36, %v8952_v8  ;;  %v5034_v5 = vmax.f32 %v5002_v61, 0.0 }
 0x225   : > { %v5001_v37 = vadd.f32 %v6701_v51, %v8952_v8  ;;  %v5032_v62 = vmax.f32 %v5000_v12, 0.0 }
 0x226   : > { %v5035_v45 = vmax.f32 %v5003_v32, 0.0 }
 0x227   : > { %v5033_v41 = vmax.f32 %v5001_v37, 0.0  ;;  %v6656_v6 = vpop.f32.mrb[16].mxu0 }
 0x228   : > { %v5965_v9 = vpack.c.bf16 %v5035_v45, %v5034_v5  ;;  %v6464_v26 = vpop.f32.mrb[16].mxu1  ;;  %v4886_v34 = vpop.f32.mrb[17].mxu0 }
 0x229   : > { %v5960_v18 = vpack.c.bf16 %v5033_v41, %v5032_v62  ;;  %v6702_v33 = vadd.f32 %v6656_v6, %v6464_v26  ;;  %v2749_v14 = vpop.f32.mrb[17].mxu1  ;;  %v6657_v10 = vpop.f32.mrb[18].mxu0 }
 0x22a   : > { %6013 = vst [vmem:[%s8962_s11 + $0x38] sm:$0xff] %v5965_v9   ;;  %v6703_v39 = vadd.f32 %v4886_v34, %v2749_v14  ;;  %v6465_v11 = vpop.f32.mrb[18].mxu1  ;;  %v4889_v50 = vpop.f32.mrb[19].mxu0 }
 0x22b   : > { %6012 = vst [vmem:[%s8962_s11 + $0x30] sm:$0xff] %v5960_v18   ;;  %v5006_v23 = vadd.f32 %v6702_v33, %v8952_v8  ;;  %v6704_v3 = vadd.f32 %v6657_v10, %v6465_v11  ;;  %v2752_v58 = vpop.f32.mrb[19].mxu1 }
 0x22c   : > { %v5004_v22 = vadd.f32 %v6703_v39, %v8952_v8  ;;  %v6705_v59 = vadd.f32 %v4889_v50, %v2752_v58 }
 0x22d   : > { %v5007_v30 = vadd.f32 %v6704_v3, %v8952_v8  ;;  %v5038_v52 = vmax.f32 %v5006_v23, 0.0 }
 0x22e   : > { %v5005_v19 = vadd.f32 %v6705_v59, %v8952_v8  ;;  %v5036_v38 = vmax.f32 %v5004_v22, 0.0 }
 0x22f   : > { %v5039_v15 = vmax.f32 %v5007_v30, 0.0  ;;  %v6660_v43 = vpop.f32.mrb[20].mxu0 }
 0x230   : > { %v5037_v56 = vmax.f32 %v5005_v19, 0.0  ;;  %v6468_v1 = vpop.f32.mrb[20].mxu1  ;;  %v4902_v31 = vpop.f32.mrb[21].mxu0 }
 0x231   : > { %v5975_v63 = vpack.c.bf16 %v5039_v15, %v5038_v52  ;;  %v6706_v20 = vadd.f32 %v6660_v43, %v6468_v1  ;;  %v2765_v29 = vpop.f32.mrb[21].mxu1  ;;  %v6661_v44 = vpop.f32.mrb[22].mxu0 }
 0x232   : > { %v5970_v35 = vpack.c.bf16 %v5037_v56, %v5036_v38  ;;  %v6707_v4 = vadd.f32 %v4902_v31, %v2765_v29  ;;  %v6469_v57 = vpop.f32.mrb[22].mxu1  ;;  %v4905_v53 = vpop.f32.mrb[23].mxu0 }
 0x233   : > { %6015 = vst [vmem:[%s8962_s11 + $0x48] sm:$0xff] %v5975_v63   ;;  %v5010_v7 = vadd.f32 %v6706_v20, %v8952_v8  ;;  %v6708_v25 = vadd.f32 %v6661_v44, %v6469_v57  ;;  %v2768_v16 = vpop.f32.mrb[23].mxu1 }
 0x234   : > { %6014 = vst [vmem:[%s8962_s11 + $0x40] sm:$0xff] %v5970_v35   ;;  %v5008_v54 = vadd.f32 %v6707_v4, %v8952_v8  ;;  %v6709_v13 = vadd.f32 %v4905_v53, %v2768_v16 }
 0x235   : > { %v5011_v60 = vadd.f32 %v6708_v25, %v8952_v8  ;;  %v5042_v27 = vmax.f32 %v5010_v7, 0.0 }
 0x236   : > { %v5009_v0 = vadd.f32 %v6709_v13, %v8952_v8  ;;  %v5040_v42 = vmax.f32 %v5008_v54, 0.0 }
 0x237   : > { %v5043_v46 = vmax.f32 %v5011_v60, 0.0  ;;  %v6664_v2 = vpop.f32.mrb[24].mxu0 }
 0x238   : > { %v5041_v17 = vmax.f32 %v5009_v0, 0.0  ;;  %v6472_v55 = vpop.f32.mrb[24].mxu1  ;;  %v4918_v49 = vpop.f32.mrb[25].mxu0 }
 0x239   : > { %v5985_v28 = vpack.c.bf16 %v5043_v46, %v5042_v27  ;;  %v6710_v24 = vadd.f32 %v6664_v2, %v6472_v55  ;;  %v2781_v40 = vpop.f32.mrb[25].mxu1  ;;  %v6665_v21 = vpop.f32.mrb[26].mxu0 }
 0x23a   : > { %v5980_v48 = vpack.c.bf16 %v5041_v17, %v5040_v42  ;;  %v6711_v61 = vadd.f32 %v4918_v49, %v2781_v40  ;;  %v6473_v36 = vpop.f32.mrb[26].mxu1  ;;  %v4921_v47 = vpop.f32.mrb[27].mxu0 }
 0x23b   : > { %6017 = vst [vmem:[%s8962_s11 + $0x58] sm:$0xff] %v5985_v28   ;;  %v5014_v12 = vadd.f32 %v6710_v24, %v8952_v8  ;;  %v6712_v51 = vadd.f32 %v6665_v21, %v6473_v36  ;;  %v2784_v32 = vpop.f32.mrb[27].mxu1 }
 0x23c   : > { %6016 = vst [vmem:[%s8962_s11 + $0x50] sm:$0xff] %v5980_v48   ;;  %v5012_v37 = vadd.f32 %v6711_v61, %v8952_v8  ;;  %v6713_v5 = vadd.f32 %v4921_v47, %v2784_v32 }
 0x23d   : > { %v5015_v45 = vadd.f32 %v6712_v51, %v8952_v8  ;;  %v5046_v41 = vmax.f32 %v5014_v12, 0.0 }
 0x23e   : > { %v5013_v62 = vadd.f32 %v6713_v5, %v8952_v8  ;;  %v5044_v26 = vmax.f32 %v5012_v37, 0.0 }
 0x23f   : > { %v5047_v6 = vmax.f32 %v5015_v45, 0.0  ;;  %v6668_v9 = vpop.f32.mrb[28].mxu0 }
 0x240   : > { %v5045_v34 = vmax.f32 %v5013_v62, 0.0  ;;  %v6476_v18 = vpop.f32.mrb[28].mxu1  ;;  %v4934_v33 = vpop.f32.mrb[29].mxu0 }
 0x241   : > { %v5995_v14 = vpack.c.bf16 %v5047_v6, %v5046_v41  ;;  %v6714_v10 = vadd.f32 %v6668_v9, %v6476_v18  ;;  %v2797_v39 = vpop.f32.mrb[29].mxu1  ;;  %v6669_v11 = vpop.f32.mrb[30].mxu0 }
 0x242   : > { %v5990_v50 = vpack.c.bf16 %v5045_v34, %v5044_v26  ;;  %v6715_v23 = vadd.f32 %v4934_v33, %v2797_v39  ;;  %v6477_v3 = vpop.f32.mrb[30].mxu1  ;;  %v4937_v58 = vpop.f32.mrb[31].mxu0 }
 0x243   : > { %6019 = vst [vmem:[%s8962_s11 + $0x68] sm:$0xff] %v5995_v14   ;;  %v5018_v22 = vadd.f32 %v6714_v10, %v8952_v8  ;;  %v6716_v59 = vadd.f32 %v6669_v11, %v6477_v3  ;;  %v2800_v30 = vpop.f32.mrb[31].mxu1 }
 0x244   : > { %6018 = vst [vmem:[%s8962_s11 + $0x60] sm:$0xff] %v5990_v50   ;;  %v5016_v19 = vadd.f32 %v6715_v23, %v8952_v8  ;;  %v6717_v52 = vadd.f32 %v4937_v58, %v2800_v30 }
 0x245   : > { %v5019_v15 = vadd.f32 %v6716_v59, %v8952_v8  ;;  %v5050_v38 = vmax.f32 %v5018_v22, 0.0 }
 0x246   : > { %v5017_v43 = vadd.f32 %v6717_v52, %v8952_v8  ;;  %v5048_v1 = vmax.f32 %v5016_v19, 0.0 }
 0x247   : > { %v5051_v56 = vmax.f32 %v5019_v15, 0.0 }
 0x248   : > { %v5049_v31 = vmax.f32 %v5017_v43, 0.0 }
 0x249   : > { %v6005_v63 = vpack.c.bf16 %v5051_v56, %v5050_v38 }
 0x24a   : > { %v6000_v20 = vpack.c.bf16 %v5049_v31, %v5048_v1 }
 0x24b   : > { %6021 = vst [vmem:[%s8962_s11 + $0x78] sm:$0xff] %v6005_v63  }
 0x24c   : > { %6020 = vst [vmem:[%s8962_s11 + $0x70] sm:$0xff] %v6000_v20  }
 0x24d PF: > { %s13_s12 = sadd.s32 1, %s7147_s12  }
 0x24e   : > { %p10_p4 = scmp.ge.s32.totalorder %s13_s12, 4  }
 0x250   :  { %12 = sbr.rel (!%p10_p4) target bundleno = 1 (0x1), region = 72 }

</bundles_post_ra>
